<compile_context>
chip_gen: v6e
topology: v6e:2x2x1
jax: 0.10.0
libtpu: 0.0.40
codegen_flags: <defaults>
</compile_context>

<pallas_src>
import numpy as np
import jax
import jax.numpy as jnp
from jax import lax
from jax.experimental import pallas as pl
from jax.experimental.pallas import tpu as pltpu

_VMEM_LIMIT = 32 * 1024 * 1024  # safe on v5e / v6e / v7x scoped-VMEM budgets


# ---------------------------------------------------------------------------
# Kernel 1: conv1 (1->64, 3x3, valid) + bias + relu + 2x2 maxpool.
# ---------------------------------------------------------------------------
def _conv1_pool1_kernel(xd_ref, r0_ref, r1_ref, b1_ref, o_ref):
    xe = xd_ref[0, 0]                       # even input rows  (14, 28) f32
    xo = xd_ref[0, 1]                       # odd  input rows  (14, 28) f32
    # lhs row ph packs the 3 input rows feeding conv row 2*ph (lhs0) and
    # 2*ph+1 (lhs1): K = 3*28 = 84.
    lhs0 = jnp.concatenate([xe[0:13], xo[0:13], xe[1:14]], axis=1)
    lhs1 = jnp.concatenate([xo[0:13], xe[1:14], xo[1:14]], axis=1)
    lhs0 = lhs0.astype(jnp.bfloat16)
    lhs1 = lhs1.astype(jnp.bfloat16)
    r0 = r0_ref[...]                        # (84, 832) bf16  (even conv cols)
    r1 = r1_ref[...]                        # (84, 832) bf16  (odd  conv cols)
    z00 = jnp.dot(lhs0, r0, preferred_element_type=jnp.float32)
    z01 = jnp.dot(lhs0, r1, preferred_element_type=jnp.float32)
    z10 = jnp.dot(lhs1, r0, preferred_element_type=jnp.float32)
    z11 = jnp.dot(lhs1, r1, preferred_element_type=jnp.float32)
    z = jnp.maximum(jnp.maximum(z00, z01), jnp.maximum(z10, z11))  # 2x2 pool
    a = jnp.maximum(z + b1_ref[...], 0.0)                          # bias+relu
    o_ref[0] = a.astype(o_ref.dtype)        # (13, 832) lane-dense bf16


def conv1_pool1(xd, r0, r1, b1t):
    B = xd.shape[0]
    return pl.pallas_call(
        _conv1_pool1_kernel,
        out_shape=jax.ShapeDtypeStruct((B, 13, 832), jnp.bfloat16),
        grid=(B,),
        in_specs=[
            pl.BlockSpec((1, 2, 14, 28), lambda b: (b, 0, 0, 0)),
            pl.BlockSpec((84, 832), lambda b: (0, 0)),     # resident weights
            pl.BlockSpec((84, 832), lambda b: (0, 0)),
            pl.BlockSpec((1, 832), lambda b: (0, 0)),
        ],
        out_specs=pl.BlockSpec((1, 13, 832), lambda b: (b, 0, 0)),
        compiler_params=pltpu.CompilerParams(
            dimension_semantics=("parallel",),
            vmem_limit_bytes=_VMEM_LIMIT),
    )(xd, r0, r1, b1t)


# ---------------------------------------------------------------------------
# Kernel 2: conv2 (64->128, 3x3, valid) + bias + relu + 2x2 maxpool.
# ---------------------------------------------------------------------------
def _conv2_pool2_kernel(a1_ref, w2_ref, b2_ref, o_ref, yh_ref):
    a1 = a1_ref[0]                          # (13, 13, 64) bf16, NHWC tile
    # In-kernel im2col: only conv rows/cols 0..9 feed the floor-mode 2x2 pool,
    # so assemble (10, 10, 9*64) patches directly (VMEM only, no HBM blowup).
    taps = [a1[di:di + 10, dj:dj + 10, :]
            for di in range(3) for dj in range(3)]
    patches = jnp.concatenate(taps, axis=-1)            # (10, 10, 576) bf16
    w2 = w2_ref[...]                                    # (576, 128) bf16
    for ph in range(5):                                 # height-pooled rows
        ya = jnp.dot(patches[2 * ph], w2, preferred_element_type=jnp.float32)
        yb = jnp.dot(patches[2 * ph + 1], w2, preferred_element_type=jnp.float32)
        yh_ref[ph * 10:(ph + 1) * 10, :] = jnp.maximum(ya, yb)    # (10, 128)
    # Width pool: adjacent row pairs of the (50, 128) scratch (stride-2 reads).
    pooled = jnp.maximum(yh_ref[pl.ds(0, 25, 2), :],
                         yh_ref[pl.ds(1, 25, 2), :])              # (25, 128)
    o_ref[0] = jnp.maximum(pooled + b2_ref[...], 0.0).astype(o_ref.dtype)


def conv2_pool2(a1, w2, b2):
    B = a1.shape[0]
    return pl.pallas_call(
        _conv2_pool2_kernel,
        out_shape=jax.ShapeDtypeStruct((B, 25, 128), jnp.bfloat16),
        grid=(B,),
        in_specs=[
            pl.BlockSpec((1, 13, 13, 64), lambda b: (b, 0, 0, 0)),
            pl.BlockSpec((576, 128), lambda b: (0, 0)),
            pl.BlockSpec((1, 128), lambda b: (0, 0)),
        ],
        out_specs=pl.BlockSpec((1, 25, 128), lambda b: (b, 0, 0)),
        scratch_shapes=[pltpu.VMEM((50, 128), jnp.float32)],
        compiler_params=pltpu.CompilerParams(
            dimension_semantics=("parallel",),
            vmem_limit_bytes=_VMEM_LIMIT),
    )(a1, w2, b2)


# ---------------------------------------------------------------------------
# Kernel 3: fc1 + relu + fc2 (fused), M (batch) tiled, lane-dense N=128 out.
# ---------------------------------------------------------------------------
def _fc_kernel(x_ref, w1_ref, b1_ref, w2_ref, b2_ref, o_ref):
    h = jnp.dot(x_ref[...], w1_ref[...], preferred_element_type=jnp.float32)
    h = jnp.maximum(h + b1_ref[...], 0.0)
    y = jnp.dot(h.astype(jnp.bfloat16), w2_ref[...],
                preferred_element_type=jnp.float32)
    o_ref[...] = y + b2_ref[...]


def fc_head(a2, p):
    B = a2.shape[0]
    if B <= 256:                 # single full-batch tile
        tm, bp, a2p = B, B, a2
    else:                        # tile M for large batches (padded)
        tm = 256
        bp = ((B + tm - 1) // tm) * tm
        a2p = jnp.pad(a2, ((0, bp - B), (0, 0)))
    out = pl.pallas_call(
        _fc_kernel,
        out_shape=jax.ShapeDtypeStruct((bp, 128), jnp.float32),
        grid=(bp // tm,),
        in_specs=[
            pl.BlockSpec((tm, 3200), lambda m: (m, 0)),
            pl.BlockSpec((3200, 256), lambda m: (0, 0)),   # resident bf16 fc1
            pl.BlockSpec((1, 256), lambda m: (0, 0)),
            pl.BlockSpec((256, 128), lambda m: (0, 0)),    # fc2 padded to 128
            pl.BlockSpec((1, 128), lambda m: (0, 0)),
        ],
        out_specs=pl.BlockSpec((tm, 128), lambda m: (m, 0)),
        compiler_params=pltpu.CompilerParams(
            dimension_semantics=("parallel",),
            vmem_limit_bytes=_VMEM_LIMIT),
    )(a2p, p["wfc1"], p["bfc1"], p["wfc2"], p["bfc2"])
    return out[:B]


# ---------------------------------------------------------------------------
# Forward pass (only free reshapes + tiny slicing remain in XLA glue).
# ---------------------------------------------------------------------------
def snn_forward(x_nchw, p):
    B = x_nchw.shape[0]
    xs = x_nchw.reshape(B, 28, 28)
    # Even/odd input-row split (pure re-layout, no duplication): the fused
    # conv1+pool1 kernel consumes rows by parity so it needs no strided loads.
    xd = jnp.stack([xs[:, 0::2, :], xs[:, 1::2, :]], axis=1)     # (B,2,14,28)
    a1 = conv1_pool1(xd, p["r0"], p["r1"], p["b1t"])             # (B,13,832)
    a1 = a1.reshape(B, 13, 13, 64)       # free: identical HBM byte order (NHWC)
    a2 = conv2_pool2(a1, p["w2"], p["b2"])                       # (B,25,128)
    a2 = a2.reshape(B, 25 * 128)         # free: NHWC flatten
    logits = fc_head(a2, p)                                      # (B,128) f32
    return logits[:, :10]


# ---------------------------------------------------------------------------
# Parameters
# ---------------------------------------------------------------------------
def init_params(key):
    """Synthetic weights with PyTorch-default init scales and torch layouts.

    conv weights are HWIO; fc weights are (in, out) == torch weight.T; fc1's
    rows follow torch's NCHW flatten order (c, h, w)."""
    ks = jax.random.split(key, 8)

    def u(k, shape, fan_in):
        bound = 1.0 / np.sqrt(fan_in)
        return jax.random.uniform(k, shape, jnp.float32, -bound, bound)

    return {
        "w1_hwio": u(ks[0], (3, 3, 1, 64), 9),
        "b1": u(ks[1], (64,), 9),
        "w2_hwio": u(ks[2], (3, 3, 64, 128), 576),
        "b2": u(ks[3], (128,), 576),
        "wfc1_chw": u(ks[4], (3200, 256), 3200),
        "bfc1": u(ks[5], (256,), 3200),
        "wfc2": u(ks[6], (256, 10), 256),
        "bfc2": u(ks[7], (10,), 256),
    }


def prepare_params(raw):
    """Host-side (numpy) one-time repack of torch-layout weights into the
    kernel-ready forms (banded conv1 matrices, flat conv2 weight, permuted fc1
    rows, lane-padded fc2)."""
    w1 = np.asarray(raw["w1_hwio"], np.float32)[:, :, 0, :]       # (3,3,64)
    b1 = np.asarray(raw["b1"], np.float32)
    # Banded conv1 matrices: R[par][di*28 + j, pw*64 + c] = w1[di, dj, c]
    # with j = 2*pw + par + dj (par = pooled-column parity).
    R = np.zeros((2, 84, 13 * 64), np.float32)
    for par in range(2):
        for di in range(3):
            for pw in range(13):
                for dj in range(3):
                    j = 2 * pw + par + dj
                    R[par, di * 28 + j, pw * 64:(pw + 1) * 64] = w1[di, dj, :]
    b1t = np.tile(b1, 13).reshape(1, 13 * 64)

    w2 = np.asarray(raw["w2_hwio"], np.float32).reshape(9 * 64, 128)
    b2 = np.asarray(raw["b2"], np.float32).reshape(1, 128)

    # Permute fc1 rows from torch's (c, h, w) flatten order to the NHWC
    # (h, w, c) order produced by the conv2 kernel -> no transpose in forward.
    wfc1 = np.asarray(raw["wfc1_chw"], np.float32)
    wfc1 = wfc1.reshape(128, 5, 5, 256).transpose(1, 2, 0, 3).reshape(3200, 256)
    bfc1 = np.asarray(raw["bfc1"], np.float32).reshape(1, 256)

    # Pad fc2 to N=128 so the final store is lane-dense; valid cols sliced out.
    wfc2 = np.zeros((256, 128), np.float32)
    wfc2[:, :10] = np.asarray(raw["wfc2"], np.float32)
    bfc2 = np.zeros((1, 128), np.float32)
    bfc2[0, :10] = np.asarray(raw["bfc2"], np.float32)

    return {
        "r0": jnp.asarray(R[0], jnp.bfloat16),
        "r1": jnp.asarray(R[1], jnp.bfloat16),
        "b1t": jnp.asarray(b1t, jnp.float32),
        "w2": jnp.asarray(w2, jnp.bfloat16),
        "b2": jnp.asarray(b2, jnp.float32),
        "wfc1": jnp.asarray(wfc1, jnp.bfloat16),
        "bfc1": jnp.asarray(bfc1, jnp.float32),
        "wfc2": jnp.asarray(wfc2, jnp.bfloat16),
        "bfc2": jnp.asarray(bfc2, jnp.float32),
    }


# ---------------------------------------------------------------------------
# Pure-JAX f32 reference with exact PyTorch semantics (for validation).
# ---------------------------------------------------------------------------
def reference_forward(x, raw):
    hi = lax.Precision.HIGHEST
    w1 = jnp.transpose(raw["w1_hwio"], (3, 2, 0, 1))   # OIHW
    w2 = jnp.transpose(raw["w2_hwio"], (3, 2, 0, 1))
    y = lax.conv_general_dilated(x, w1, (1, 1), "VALID",
                                 dimension_numbers=("NCHW", "OIHW", "NCHW"),
                                 precision=hi)
    y = jnp.maximum(y + raw["b1"][None, :, None, None], 0.0)
    y = lax.reduce_window(y, -jnp.inf, lax.max, (1, 1, 2, 2), (1, 1, 2, 2), "VALID")
    y = lax.conv_general_dilated(y, w2, (1, 1), "VALID",
                                 dimension_numbers=("NCHW", "OIHW", "NCHW"),
                                 precision=hi)
    y = jnp.maximum(y + raw["b2"][None, :, None, None], 0.0)
    y = lax.reduce_window(y, -jnp.inf, lax.max, (1, 1, 2, 2), (1, 1, 2, 2), "VALID")
    y = y.reshape(x.shape[0], 128 * 5 * 5)              # torch NCHW flatten
    y = jnp.maximum(jnp.dot(y, raw["wfc1_chw"], precision=hi) + raw["bfc1"], 0.0)
    return jnp.dot(y, raw["wfc2"], precision=hi) + raw["bfc2"]


if __name__ == "__main__":
    key = jax.random.PRNGKey(0)
    kx, kp = jax.random.split(key)
    # Spatial 28x28, 1 channel are dictated by fc1's in_features = 128*5*5.
    x = jax.random.normal(kx, (2, 1, 28, 28), dtype=jnp.float32)
    raw = init_params(kp)
    params = prepare_params(raw)

    fwd = jax.jit(snn_forward)
    out = jax.block_until_ready(fwd(x, params))

    assert out.shape == (2, 10), out.shape
    assert bool(jnp.all(jnp.isfinite(out)))

    # Validate against the f32 reference (bf16 MXU operands -> loose tolerance).
    ref = jax.block_until_ready(jax.jit(reference_forward)(x, raw))
    rel = float(jnp.max(jnp.abs(out - ref))) / (float(jnp.max(jnp.abs(ref))) + 1e-6)
    assert rel < 0.1, f"relative error vs reference too large: {rel}"

    print("KERNEL_OK")
</pallas_src>

<mosaic_0001>
module attributes {stable_mosaic.version = 11 : i64} {
  func.func @_conv1_pool1_kernel(%arg0: i32, %arg1: memref<1x2x14x28xf32, #tpu.memory_space<vmem>>, %arg2: memref<84x832xbf16, #tpu.memory_space<vmem>>, %arg3: memref<84x832xbf16, #tpu.memory_space<vmem>>, %arg4: memref<1x832xf32, #tpu.memory_space<vmem>>, %arg5: memref<1x13x832xbf16, #tpu.memory_space<vmem>>) attributes {dimension_semantics = [#tpu.dimension_semantics<parallel>], iteration_bounds = array<i64: 2>, scalar_prefetch = 0 : i64, scratch_operands = 0 : i64, tpu.core_type = #tpu.core_type<tc>, window_params = [{transform_indices = @transform_0, window_bounds = array<i64: 1, 2, 14, 28>}, {pipeline_mode = #tpu.pipeline_mode<synchronous>, transform_indices = @transform_1, window_bounds = array<i64: 84, 832>}, {pipeline_mode = #tpu.pipeline_mode<synchronous>, transform_indices = @transform_2, window_bounds = array<i64: 84, 832>}, {pipeline_mode = #tpu.pipeline_mode<synchronous>, transform_indices = @transform_3, window_bounds = array<i64: 1, 832>}, {transform_indices = @transform_4, window_bounds = array<i64: 1, 13, 832>}]} {
    %c0 = arith.constant 0 : index
    %c0_0 = arith.constant 0 : index
    %c0_1 = arith.constant 0 : index
    %c0_2 = arith.constant 0 : index
    %0 = vector.load %arg1[%c0, %c0_0, %c0_1, %c0_2] : memref<1x2x14x28xf32, #tpu.memory_space<vmem>>, vector<1x1x14x28xf32>
    %1 = vector.shape_cast %0 : vector<1x1x14x28xf32> to vector<14x28xf32>
    %c0_3 = arith.constant 0 : index
    %c1 = arith.constant 1 : index
    %c0_4 = arith.constant 0 : index
    %c0_5 = arith.constant 0 : index
    %2 = vector.load %arg1[%c0_3, %c1, %c0_4, %c0_5] : memref<1x2x14x28xf32, #tpu.memory_space<vmem>>, vector<1x1x14x28xf32>
    %3 = vector.shape_cast %2 : vector<1x1x14x28xf32> to vector<14x28xf32>
    %4 = vector.extract_strided_slice %1 {offsets = [0, 0], sizes = [13, 28], strides = [1, 1]} : vector<14x28xf32> to vector<13x28xf32>
    %5 = vector.extract_strided_slice %3 {offsets = [0, 0], sizes = [13, 28], strides = [1, 1]} : vector<14x28xf32> to vector<13x28xf32>
    %6 = vector.extract_strided_slice %1 {offsets = [1, 0], sizes = [13, 28], strides = [1, 1]} : vector<14x28xf32> to vector<13x28xf32>
    %7 = tpu.concatenate %4, %5, %6 in 1 : vector<13x28xf32>, vector<13x28xf32>, vector<13x28xf32> -> vector<13x84xf32>
    %8 = vector.extract_strided_slice %3 {offsets = [0, 0], sizes = [13, 28], strides = [1, 1]} : vector<14x28xf32> to vector<13x28xf32>
    %9 = vector.extract_strided_slice %1 {offsets = [1, 0], sizes = [13, 28], strides = [1, 1]} : vector<14x28xf32> to vector<13x28xf32>
    %10 = vector.extract_strided_slice %3 {offsets = [1, 0], sizes = [13, 28], strides = [1, 1]} : vector<14x28xf32> to vector<13x28xf32>
    %11 = tpu.concatenate %8, %9, %10 in 1 : vector<13x28xf32>, vector<13x28xf32>, vector<13x28xf32> -> vector<13x84xf32>
    %12 = arith.truncf %7 : vector<13x84xf32> to vector<13x84xbf16>
    %13 = arith.truncf %11 : vector<13x84xf32> to vector<13x84xbf16>
    %c0_6 = arith.constant 0 : index
    %c0_7 = arith.constant 0 : index
    %14 = vector.load %arg2[%c0_6, %c0_7] : memref<84x832xbf16, #tpu.memory_space<vmem>>, vector<84x832xbf16>
    %c0_8 = arith.constant 0 : index
    %c0_9 = arith.constant 0 : index
    %15 = vector.load %arg3[%c0_8, %c0_9] : memref<84x832xbf16, #tpu.memory_space<vmem>>, vector<84x832xbf16>
    %cst = arith.constant dense<0.000000e+00> : vector<13x832xf32>
    %16 = tpu.matmul %12, %14, %cst {dimension_numbers = #tpu.dot_dimension_numbers<[1], [0], [0], [1], [0, 0, 1, 1], [], []>} : vector<13x84xbf16>, vector<84x832xbf16>, vector<13x832xf32> -> vector<13x832xf32>
    %cst_10 = arith.constant dense<0.000000e+00> : vector<13x832xf32>
    %17 = tpu.matmul %12, %15, %cst_10 {dimension_numbers = #tpu.dot_dimension_numbers<[1], [0], [0], [1], [0, 0, 1, 1], [], []>} : vector<13x84xbf16>, vector<84x832xbf16>, vector<13x832xf32> -> vector<13x832xf32>
    %cst_11 = arith.constant dense<0.000000e+00> : vector<13x832xf32>
    %18 = tpu.matmul %13, %14, %cst_11 {dimension_numbers = #tpu.dot_dimension_numbers<[1], [0], [0], [1], [0, 0, 1, 1], [], []>} : vector<13x84xbf16>, vector<84x832xbf16>, vector<13x832xf32> -> vector<13x832xf32>
    %cst_12 = arith.constant dense<0.000000e+00> : vector<13x832xf32>
    %19 = tpu.matmul %13, %15, %cst_12 {dimension_numbers = #tpu.dot_dimension_numbers<[1], [0], [0], [1], [0, 0, 1, 1], [], []>} : vector<13x84xbf16>, vector<84x832xbf16>, vector<13x832xf32> -> vector<13x832xf32>
    %20 = arith.maximumf %16, %17 : vector<13x832xf32>
    %21 = arith.maximumf %18, %19 : vector<13x832xf32>
    %22 = arith.maximumf %20, %21 : vector<13x832xf32>
    %c0_13 = arith.constant 0 : index
    %c0_14 = arith.constant 0 : index
    %23 = vector.load %arg4[%c0_13, %c0_14] : memref<1x832xf32, #tpu.memory_space<vmem>>, vector<1x832xf32>
    %24 = vector.broadcast %23 : vector<1x832xf32> to vector<13x832xf32>
    %25 = arith.addf %22, %24 : vector<13x832xf32>
    %cst_15 = arith.constant 0.000000e+00 : f32
    %26 = vector.broadcast %cst_15 : f32 to vector<13x832xf32>
    %27 = arith.maximumf %25, %26 : vector<13x832xf32>
    %28 = arith.truncf %27 : vector<13x832xf32> to vector<13x832xbf16>
    %c0_16 = arith.constant 0 : index
    %c0_17 = arith.constant 0 : index
    %c0_18 = arith.constant 0 : index
    %29 = vector.load %arg5[%c0_16, %c0_17, %c0_18] : memref<1x13x832xbf16, #tpu.memory_space<vmem>>, vector<1x13x832xbf16>
    %30 = vector.shape_cast %29 : vector<1x13x832xbf16> to vector<13x832xbf16>
    %31 = vector.shape_cast %28 : vector<13x832xbf16> to vector<1x13x832xbf16>
    tpu.vector_store %arg5[%c0_16, %c0_17, %c0_18], %31 {strides = array<i32>} : memref<1x13x832xbf16, #tpu.memory_space<vmem>>, vector<1x13x832xbf16>,
    return
  }
  func.func @transform_0(%arg0: i32) -> (i32, i32, i32, i32) {
    %c0_i32 = arith.constant 0 : i32
    %c0_i32_0 = arith.constant 0 : i32
    %c0_i32_1 = arith.constant 0 : i32
    %c0_i32_2 = arith.constant 0 : i32
    return %arg0, %c0_i32, %c0_i32_0, %c0_i32_1 : i32, i32, i32, i32
  }
  func.func @transform_1(%arg0: i32) -> (i32, i32) {
    %c0_i32 = arith.constant 0 : i32
    %c0_i32_0 = arith.constant 0 : i32
    %c0_i32_1 = arith.constant 0 : i32
    return %c0_i32, %c0_i32_0 : i32, i32
  }
  func.func @transform_2(%arg0: i32) -> (i32, i32) {
    %c0_i32 = arith.constant 0 : i32
    %c0_i32_0 = arith.constant 0 : i32
    %c0_i32_1 = arith.constant 0 : i32
    return %c0_i32, %c0_i32_0 : i32, i32
  }
  func.func @transform_3(%arg0: i32) -> (i32, i32) {
    %c0_i32 = arith.constant 0 : i32
    %c0_i32_0 = arith.constant 0 : i32
    %c0_i32_1 = arith.constant 0 : i32
    return %c0_i32, %c0_i32_0 : i32, i32
  }
  func.func @transform_4(%arg0: i32) -> (i32, i32, i32) {
    %c0_i32 = arith.constant 0 : i32
    %c0_i32_0 = arith.constant 0 : i32
    %c0_i32_1 = arith.constant 0 : i32
    return %arg0, %c0_i32, %c0_i32_0 : i32, i32, i32
  }
}

module attributes {stable_mosaic.version = 11 : i64} {
  func.func @_conv2_pool2_kernel(%arg0: i32, %arg1: memref<1x13x13x64xbf16, #tpu.memory_space<vmem>>, %arg2: memref<576x128xbf16, #tpu.memory_space<vmem>>, %arg3: memref<1x128xf32, #tpu.memory_space<vmem>>, %arg4: memref<1x25x128xbf16, #tpu.memory_space<vmem>>, %arg5: memref<50x128xf32, #tpu.memory_space<vmem>>) attributes {dimension_semantics = [#tpu.dimension_semantics<parallel>], iteration_bounds = array<i64: 2>, scalar_prefetch = 0 : i64, scratch_operands = 1 : i64, tpu.core_type = #tpu.core_type<tc>, window_params = [{transform_indices = @transform_0, window_bounds = array<i64: 1, 13, 13, 64>}, {pipeline_mode = #tpu.pipeline_mode<synchronous>, transform_indices = @transform_1, window_bounds = array<i64: 576, 128>}, {pipeline_mode = #tpu.pipeline_mode<synchronous>, transform_indices = @transform_2, window_bounds = array<i64: 1, 128>}, {transform_indices = @transform_3, window_bounds = array<i64: 1, 25, 128>}]} {
    %c0 = arith.constant 0 : index
    %c0_0 = arith.constant 0 : index
    %c0_1 = arith.constant 0 : index
    %c0_2 = arith.constant 0 : index
    %0 = vector.load %arg1[%c0, %c0_0, %c0_1, %c0_2] : memref<1x13x13x64xbf16, #tpu.memory_space<vmem>>, vector<1x13x13x64xbf16>
    %1 = vector.shape_cast %0 : vector<1x13x13x64xbf16> to vector<13x13x64xbf16>
    %2 = vector.extract_strided_slice %1 {offsets = [0, 0, 0], sizes = [10, 10, 64], strides = [1, 1, 1]} : vector<13x13x64xbf16> to vector<10x10x64xbf16>
    %3 = vector.extract_strided_slice %1 {offsets = [0, 1, 0], sizes = [10, 10, 64], strides = [1, 1, 1]} : vector<13x13x64xbf16> to vector<10x10x64xbf16>
    %4 = vector.extract_strided_slice %1 {offsets = [0, 2, 0], sizes = [10, 10, 64], strides = [1, 1, 1]} : vector<13x13x64xbf16> to vector<10x10x64xbf16>
    %5 = vector.extract_strided_slice %1 {offsets = [1, 0, 0], sizes = [10, 10, 64], strides = [1, 1, 1]} : vector<13x13x64xbf16> to vector<10x10x64xbf16>
    %6 = vector.extract_strided_slice %1 {offsets = [1, 1, 0], sizes = [10, 10, 64], strides = [1, 1, 1]} : vector<13x13x64xbf16> to vector<10x10x64xbf16>
    %7 = vector.extract_strided_slice %1 {offsets = [1, 2, 0], sizes = [10, 10, 64], strides = [1, 1, 1]} : vector<13x13x64xbf16> to vector<10x10x64xbf16>
    %8 = vector.extract_strided_slice %1 {offsets = [2, 0, 0], sizes = [10, 10, 64], strides = [1, 1, 1]} : vector<13x13x64xbf16> to vector<10x10x64xbf16>
    %9 = vector.extract_strided_slice %1 {offsets = [2, 1, 0], sizes = [10, 10, 64], strides = [1, 1, 1]} : vector<13x13x64xbf16> to vector<10x10x64xbf16>
    %10 = vector.extract_strided_slice %1 {offsets = [2, 2, 0], sizes = [10, 10, 64], strides = [1, 1, 1]} : vector<13x13x64xbf16> to vector<10x10x64xbf16>
    %11 = tpu.concatenate %2, %3, %4, %5, %6, %7, %8, %9, %10 in 2 : vector<10x10x64xbf16>, vector<10x10x64xbf16>, vector<10x10x64xbf16>, vector<10x10x64xbf16>, vector<10x10x64xbf16>, vector<10x10x64xbf16>, vector<10x10x64xbf16>, vector<10x10x64xbf16>, vector<10x10x64xbf16> -> vector<10x10x576xbf16>
    %c0_3 = arith.constant 0 : index
    %c0_4 = arith.constant 0 : index
    %12 = vector.load %arg2[%c0_3, %c0_4] : memref<576x128xbf16, #tpu.memory_space<vmem>>, vector<576x128xbf16>
    %13 = vector.extract_strided_slice %11 {offsets = [0, 0, 0], sizes = [1, 10, 576], strides = [1, 1, 1]} : vector<10x10x576xbf16> to vector<1x10x576xbf16>
    %14 = vector.shape_cast %13 : vector<1x10x576xbf16> to vector<10x576xbf16>
    %cst = arith.constant dense<0.000000e+00> : vector<10x128xf32>
    %15 = tpu.matmul %14, %12, %cst {dimension_numbers = #tpu.dot_dimension_numbers<[1], [0], [0], [1], [0, 0, 1, 1], [], []>} : vector<10x576xbf16>, vector<576x128xbf16>, vector<10x128xf32> -> vector<10x128xf32>
    %16 = vector.extract_strided_slice %11 {offsets = [1, 0, 0], sizes = [1, 10, 576], strides = [1, 1, 1]} : vector<10x10x576xbf16> to vector<1x10x576xbf16>
    %17 = vector.shape_cast %16 : vector<1x10x576xbf16> to vector<10x576xbf16>
    %cst_5 = arith.constant dense<0.000000e+00> : vector<10x128xf32>
    %18 = tpu.matmul %17, %12, %cst_5 {dimension_numbers = #tpu.dot_dimension_numbers<[1], [0], [0], [1], [0, 0, 1, 1], [], []>} : vector<10x576xbf16>, vector<576x128xbf16>, vector<10x128xf32> -> vector<10x128xf32>
    %19 = arith.maximumf %15, %18 : vector<10x128xf32>
    %c0_6 = arith.constant 0 : index
    %c0_7 = arith.constant 0 : index
    %20 = vector.load %arg5[%c0_6, %c0_7] : memref<50x128xf32, #tpu.memory_space<vmem>>, vector<10x128xf32>
    tpu.vector_store %arg5[%c0_6, %c0_7], %19 {strides = array<i32>} : memref<50x128xf32, #tpu.memory_space<vmem>>, vector<10x128xf32>,
    %21 = vector.extract_strided_slice %11 {offsets = [2, 0, 0], sizes = [1, 10, 576], strides = [1, 1, 1]} : vector<10x10x576xbf16> to vector<1x10x576xbf16>
    %22 = vector.shape_cast %21 : vector<1x10x576xbf16> to vector<10x576xbf16>
    %cst_8 = arith.constant dense<0.000000e+00> : vector<10x128xf32>
    %23 = tpu.matmul %22, %12, %cst_8 {dimension_numbers = #tpu.dot_dimension_numbers<[1], [0], [0], [1], [0, 0, 1, 1], [], []>} : vector<10x576xbf16>, vector<576x128xbf16>, vector<10x128xf32> -> vector<10x128xf32>
    %24 = vector.extract_strided_slice %11 {offsets = [3, 0, 0], sizes = [1, 10, 576], strides = [1, 1, 1]} : vector<10x10x576xbf16> to vector<1x10x576xbf16>
    %25 = vector.shape_cast %24 : vector<1x10x576xbf16> to vector<10x576xbf16>
    %cst_9 = arith.constant dense<0.000000e+00> : vector<10x128xf32>
    %26 = tpu.matmul %25, %12, %cst_9 {dimension_numbers = #tpu.dot_dimension_numbers<[1], [0], [0], [1], [0, 0, 1, 1], [], []>} : vector<10x576xbf16>, vector<576x128xbf16>, vector<10x128xf32> -> vector<10x128xf32>
    %27 = arith.maximumf %23, %26 : vector<10x128xf32>
    %c10 = arith.constant 10 : index
    %c0_10 = arith.constant 0 : index
    %28 = vector.load %arg5[%c10, %c0_10] : memref<50x128xf32, #tpu.memory_space<vmem>>, vector<10x128xf32>
    tpu.vector_store %arg5[%c10, %c0_10], %27 {strides = array<i32>} : memref<50x128xf32, #tpu.memory_space<vmem>>, vector<10x128xf32>,
    %29 = vector.extract_strided_slice %11 {offsets = [4, 0, 0], sizes = [1, 10, 576], strides = [1, 1, 1]} : vector<10x10x576xbf16> to vector<1x10x576xbf16>
    %30 = vector.shape_cast %29 : vector<1x10x576xbf16> to vector<10x576xbf16>
    %cst_11 = arith.constant dense<0.000000e+00> : vector<10x128xf32>
    %31 = tpu.matmul %30, %12, %cst_11 {dimension_numbers = #tpu.dot_dimension_numbers<[1], [0], [0], [1], [0, 0, 1, 1], [], []>} : vector<10x576xbf16>, vector<576x128xbf16>, vector<10x128xf32> -> vector<10x128xf32>
    %32 = vector.extract_strided_slice %11 {offsets = [5, 0, 0], sizes = [1, 10, 576], strides = [1, 1, 1]} : vector<10x10x576xbf16> to vector<1x10x576xbf16>
    %33 = vector.shape_cast %32 : vector<1x10x576xbf16> to vector<10x576xbf16>
    %cst_12 = arith.constant dense<0.000000e+00> : vector<10x128xf32>
    %34 = tpu.matmul %33, %12, %cst_12 {dimension_numbers = #tpu.dot_dimension_numbers<[1], [0], [0], [1], [0, 0, 1, 1], [], []>} : vector<10x576xbf16>, vector<576x128xbf16>, vector<10x128xf32> -> vector<10x128xf32>
    %35 = arith.maximumf %31, %34 : vector<10x128xf32>
    %c20 = arith.constant 20 : index
    %c0_13 = arith.constant 0 : index
    %36 = vector.load %arg5[%c20, %c0_13] : memref<50x128xf32, #tpu.memory_space<vmem>>, vector<10x128xf32>
    tpu.vector_store %arg5[%c20, %c0_13], %35 {strides = array<i32>} : memref<50x128xf32, #tpu.memory_space<vmem>>, vector<10x128xf32>,
    %37 = vector.extract_strided_slice %11 {offsets = [6, 0, 0], sizes = [1, 10, 576], strides = [1, 1, 1]} : vector<10x10x576xbf16> to vector<1x10x576xbf16>
    %38 = vector.shape_cast %37 : vector<1x10x576xbf16> to vector<10x576xbf16>
    %cst_14 = arith.constant dense<0.000000e+00> : vector<10x128xf32>
    %39 = tpu.matmul %38, %12, %cst_14 {dimension_numbers = #tpu.dot_dimension_numbers<[1], [0], [0], [1], [0, 0, 1, 1], [], []>} : vector<10x576xbf16>, vector<576x128xbf16>, vector<10x128xf32> -> vector<10x128xf32>
    %40 = vector.extract_strided_slice %11 {offsets = [7, 0, 0], sizes = [1, 10, 576], strides = [1, 1, 1]} : vector<10x10x576xbf16> to vector<1x10x576xbf16>
    %41 = vector.shape_cast %40 : vector<1x10x576xbf16> to vector<10x576xbf16>
    %cst_15 = arith.constant dense<0.000000e+00> : vector<10x128xf32>
    %42 = tpu.matmul %41, %12, %cst_15 {dimension_numbers = #tpu.dot_dimension_numbers<[1], [0], [0], [1], [0, 0, 1, 1], [], []>} : vector<10x576xbf16>, vector<576x128xbf16>, vector<10x128xf32> -> vector<10x128xf32>
    %43 = arith.maximumf %39, %42 : vector<10x128xf32>
    %c30 = arith.constant 30 : index
    %c0_16 = arith.constant 0 : index
    %44 = vector.load %arg5[%c30, %c0_16] : memref<50x128xf32, #tpu.memory_space<vmem>>, vector<10x128xf32>
    tpu.vector_store %arg5[%c30, %c0_16], %43 {strides = array<i32>} : memref<50x128xf32, #tpu.memory_space<vmem>>, vector<10x128xf32>,
    %45 = vector.extract_strided_slice %11 {offsets = [8, 0, 0], sizes = [1, 10, 576], strides = [1, 1, 1]} : vector<10x10x576xbf16> to vector<1x10x576xbf16>
    %46 = vector.shape_cast %45 : vector<1x10x576xbf16> to vector<10x576xbf16>
    %cst_17 = arith.constant dense<0.000000e+00> : vector<10x128xf32>
    %47 = tpu.matmul %46, %12, %cst_17 {dimension_numbers = #tpu.dot_dimension_numbers<[1], [0], [0], [1], [0, 0, 1, 1], [], []>} : vector<10x576xbf16>, vector<576x128xbf16>, vector<10x128xf32> -> vector<10x128xf32>
    %48 = vector.extract_strided_slice %11 {offsets = [9, 0, 0], sizes = [1, 10, 576], strides = [1, 1, 1]} : vector<10x10x576xbf16> to vector<1x10x576xbf16>
    %49 = vector.shape_cast %48 : vector<1x10x576xbf16> to vector<10x576xbf16>
    %cst_18 = arith.constant dense<0.000000e+00> : vector<10x128xf32>
    %50 = tpu.matmul %49, %12, %cst_18 {dimension_numbers = #tpu.dot_dimension_numbers<[1], [0], [0], [1], [0, 0, 1, 1], [], []>} : vector<10x576xbf16>, vector<576x128xbf16>, vector<10x128xf32> -> vector<10x128xf32>
    %51 = arith.maximumf %47, %50 : vector<10x128xf32>
    %c40 = arith.constant 40 : index
    %c0_19 = arith.constant 0 : index
    %52 = vector.load %arg5[%c40, %c0_19] : memref<50x128xf32, #tpu.memory_space<vmem>>, vector<10x128xf32>
    tpu.vector_store %arg5[%c40, %c0_19], %51 {strides = array<i32>} : memref<50x128xf32, #tpu.memory_space<vmem>>, vector<10x128xf32>,
    %c0_20 = arith.constant 0 : index
    %c0_21 = arith.constant 0 : index
    %53 = tpu.strided_load %arg5[%c0_20, %c0_21] {strides = array<i32: 2, 1>} : memref<50x128xf32, #tpu.memory_space<vmem>>, vector<25x128xf32>
    %c1 = arith.constant 1 : index
    %c0_22 = arith.constant 0 : index
    %54 = tpu.strided_load %arg5[%c1, %c0_22] {strides = array<i32: 2, 1>} : memref<50x128xf32, #tpu.memory_space<vmem>>, vector<25x128xf32>
    %55 = arith.maximumf %53, %54 : vector<25x128xf32>
    %c0_23 = arith.constant 0 : index
    %c0_24 = arith.constant 0 : index
    %56 = vector.load %arg3[%c0_23, %c0_24] : memref<1x128xf32, #tpu.memory_space<vmem>>, vector<1x128xf32>
    %57 = vector.broadcast %56 : vector<1x128xf32> to vector<25x128xf32>
    %58 = arith.addf %55, %57 : vector<25x128xf32>
    %cst_25 = arith.constant 0.000000e+00 : f32
    %59 = vector.broadcast %cst_25 : f32 to vector<25x128xf32>
    %60 = arith.maximumf %58, %59 : vector<25x128xf32>
    %61 = arith.truncf %60 : vector<25x128xf32> to vector<25x128xbf16>
    %c0_26 = arith.constant 0 : index
    %c0_27 = arith.constant 0 : index
    %c0_28 = arith.constant 0 : index
    %62 = vector.load %arg4[%c0_26, %c0_27, %c0_28] : memref<1x25x128xbf16, #tpu.memory_space<vmem>>, vector<1x25x128xbf16>
    %63 = vector.shape_cast %62 : vector<1x25x128xbf16> to vector<25x128xbf16>
    %64 = vector.shape_cast %61 : vector<25x128xbf16> to vector<1x25x128xbf16>
    tpu.vector_store %arg4[%c0_26, %c0_27, %c0_28], %64 {strides = array<i32>} : memref<1x25x128xbf16, #tpu.memory_space<vmem>>, vector<1x25x128xbf16>,
    return
  }
  func.func @transform_0(%arg0: i32) -> (i32, i32, i32, i32) {
    %c0_i32 = arith.constant 0 : i32
    %c0_i32_0 = arith.constant 0 : i32
    %c0_i32_1 = arith.constant 0 : i32
    %c0_i32_2 = arith.constant 0 : i32
    return %arg0, %c0_i32, %c0_i32_0, %c0_i32_1 : i32, i32, i32, i32
  }
  func.func @transform_1(%arg0: i32) -> (i32, i32) {
    %c0_i32 = arith.constant 0 : i32
    %c0_i32_0 = arith.constant 0 : i32
    %c0_i32_1 = arith.constant 0 : i32
    return %c0_i32, %c0_i32_0 : i32, i32
  }
  func.func @transform_2(%arg0: i32) -> (i32, i32) {
    %c0_i32 = arith.constant 0 : i32
    %c0_i32_0 = arith.constant 0 : i32
    %c0_i32_1 = arith.constant 0 : i32
    return %c0_i32, %c0_i32_0 : i32, i32
  }
  func.func @transform_3(%arg0: i32) -> (i32, i32, i32) {
    %c0_i32 = arith.constant 0 : i32
    %c0_i32_0 = arith.constant 0 : i32
    %c0_i32_1 = arith.constant 0 : i32
    return %arg0, %c0_i32, %c0_i32_0 : i32, i32, i32
  }
}

module attributes {stable_mosaic.version = 11 : i64} {
  func.func @_fc_kernel(%arg0: i32, %arg1: memref<2x3200xbf16, #tpu.memory_space<vmem>>, %arg2: memref<3200x256xbf16, #tpu.memory_space<vmem>>, %arg3: memref<1x256xf32, #tpu.memory_space<vmem>>, %arg4: memref<256x128xbf16, #tpu.memory_space<vmem>>, %arg5: memref<1x128xf32, #tpu.memory_space<vmem>>, %arg6: memref<2x128xf32, #tpu.memory_space<vmem>>) attributes {dimension_semantics = [#tpu.dimension_semantics<parallel>], iteration_bounds = array<i64: 1>, scalar_prefetch = 0 : i64, scratch_operands = 0 : i64, tpu.core_type = #tpu.core_type<tc>, window_params = [{transform_indices = @transform_0, window_bounds = array<i64: 2, 3200>}, {pipeline_mode = #tpu.pipeline_mode<synchronous>, transform_indices = @transform_1, window_bounds = array<i64: 3200, 256>}, {pipeline_mode = #tpu.pipeline_mode<synchronous>, transform_indices = @transform_2, window_bounds = array<i64: 1, 256>}, {pipeline_mode = #tpu.pipeline_mode<synchronous>, transform_indices = @transform_3, window_bounds = array<i64: 256, 128>}, {pipeline_mode = #tpu.pipeline_mode<synchronous>, transform_indices = @transform_4, window_bounds = array<i64: 1, 128>}, {transform_indices = @transform_5, window_bounds = array<i64: 2, 128>}]} {
    %c0 = arith.constant 0 : index
    %c0_0 = arith.constant 0 : index
    %0 = vector.load %arg1[%c0, %c0_0] : memref<2x3200xbf16, #tpu.memory_space<vmem>>, vector<2x3200xbf16>
    %c0_1 = arith.constant 0 : index
    %c0_2 = arith.constant 0 : index
    %1 = vector.load %arg2[%c0_1, %c0_2] : memref<3200x256xbf16, #tpu.memory_space<vmem>>, vector<3200x256xbf16>
    %cst = arith.constant dense<0.000000e+00> : vector<2x256xf32>
    %2 = tpu.matmul %0, %1, %cst {dimension_numbers = #tpu.dot_dimension_numbers<[1], [0], [0], [1], [0, 0, 1, 1], [], []>} : vector<2x3200xbf16>, vector<3200x256xbf16>, vector<2x256xf32> -> vector<2x256xf32>
    %c0_3 = arith.constant 0 : index
    %c0_4 = arith.constant 0 : index
    %3 = vector.load %arg3[%c0_3, %c0_4] : memref<1x256xf32, #tpu.memory_space<vmem>>, vector<1x256xf32>
    %4 = vector.broadcast %3 : vector<1x256xf32> to vector<2x256xf32>
    %5 = arith.addf %2, %4 : vector<2x256xf32>
    %cst_5 = arith.constant 0.000000e+00 : f32
    %6 = vector.broadcast %cst_5 : f32 to vector<2x256xf32>
    %7 = arith.maximumf %5, %6 : vector<2x256xf32>
    %8 = arith.truncf %7 : vector<2x256xf32> to vector<2x256xbf16>
    %c0_6 = arith.constant 0 : index
    %c0_7 = arith.constant 0 : index
    %9 = vector.load %arg4[%c0_6, %c0_7] : memref<256x128xbf16, #tpu.memory_space<vmem>>, vector<256x128xbf16>
    %cst_8 = arith.constant dense<0.000000e+00> : vector<2x128xf32>
    %10 = tpu.matmul %8, %9, %cst_8 {dimension_numbers = #tpu.dot_dimension_numbers<[1], [0], [0], [1], [0, 0, 1, 1], [], []>} : vector<2x256xbf16>, vector<256x128xbf16>, vector<2x128xf32> -> vector<2x128xf32>
    %c0_9 = arith.constant 0 : index
    %c0_10 = arith.constant 0 : index
    %11 = vector.load %arg5[%c0_9, %c0_10] : memref<1x128xf32, #tpu.memory_space<vmem>>, vector<1x128xf32>
    %12 = vector.broadcast %11 : vector<1x128xf32> to vector<2x128xf32>
    %13 = arith.addf %10, %12 : vector<2x128xf32>
    %c0_11 = arith.constant 0 : index
    %c0_12 = arith.constant 0 : index
    %14 = vector.load %arg6[%c0_11, %c0_12] : memref<2x128xf32, #tpu.memory_space<vmem>>, vector<2x128xf32>
    tpu.vector_store %arg6[%c0_11, %c0_12], %13 {strides = array<i32>} : memref<2x128xf32, #tpu.memory_space<vmem>>, vector<2x128xf32>,
    return
  }
  func.func @transform_0(%arg0: i32) -> (i32, i32) {
    %c0_i32 = arith.constant 0 : i32
    %c0_i32_0 = arith.constant 0 : i32
    return %arg0, %c0_i32 : i32, i32
  }
  func.func @transform_1(%arg0: i32) -> (i32, i32) {
    %c0_i32 = arith.constant 0 : i32
    %c0_i32_0 = arith.constant 0 : i32
    %c0_i32_1 = arith.constant 0 : i32
    return %c0_i32, %c0_i32_0 : i32, i32
  }
  func.func @transform_2(%arg0: i32) -> (i32, i32) {
    %c0_i32 = arith.constant 0 : i32
    %c0_i32_0 = arith.constant 0 : i32
    %c0_i32_1 = arith.constant 0 : i32
    return %c0_i32, %c0_i32_0 : i32, i32
  }
  func.func @transform_3(%arg0: i32) -> (i32, i32) {
    %c0_i32 = arith.constant 0 : i32
    %c0_i32_0 = arith.constant 0 : i32
    %c0_i32_1 = arith.constant 0 : i32
    return %c0_i32, %c0_i32_0 : i32, i32
  }
  func.func @transform_4(%arg0: i32) -> (i32, i32) {
    %c0_i32 = arith.constant 0 : i32
    %c0_i32_0 = arith.constant 0 : i32
    %c0_i32_1 = arith.constant 0 : i32
    return %c0_i32, %c0_i32_0 : i32, i32
  }
  func.func @transform_5(%arg0: i32) -> (i32, i32) {
    %c0_i32 = arith.constant 0 : i32
    %c0_i32_0 = arith.constant 0 : i32
    return %arg0, %c0_i32 : i32, i32
  }
}

</mosaic_0001>

<bundles_post_ra>
// kernel: snn_forward.3
= control target key start
LH: loop header
LB: loop body
LE: loop exit
PB: predicated region body
PF: predicated region fallthrough
CT: control target
= control target key end

     0   :  { %9 = vsyncpa [#allocation3], 0  ;;  %s3026_s0 = inlined_call_operand.vmem [shape: f32[2,2,14,28], index: 0, kind: input, shape index: {}]   ;;  %s3027_s1 = inlined_call_operand.hbm [shape: bf16[84,832], index: 1, kind: input, shape index: {}]   ;;  %s3028_s2 = inlined_call_operand.hbm [shape: bf16[84,832], index: 2, kind: input, shape index: {}]   ;;  %s3029_s3 = inlined_call_operand.hbm [shape: f32[1,832], index: 3, kind: input, shape index: {}]   ;;  %s3030_s4 = inlined_call_operand.vmem [shape: bf16[2,13,832], index: 4, kind: output, shape index: {}]  }
   0x1   :  { %10 = vsyncpa [#allocation5], 0  ;;  %s2319_s15 = smov 0  }
   0x2 LB: > { %s2325_s16 = sadd.s32 4294967295, %s2282_s15   ;;  %p1772_p0 = scmp.ge.s32.totalorder %s2282_s15, 1  ;;  %s2282_s15 = sphi %s2319_s15, %s16_s15  }
   0x3   : > { %p136_p1 = scmp.lt.s32.totalorder %s2282_s15, 3  ;;  %p2032_p2 = scmp.eq.s32.totalorder %s2325_s16, 0 }
   0x4   : > { %s2284_s18 = smov [#allocation4]   ;;  %s2285_s20 = smov [#allocation2]  }
   0x5   : > { %p2330_p3 = pnand %p1772_p0, %p136_p1  ;;  %s161_s19 = sshll.u32 %s2284_s18, 4  ;;  %s162_s19 = int_to_ptr.vmem [resolvable:$true] %s161_s19 }
   0x6   : > { %s148_s21 = sshll.u32 %s2285_s20, 4  ;;  %s2286_s23 = smov [#allocation6]   ;;  %s149_s21 = int_to_ptr.vmem [resolvable:$true] %s148_s21 }
   0x7   : > { %p2022_p4 = pneg %p2330_p3  ;;  %s175_s24 = sshll.u32 %s2286_s23, 4  ;;  %s2342_s24 = int_to_ptr.vmem [resolvable:$true] %s175_s24 }
   0x8   : > { %s2201_s25 = scalar_lea.vmem %s162_s19, 4928  ;;  %p2209_p10 = scmp.lt.s32.totalorder %s162_s19, %s162_s19 }
   0x9   : > { %p2338_p5 = pnand %p2032_p2, %p2022_p4  ;;  %p2202_p7 = scmp.ne.s32.totalorder %s162_s19, %s2201_s25 }
   0xa   : > { %p2210_p11 = scmp.lt.s32.totalorder %s2201_s25, %s2201_s25 }
   0xb   : > { %p2192_p6 = pneg %p2338_p5 }
   0xc   : > { %p2211_p12 = por %p2210_p11, %p2209_p10 }
   0xd   : > { %p2204_p8 = pnand %p2202_p7, %p2192_p6 }
   0xf   : > { %p2205_p9 = pneg %p2204_p8 }
  0x11   : > { %p2212_p13 = pnand %p2211_p12, %p2205_p9 }
  0x13   : > { %2215 = shalt.err (!%p2212_p13)
}
  0x14   : > { %s2287_s26 = smov 448   ;;  %s2288_s27 = smov 28  }
  0x15   : > { %2028 = dma.hbm_to_vmem [thread:$0]  (!%p2338_p5), %s3028_s2, 4928, %s162_s19, [#allocation5], %s2287_s26, %s2287_s26, %s2288_s27  }
  0x16   : > { %s2227_s30 = scalar_lea.vmem %s149_s21, 4928  ;;  %p2235_p7 = scmp.lt.s32.totalorder %s149_s21, %s149_s21 }
  0x17   : > { %p2228_p0 = scmp.ne.s32.totalorder %s149_s21, %s2227_s30  ;;  %p2236_p8 = scmp.lt.s32.totalorder %s2227_s30, %s2227_s30 }
  0x19   : > { %p2230_p1 = pnand %p2228_p0, %p2192_p6  ;;  %p2237_p10 = por %p2236_p8, %p2235_p7 }
  0x1b   : > { %p2231_p4 = pneg %p2230_p1 }
  0x1d   : > { %p2238_p9 = pnand %p2237_p10, %p2231_p4 }
  0x1f   : > { %2241 = shalt.err (!%p2238_p9)
}
  0x20   : > { %2025 = dma.hbm_to_vmem [thread:$0]  (!%p2338_p5), %s3027_s1, 4928, %s149_s21, [#allocation3], %s2287_s26, %s2287_s26, %s2288_s27  }
  0x21   : > { %s2253_s7 = scalar_lea.vmem %s2342_s24, 112  ;;  %s2260_s8 = scalar_lea.vmem %s2342_s24, 128 }
  0x22   : > { %p2254_p11 = scmp.ne.s32.totalorder %s2342_s24, %s2253_s7  ;;  %p2261_p0 = scmp.lt.s32.totalorder %s2342_s24, %s2342_s24 }
  0x23   : > { %p2262_p1 = scmp.lt.s32.totalorder %s2260_s8, %s2253_s7 }
  0x24   : > { %p2256_p12 = pnand %p2254_p11, %p2192_p6 }
  0x25   : > { %p2263_p4 = por %p2262_p1, %p2261_p0 }
  0x26   : > { %p2257_p13 = pneg %p2256_p12 }
  0x28   : > { %p2264_p7 = pnand %p2263_p4, %p2257_p13 }
  0x2a   : > { %2267 = shalt.err (!%p2264_p7)
}
  0x2b   : > { %2031 = dma.hbm_to_vmem [thread:$0]  (!%p2338_p5), %s3029_s3, 112, %s2342_s24, [#allocation5]  }
  0x2c   : > { %196 = sbr.rel (%p2330_p3) target bundleno = 563 (0x233), region = 36 }
  0x31   : > { %2273 = dma.done.wait (%p2032_p2), [#allocation3], 4928  }
  0x32   : > { %2275 = vsyncadd (%p2032_p2), [#allocation3], 4294962368 }
  0x33   : > { %2277 = dma.done.wait (%p2032_p2), [#allocation5], 5040  }
  0x34   : > { %2279 = vsyncadd (%p2032_p2), [#allocation5], 4294962256  ;;  %p230_p6 = scmp.lt.s32.totalorder %s2325_s16, 1  ;;  %v3031_v0 = vmov 0   ;;  %vm256_vm0 = vcmask 1046528   ;;  %vm583_vm1 = vcmask 1041408  }
  0x35   : > { %637 = vmatprep.mubr.bf16.mxu0 %v3031_v0  ;;  %680 = vmatprep.mubr.bf16.mxu1 %v3031_v0  ;;  %v333_v10 = vld [vmem:[#allocation2 + $0x118] sm:$0x33]  ;;  %v334_v11 = vld [vmem:[#allocation2 + $0x120] sm:$0x33]  ;;  %s2290_s17 = smov 28   ;;  %s2291_s18 = smov 56  }
  0x36   : > { %s3118_s16 = smov (!%p230_p6, %s2325_s16), 1  ;;  %v2410_v12 = vcombine.high %v333_v10, %v333_v10  ;;  %v2412_v13 = vcombine.high %v334_v11, %v334_v11  ;;  %v1821_v14 = vcombine.low %v333_v10, %v333_v10  ;;  %v1823_v17 = vcombine.low %v334_v11, %v334_v11  ;;  %v2416_v18 = vld [vmem:[#allocation2 + $0xe4] ss:$28 sps:$4 sm:$0xff]   ;;  %v2425_v21 = vld [vmem:[#allocation2 + $0xec] ss:$28 sps:$4 sm:$0xff]  }
  0x37   : > { %s1908_s11 = sshll.u32 %s3118_s16, 5  ;;  %v2431_v23 = vld [vmem:[#allocation2 + $0xe0] ss:$28 sps:$4 sm:$0xff]   ;;  %v2433_v25 = vld [vmem:[#allocation2 + $0xac] ss:$28 sps:$4 sm:$0xff]   ;;  %v3033_v44 = vmov 0.0  }
  0x38   : > { %s234_s14 = scalar_lea.vmem %s3026_s0, %s1908_s11  ;;  %1828 = vmatprep.subr.msk.bf16.mxu0 %vm583_vm1, %v2410_v12  ;;  %1830 = vmatprep.subr.msk.bf16.mxu1 %vm583_vm1, %v2412_v13  ;;  %v2423_v20 = vsel %vm583_vm1, %v1821_v14, 0  ;;  %v2429_v22 = vsel %vm583_vm1, %v1823_v17, 0  ;;  %v2437_v26 = vld [vmem:[#allocation2 + $0xe8] ss:$28 sps:$4 sm:$0xff]   ;;  %v2440_v27 = vld [vmem:[#allocation2 + $0xb4] ss:$28 sps:$4 sm:$0xff]  }
  0x39   : > { %v2396_v1 = vld [vmem:[%s234_s14 + $0x10] sm:$0xff]  ;;  %v2398_v2 = vld [vmem:[%s234_s14 + $0x18] sm:$0x3f]  ;;  %v2400_v3 = vld [vmem:[%s234_s14] sm:$0xff]  ;;  %610 = vmatpush1.bf16.msra.mxu0 %v2423_v20  ;;  %653 = vmatpush1.bf16.msra.mxu1 %v2429_v22  ;;  %vm266_vm2 = vcmask 228352   ;;  %vm269_vm3 = vcmask 457728  }
  0x3a   : > { %v2056_v4 = vpack.i.bf16 %v2398_v2, %v2396_v1  ;;  %v278_v5 = vrot.slane %v2396_v1, 1  ;;  %v2405_v6 = vld [vmem:[%s234_s14 + $0x8] sm:$0x3f]  ;;  %v257_v7 = vrot.slane %v2400_v3, 1  ;;  %v279_v8 = vrot.slane %v2398_v2, 1  ;;  %611 = vmatprep.subr.bf16.mxu0 %v2416_v18  ;;  %654 = vmatprep.subr.bf16.mxu1 %v2425_v21  ;;  %s2009_s19 = smul.u32 56, %s3118_s16 }
  0x3b   : > { %v258_v9 = vrot.slane %v2405_v6, 1  ;;  %v2443_v28 = vld [vmem:[#allocation2 + $0xa8] ss:$28 sps:$4 sm:$0xff]   ;;  %v2446_v29 = vld [vmem:[#allocation2 + $0x74] ss:$28 sps:$4 sm:$0xff]   ;;  %vm579_vm4 = vcmask 687104  }
  0x3c   : > { %2057 = vrot.lane.b32.xlu0 %v2056_v4, %s2290_s17  ;;  %v280_v16 = vsel %vm256_vm0, %v278_v5, %v279_v8  ;;  %v2449_v30 = vld [vmem:[#allocation2 + $0xb0] ss:$28 sps:$4 sm:$0xff]   ;;  %v2452_v31 = vld [vmem:[#allocation2 + $0x7c] ss:$28 sps:$4 sm:$0xff]   ;;  %v2464_v35 = vld [vmem:[#allocation2 + $0x44] ss:$28 sps:$4 sm:$0xff]   ;;  %s2965_s21 = scalar_lea.vmem %s3030_s4, %s2009_s19 }
  0x3d   : > { %v259_v15 = vsel %vm256_vm0, %v257_v7, %v258_v9  ;;  %v2071_v24 = vpack.i.bf16 %v279_v8, %v280_v16  ;;  %612 = vmatpush1.bf16.msra.mxu0 %v2431_v23  ;;  %655 = vmatpush1.bf16.msra.mxu1 %v2437_v26  ;;  %v2455_v32 = vld [vmem:[#allocation2 + $0x70] ss:$28 sps:$4 sm:$0xff]   ;;  %v2458_v33 = vld [vmem:[#allocation2 + $0x3c] ss:$28 sps:$4 sm:$0xff]   ;;  %v2470_v37 = vld [vmem:[#allocation2 + $0x4] ss:$28 sps:$4 sm:$0xff]  }
  0x3e   : > { %v2061_v19 = vpack.i.bf16 %v258_v9, %v259_v15  ;;  %613 = vmatprep.subr.bf16.mxu0 %v2433_v25  ;;  %656 = vmatprep.subr.bf16.mxu1 %v2440_v27  ;;  %v2461_v34 = vld [vmem:[#allocation2 + $0x78] ss:$28 sps:$4 sm:$0xff]   ;;  %v2473_v38 = vld [vmem:[#allocation2 + $0x40] ss:$28 sps:$4 sm:$0xff]   ;;  %v335_v39 = vld [vmem:[#allocation2 + $0x128] sm:$0x33] }
  0x3f   : > { %v2467_v36 = vld [vmem:[#allocation2 + $0x38] ss:$28 sps:$4 sm:$0xff]   ;;  %v2476_v40 = vld [vmem:[#allocation2 + $0xc] ss:$28 sps:$4 sm:$0xff]   ;;  %v2479_v41 = vld [vmem:[#allocation2] ss:$28 sps:$4 sm:$0xff]   ;;  %v2482_v42 = vcombine.high %v335_v39, %v335_v39  ;;  %v1825_v48 = vcombine.low %v335_v39, %v335_v39 }
  0x40   : > { %2062 = vrot.lane.b32.xlu0 %v2061_v19, %s2291_s18  ;;  %2067 = vrot.lane.b32.xlu1 %v2061_v19, %s2290_s17  ;;  %v2485_v43 = vld [vmem:[#allocation2 + $0x8] ss:$28 sps:$4 sm:$0xff]   ;;  %v2112_v50 = vld [vmem:[#allocation2 + $0x130] ss:$0 sps:$4 sm:$0x33]   ;;  %vm2293_vm5 = vmmov 0  }
  0x41   : > { %614 = vmatpush1.bf16.msra.mxu0 %v2443_v28  ;;  %657 = vmatpush1.bf16.msra.mxu1 %v2449_v30  ;;  %v2500_v60 = vsel %vm583_vm1, %v1825_v48, 0  ;;  %v2505_v62 = vsel %vm583_vm1, %v2112_v50, 0  ;;  %v2507_v63 = vld [vmem:[#allocation2 + $0xf4] ss:$28 sps:$4 sm:$0xff]   ;;  %v2527_v10 = vld [vmem:[#allocation2 + $0xbc] ss:$28 sps:$4 sm:$0xff]  }
  0x42   : > { %615 = vmatprep.subr.bf16.mxu0 %v2446_v29  ;;  %658 = vmatprep.subr.bf16.mxu1 %v2452_v31  ;;  %v2519_v8 = vld [vmem:[#allocation2 + $0xf0] ss:$28 sps:$4 sm:$0xff]   ;;  %v2521_v9 = vld [vmem:[#allocation2 + $0xf8] ss:$28 sps:$4 sm:$0xff]   ;;  %v2538_v15 = vld [vmem:[#allocation2 + $0xc0] ss:$28 sps:$4 sm:$0xff]  }
  0x43   : > { %v2536_v14 = vld [vmem:[#allocation2 + $0xb8] ss:$28 sps:$4 sm:$0xff]   ;;  %v2542_v16 = vld [vmem:[#allocation2 + $0x84] ss:$28 sps:$4 sm:$0xff]   ;;  %vm1663_vm6 = vcmask 1042432   ;;  %vm1666_vm8 = vcmask 1046532  }
  0x44   : > { %2072 = vrot.lane.b32.xlu1 %v2071_v24, %s2291_s18  ;;  %v2546_v17 = vld [vmem:[#allocation2 + $0x80] ss:$28 sps:$4 sm:$0xff]   ;;  %v2548_v19 = vld [vmem:[#allocation2 + $0x88] ss:$28 sps:$4 sm:$0xff]   ;;  %v378_v48 = vld [vmem:[#allocation4 + $0x120] sm:$0x33] }
  0x45   : > { %616 = vmatpush1.bf16.msra.mxu0 %v2455_v32  ;;  %659 = vmatpush1.bf16.msra.mxu1 %v2461_v34  ;;  %v2552_v24 = vld [vmem:[#allocation2 + $0x4c] ss:$28 sps:$4 sm:$0xff]   ;;  %v2568_v50 = vld [vmem:[#allocation2 + $0x18] ss:$28 sps:$4 sm:$0xff]   ;;  %vm1664_vm7 = vsmask.f32 2304 }
  0x46   : > { %617 = vmatprep.subr.bf16.mxu0 %v2458_v33  ;;  %660 = vmatprep.subr.bf16.mxu1 %v2464_v35  ;;  %v2556_v39 = vld [vmem:[#allocation2 + $0x48] ss:$28 sps:$4 sm:$0xff]   ;;  %vm1667_vm9 = vsmask.f32 6400  ;;  %vm1665_vm10 = vmand %vm1663_vm6, %vm1664_vm7  ;;  %vm1661_vm13 = vcmask 519168   ;;  %vm1679_vm14 = vcmask 518144  }
  0x47   : > { %vm1668_vm11 = vmand %vm1666_vm8, %vm1667_vm9 }
  0x48   : > { %vm2976_vm12 = vmor %vm1668_vm11, %vm1665_vm10 }
  0x49   : > { %618 = vmatpush1.bf16.msra.mxu0 %v2467_v36  ;;  %661 = vmatpush1.bf16.msra.mxu1 %v2473_v38  ;;  %vm1680_vm15 = vmand %vm1679_vm14, %vm1664_vm7 }
  0x4a   : > { %619 = vmatprep.subr.bf16.mxu0 %v2470_v37  ;;  %662 = vmatprep.subr.bf16.mxu1 %v2476_v40 }
  0x4d   : > { %620 = vmatpush1.bf16.msra.mxu0 %v2479_v41  ;;  %663 = vmatpush1.bf16.msra.mxu1 %v2485_v43 }
  0x4e   : > { %1832 = vmatprep.subr.msk.bf16.mxu0 %vm583_vm1, %v2482_v42  ;;  %1945 = vmatprep.subr.bf16.mxu1 %v3033_v44 }
  0xae   : > { %v2058_v45 = vpop.permute.xlu0 %2057 }
  0xaf   : > { %v2060_v46 = vunpack.i.h.bf16 %v2058_v45  ;;  %v2059_v47 = vunpack.i.l.bf16 %v2058_v45  ;;  %v2558_v45 = vld [vmem:[#allocation2 + $0x50] ss:$28 sps:$4 sm:$0xff]  }
  0xb1   : > { %v267_v56 = vsel %vm266_vm2, %v2400_v3, %v2059_v47  ;;  %v268_v57 = vsel %vm266_vm2, %v2405_v6, %v2060_v46  ;;  %v2562_v46 = vld [vmem:[#allocation2 + $0x14] ss:$28 sps:$4 sm:$0xff]  }
  0xb2   : > { %v2063_v49 = vpop.permute.xlu0 %2062  ;;  %v2068_v51 = vpop.permute.xlu1 %2067  ;;  %v377_v47 = vld [vmem:[#allocation4 + $0x118] sm:$0x33] }
  0xb3   : > { %v2065_v52 = vunpack.i.h.bf16 %v2063_v49  ;;  %v2064_v53 = vunpack.i.l.bf16 %v2063_v49  ;;  %v2070_v54 = vunpack.i.h.bf16 %v2068_v51  ;;  %v2069_v55 = vunpack.i.l.bf16 %v2068_v51  ;;  %v2566_v49 = vld [vmem:[#allocation2 + $0x10] ss:$28 sps:$4 sm:$0xff]  }
  0xb4   : > { %v2570_v51 = vcombine.high %v377_v47, %v377_v47 }
  0xb5   : > { %v271_v58 = vsel %vm269_vm3, %v268_v57, %v2065_v52  ;;  %v270_v59 = vsel %vm269_vm3, %v267_v56, %v2064_v53  ;;  %v288_v3 = vsel %vm266_vm2, %v2398_v2, %v2070_v54  ;;  %v287_v4 = vsel %vm266_vm2, %v2396_v1, %v2069_v55  ;;  %v2588_v57 = vld [vmem:[#allocation4 + $0xe4] ss:$28 sps:$4 sm:$0xff]  }
  0xb6   : > { %v2502_v61 = vpack.c.bf16 %v271_v58, %v270_v59  ;;  %v2073_v5 = vpop.permute.xlu1 %2072  ;;  %v2574_v52 = vcombine.high %v378_v48, %v378_v48  ;;  %v1870_v53 = vcombine.low %v377_v47, %v377_v47  ;;  %v1872_v54 = vcombine.low %v378_v48, %v378_v48  ;;  %v2590_v58 = vld [vmem:[#allocation4 + $0xec] ss:$28 sps:$4 sm:$0xff]   ;;  %v2598_v59 = vld [vmem:[#allocation4 + $0xe0] ss:$28 sps:$4 sm:$0xff]   ;;  %v2626_v48 = vld [vmem:[#allocation4 + $0x78] ss:$28 sps:$4 sm:$0xff]  }
  0xb7   : > { %v2075_v6 = vunpack.i.h.bf16 %v2073_v5  ;;  %v2074_v7 = vunpack.i.l.bf16 %v2073_v5  ;;  %v2606_v5 = vld [vmem:[#allocation4 + $0xb4] ss:$28 sps:$4 sm:$0xff]   ;;  %3066 = vst [vmem:[#allocation14_spill] sm:$0xff] %v2626_v48 }
  0xb8   : > { %1829 = vmatmul.mubr.msk.bf16.vlgmr.msra.gmra.mxu0 %vm579_vm4, %v2502_v61  ;;  %1831 = vmatmul.mubr.msk.bf16.vlgmr.msra.gmra.mxu1 %vm579_vm4, %v2502_v61  ;;  %v2583_v55 = vsel %vm583_vm1, %v1870_v53, 0  ;;  %v2586_v56 = vsel %vm583_vm1, %v1872_v54, 0  ;;  %v2624_v47 = vld [vmem:[#allocation4 + $0x70] ss:$28 sps:$4 sm:$0xff]   ;;  %v2630_v53 = vld [vmem:[#allocation4 + $0x3c] ss:$28 sps:$4 sm:$0xff]  }
  0xb9   : > { %696 = vmatpush1.bf16.msra.mxu0 %v2500_v60  ;;  %1946 = vmatpush3.bf16.msra.mxu1 %v2505_v62  ;;  %v289_v2 = vsel %vm269_vm3, %v287_v4, %v2074_v7  ;;  %v290_v1 = vsel %vm269_vm3, %v288_v3, %v2075_v6  ;;  %v2600_v3 = vld [vmem:[#allocation4 + $0xe8] ss:$28 sps:$4 sm:$0xff]   ;;  %v2614_v7 = vld [vmem:[#allocation4 + $0xb0] ss:$28 sps:$4 sm:$0xff]   ;;  %3065 = vst [vmem:[#allocation13_spill] sm:$0xff] %v2624_v47  ;;  %3067 = vst [vmem:[#allocation15_spill] sm:$0xff] %v2630_v53 }
  0xba   : > { %697 = vmatprep.subr.bf16.mxu0 %v2507_v63  ;;  %1947 = vmatprep.subr.bf16.mxu1 %v3033_v44  ;;  %v2529_v11 = vpack.c.bf16 %v290_v1, %v289_v2  ;;  %v2604_v4 = vld [vmem:[#allocation4 + $0xac] ss:$28 sps:$4 sm:$0xff]   ;;  %3062 = vst [vmem:[#allocation10_spill] sm:$0xff] %v2614_v7  ;;  %v2618_v2 = vld [vmem:[#allocation4 + $0x74] ss:$28 sps:$4 sm:$0xff]  }
  0xbb   : > { %723 = vmatprep.mubr.bf16.mxu0 %v3031_v0  ;;  %1957 = vmatprep.mubr.msk.bf16.mxu1 %vm2293_vm5, %v3033_v44  ;;  %v2612_v6 = vld [vmem:[#allocation4 + $0xa8] ss:$28 sps:$4 sm:$0xff]   ;;  %3063 = vst [vmem:[#allocation11_spill] sm:$0xff] %v2618_v2  ;;  %v2620_v1 = vld [vmem:[#allocation4 + $0x7c] ss:$28 sps:$4 sm:$0xff]  }
  0xbc   : > { %3061 = vst [vmem:[#allocation9_spill] sm:$0xff] %v2612_v6  ;;  %3064 = vst [vmem:[#allocation12_spill] sm:$0xff] %v2620_v1  ;;  %v2632_v54 = vld [vmem:[#allocation4 + $0x44] ss:$28 sps:$4 sm:$0xff]  }
  0xbd   : > { %698 = vmatpush1.bf16.msra.mxu0 %v2519_v8  ;;  %1948 = vmatpush3.bf16.msra.mxu1 %v2521_v9  ;;  %3068 = vst [vmem:[#allocation16_spill] sm:$0xff] %v2632_v54 }
  0xbe   : > { %699 = vmatprep.subr.bf16.mxu0 %v2527_v10  ;;  %1949 = vmatprep.subr.bf16.mxu1 %v3033_v44 }
  0xc1   : > { %700 = vmatpush1.bf16.msra.mxu0 %v2536_v14  ;;  %1950 = vmatpush3.bf16.msra.mxu1 %v2538_v15 }
  0xc2   : > { %701 = vmatprep.subr.bf16.mxu0 %v2542_v16  ;;  %1951 = vmatprep.subr.bf16.mxu1 %v3033_v44 }
  0xc5   : > { %702 = vmatpush1.bf16.msra.mxu0 %v2546_v17  ;;  %1952 = vmatpush3.bf16.msra.mxu1 %v2548_v19 }
  0xc6   : > { %703 = vmatprep.subr.bf16.mxu0 %v2552_v24  ;;  %1953 = vmatprep.subr.bf16.mxu1 %v3033_v44 }
  0xc9   : > { %704 = vmatpush1.bf16.msra.mxu0 %v2556_v39  ;;  %1954 = vmatpush3.bf16.msra.mxu1 %v2558_v45 }
  0xca   : > { %705 = vmatprep.subr.bf16.mxu0 %v2562_v46  ;;  %1955 = vmatprep.subr.bf16.mxu1 %v3033_v44  ;;  %v2638_v44 = vld [vmem:[#allocation4 + $0x40] ss:$28 sps:$4 sm:$0xff]  }
  0xcb   : > { %3070 = vst [vmem:[#allocation18_spill] sm:$0xff] %v2638_v44 }
  0xcd   : > { %706 = vmatpush1.bf16.msra.mxu0 %v2566_v49  ;;  %1956 = vmatpush3.bf16.msra.mxu1 %v2568_v50 }
  0xce   : > { %1877 = vmatprep.subr.msk.bf16.mxu0 %vm583_vm1, %v2570_v51  ;;  %1879 = vmatprep.subr.msk.bf16.mxu1 %vm583_vm1, %v2574_v52 }
  0xd0   : > { %1833 = vmatmul.mubr.msk.bf16.vlgmr.msra.gmra.mxu0 %vm579_vm4, %v2502_v61  ;;  %1958 = vmatmul.mubr.msk.bf16.vlgmr.msra.gmra.mxu1 %vm579_vm4, %v2502_v61 }
  0xd1   : > { %999 = vmatpush1.bf16.msra.mxu0 %v2583_v55  ;;  %1042 = vmatpush1.bf16.msra.mxu1 %v2586_v56 }
  0xd2   : > { %1000 = vmatprep.subr.bf16.mxu0 %v2588_v57  ;;  %1043 = vmatprep.subr.bf16.mxu1 %v2590_v58 }
  0xd3   : > { %1026 = vmatprep.mubr.bf16.mxu0 %v3031_v0  ;;  %1069 = vmatprep.mubr.bf16.mxu1 %v3031_v0  ;;  %v2636_v0 = vld [vmem:[#allocation4 + $0x38] ss:$28 sps:$4 sm:$0xff]  }
  0xd4   : > { %3069 = vst [vmem:[#allocation17_spill] sm:$0xff] %v2636_v0 }
  0xd5   : > { %1001 = vmatpush1.bf16.msra.mxu0 %v2598_v59  ;;  %1044 = vmatpush1.bf16.msra.mxu1 %v2600_v3 }
  0xd6   : > { %1002 = vmatprep.subr.bf16.mxu0 %v2604_v4  ;;  %1045 = vmatprep.subr.bf16.mxu1 %v2606_v5 }
  0xd9   : > { %1003 = vmatpush1.bf16.msra.mxu0 %v2612_v6  ;;  %1046 = vmatpush1.bf16.msra.mxu1 %v2614_v7  ;;  %v2642_v7 = vld [vmem:[#allocation4 + $0x4] ss:$28 sps:$4 sm:$0xff]   ;;  %v2169_v6 = vld [vmem:[#allocation4 + $0x130] ss:$0 sps:$4 sm:$0x33]  }
  0xda   : > { %1004 = vmatprep.subr.bf16.mxu0 %v2618_v2  ;;  %1047 = vmatprep.subr.bf16.mxu1 %v2620_v1  ;;  %3071 = vst [vmem:[#allocation19_spill] sm:$0xff] %v2642_v7  ;;  %v2644_v2 = vld [vmem:[#allocation4 + $0xc] ss:$28 sps:$4 sm:$0xff]  }
  0xdb   : > { %3072 = vst [vmem:[#allocation20_spill] sm:$0xff] %v2644_v2  ;;  %v379_v1 = vld [vmem:[#allocation4 + $0x128] sm:$0x33] }
  0xdd   : > { %1005 = vmatpush1.bf16.msra.mxu0 %v2624_v47  ;;  %1048 = vmatpush1.bf16.msra.mxu1 %v2626_v48  ;;  %v2648_v47 = vld [vmem:[#allocation4] ss:$28 sps:$4 sm:$0xff]   ;;  %v2650_v48 = vld [vmem:[#allocation4 + $0x8] ss:$28 sps:$4 sm:$0xff]  }
  0xde   : > { %1006 = vmatprep.subr.bf16.mxu0 %v2630_v53  ;;  %1049 = vmatprep.subr.bf16.mxu1 %v2632_v54  ;;  %3073 = vst [vmem:[#allocation21_spill] sm:$0xff] %v2648_v47  ;;  %3074 = vst [vmem:[#allocation22_spill] sm:$0xff] %v2650_v48  ;;  %v2654_v53 = vcombine.high %v379_v1, %v379_v1  ;;  %v1874_v54 = vcombine.low %v379_v1, %v379_v1  ;;  %v2675_v1 = vld [vmem:[#allocation4 + $0xf0] ss:$28 sps:$4 sm:$0xff]  }
  0xdf   : > { %3080 = vst [vmem:[#allocation27_spill] sm:$0xff] %v2675_v1 }
  0xe0   : > { %3075 = vst [vmem:[#allocation23_spill] sm:$0xff] %v2654_v53 }
  0xe1   : > { %1007 = vmatpush1.bf16.msra.mxu0 %v2636_v0  ;;  %1050 = vmatpush1.bf16.msra.mxu1 %v2638_v44  ;;  %v3076_v44 = vmov 0.0   ;;  %v2662_v0 = vsel %vm583_vm1, %v1874_v54, 0  ;;  %v3083_v54 = vmov 0  }
  0xe2   : > { %1008 = vmatprep.subr.bf16.mxu0 %v2642_v7  ;;  %1051 = vmatprep.subr.bf16.mxu1 %v2644_v2  ;;  %3077 = vst [vmem:[#allocation24_spill] sm:$0xff] %v2662_v0  ;;  %v2665_v7 = vsel %vm583_vm1, %v2169_v6, 0  ;;  %v2667_v2 = vld [vmem:[#allocation4 + $0xf4] ss:$28 sps:$4 sm:$0xff]   ;;  %v2681_v6 = vld [vmem:[#allocation4 + $0xbc] ss:$28 sps:$4 sm:$0xff]  }
  0xe3   : > { %3078 = vst [vmem:[#allocation25_spill] sm:$0xff] %v2665_v7  ;;  %3079 = vst [vmem:[#allocation26_spill] sm:$0xff] %v2667_v2 }
  0xe4   : > { %3082 = vst [vmem:[#allocation29_spill] sm:$0xff] %v2681_v6 }
  0xe5   : > { %1009 = vmatpush1.bf16.msra.mxu0 %v2648_v47  ;;  %1052 = vmatpush1.bf16.msra.mxu1 %v2650_v48  ;;  %v2698_v48 = vld [vmem:[#allocation4 + $0x80] ss:$28 sps:$4 sm:$0xff]   ;;  %v2700_v47 = vld [vmem:[#allocation4 + $0x88] ss:$28 sps:$4 sm:$0xff]  }
  0xe6   : > { %1881 = vmatprep.subr.msk.bf16.mxu0 %vm583_vm1, %v2654_v53  ;;  %1961 = vmatprep.subr.bf16.mxu1 %v3076_v44  ;;  %v2677_v53 = vld [vmem:[#allocation4 + $0xf8] ss:$28 sps:$4 sm:$0xff]  }
  0xe7   : > { %3081 = vst [vmem:[#allocation28_spill] sm:$0xff] %v2677_v53 }
  0xe8   : > { %1878 = vmatmul.mubr.msk.bf16.vlgmr.msra.gmra.mxu0 %vm579_vm4, %v2502_v61  ;;  %1880 = vmatmul.mubr.msk.bf16.vlgmr.msra.gmra.mxu1 %vm579_vm4, %v2502_v61 }
  0xe9   : > { %1085 = vmatpush1.bf16.msra.mxu0 %v2662_v0  ;;  %1962 = vmatpush3.bf16.msra.mxu1 %v2665_v7  ;;  %v2688_v7 = vld [vmem:[#allocation4 + $0xb8] ss:$28 sps:$4 sm:$0xff]   ;;  %v2690_v0 = vld [vmem:[#allocation4 + $0xc0] ss:$28 sps:$4 sm:$0xff]  }
  0xea   : > { %1086 = vmatprep.subr.bf16.mxu0 %v2667_v2  ;;  %1963 = vmatprep.subr.bf16.mxu1 %v3076_v44  ;;  %3084 = vst [vmem:[#allocation30_spill] sm:$0xff] %v2688_v7  ;;  %3085 = vst [vmem:[#allocation31_spill] sm:$0xff] %v2690_v0  ;;  %v2694_v2 = vld [vmem:[#allocation4 + $0x84] ss:$28 sps:$4 sm:$0xff]  }
  0xeb   : > { %1112 = vmatprep.mubr.bf16.mxu0 %v3083_v54  ;;  %1973 = vmatprep.mubr.msk.bf16.mxu1 %vm2293_vm5, %v3076_v44  ;;  %3086 = vst [vmem:[#allocation32_spill] sm:$0xff] %v2694_v2 }
  0xed   : > { %1087 = vmatpush1.bf16.msra.mxu0 %v2675_v1  ;;  %1964 = vmatpush3.bf16.msra.mxu1 %v2677_v53  ;;  %v2704_v53 = vld [vmem:[#allocation4 + $0x4c] ss:$28 sps:$4 sm:$0xff]  }
  0xee   : > { %1088 = vmatprep.subr.bf16.mxu0 %v2681_v6  ;;  %1965 = vmatprep.subr.bf16.mxu1 %v3076_v44  ;;  %v2708_v6 = vld [vmem:[#allocation4 + $0x48] ss:$28 sps:$4 sm:$0xff]   ;;  %v2710_v1 = vld [vmem:[#allocation4 + $0x50] ss:$28 sps:$4 sm:$0xff]  }
  0xf1   : > { %1089 = vmatpush1.bf16.msra.mxu0 %v2688_v7  ;;  %1966 = vmatpush3.bf16.msra.mxu1 %v2690_v0  ;;  %v2714_v0 = vld [vmem:[#allocation4 + $0x14] ss:$28 sps:$4 sm:$0xff]  }
  0xf2   : > { %1090 = vmatprep.subr.bf16.mxu0 %v2694_v2  ;;  %1967 = vmatprep.subr.bf16.mxu1 %v3076_v44  ;;  %v2718_v2 = vld [vmem:[#allocation4 + $0x10] ss:$28 sps:$4 sm:$0xff]   ;;  %v2720_v7 = vld [vmem:[#allocation4 + $0x18] ss:$28 sps:$4 sm:$0xff]  }
  0xf5   : > { %1091 = vmatpush1.bf16.msra.mxu0 %v2698_v48  ;;  %1968 = vmatpush3.bf16.msra.mxu1 %v2700_v47 }
  0xf6   : > { %1092 = vmatprep.subr.bf16.mxu0 %v2704_v53  ;;  %1969 = vmatprep.subr.bf16.mxu1 %v3076_v44 }
  0xf9   : > { %1093 = vmatpush1.bf16.msra.mxu0 %v2708_v6  ;;  %1970 = vmatpush3.bf16.msra.mxu1 %v2710_v1 }
  0xfa   : > { %1094 = vmatprep.subr.bf16.mxu0 %v2714_v0  ;;  %1971 = vmatprep.subr.bf16.mxu1 %v3076_v44 }
  0xfd   : > { %1095 = vmatpush1.bf16.msra.mxu0 %v2718_v2  ;;  %1972 = vmatpush3.bf16.msra.mxu1 %v2720_v7 }
  0xfe   : > { %1884 = vmatprep.subr.msk.bf16.mxu0 %vm583_vm1, %v2410_v12  ;;  %1886 = vmatprep.subr.msk.bf16.mxu1 %vm583_vm1, %v2412_v13  ;;  %v3087_v12 = vld [vmem:[#allocation9_spill] sm:$0xff]  ;;  %v3088_v13 = vld [vmem:[#allocation10_spill] sm:$0xff] }
 0x100   : > { %1882 = vmatmul.mubr.msk.bf16.vlgmr.msra.gmra.mxu0 %vm579_vm4, %v2502_v61  ;;  %1974 = vmatmul.mubr.msk.bf16.vlgmr.msra.gmra.mxu1 %vm579_vm4, %v2502_v61 }
 0x101   : > { %1172 = vmatpush1.bf16.msra.mxu0 %v2423_v20  ;;  %1215 = vmatpush1.bf16.msra.mxu1 %v2429_v22  ;;  %v3090_v20 = vld [vmem:[#allocation12_spill] sm:$0xff]  ;;  %v3092_v22 = vld [vmem:[#allocation14_spill] sm:$0xff] }
 0x102   : > { %1173 = vmatprep.subr.bf16.mxu0 %v2416_v18  ;;  %1216 = vmatprep.subr.bf16.mxu1 %v2425_v21  ;;  %v3089_v18 = vld [vmem:[#allocation11_spill] sm:$0xff]  ;;  %v3091_v21 = vld [vmem:[#allocation13_spill] sm:$0xff] }
 0x103   : > { %1199 = vmatprep.mubr.bf16.mxu0 %v3083_v54  ;;  %1242 = vmatprep.mubr.bf16.mxu1 %v3083_v54 }
 0x105   : > { %1174 = vmatpush1.bf16.msra.mxu0 %v2431_v23  ;;  %1217 = vmatpush1.bf16.msra.mxu1 %v2437_v26  ;;  %v3093_v23 = vld [vmem:[#allocation15_spill] sm:$0xff]  ;;  %v3095_v26 = vld [vmem:[#allocation17_spill] sm:$0xff] }
 0x106   : > { %1175 = vmatprep.subr.bf16.mxu0 %v2433_v25  ;;  %1218 = vmatprep.subr.bf16.mxu1 %v2440_v27  ;;  %v3094_v25 = vld [vmem:[#allocation16_spill] sm:$0xff]  ;;  %v3096_v27 = vld [vmem:[#allocation18_spill] sm:$0xff] }
 0x109   : > { %1176 = vmatpush1.bf16.msra.mxu0 %v2443_v28  ;;  %1219 = vmatpush1.bf16.msra.mxu1 %v2449_v30  ;;  %v3097_v28 = vld [vmem:[#allocation19_spill] sm:$0xff]  ;;  %v3099_v30 = vld [vmem:[#allocation21_spill] sm:$0xff] }
 0x10a   : > { %1177 = vmatprep.subr.bf16.mxu0 %v2446_v29  ;;  %1220 = vmatprep.subr.bf16.mxu1 %v2452_v31  ;;  %v3098_v29 = vld [vmem:[#allocation20_spill] sm:$0xff]  ;;  %v3100_v31 = vld [vmem:[#allocation22_spill] sm:$0xff] }
 0x10d   : > { %1178 = vmatpush1.bf16.msra.mxu0 %v2455_v32  ;;  %1221 = vmatpush1.bf16.msra.mxu1 %v2461_v34  ;;  %v3101_v32 = vld [vmem:[#allocation23_spill] sm:$0xff]  ;;  %v3103_v34 = vld [vmem:[#allocation25_spill] sm:$0xff] }
 0x10e   : > { %1179 = vmatprep.subr.bf16.mxu0 %v2458_v33  ;;  %1222 = vmatprep.subr.bf16.mxu1 %v2464_v35  ;;  %v3102_v33 = vld [vmem:[#allocation24_spill] sm:$0xff]  ;;  %v3104_v35 = vld [vmem:[#allocation26_spill] sm:$0xff] }
 0x111   : > { %1180 = vmatpush1.bf16.msra.mxu0 %v2467_v36  ;;  %1223 = vmatpush1.bf16.msra.mxu1 %v2473_v38  ;;  %v3105_v36 = vld [vmem:[#allocation27_spill] sm:$0xff]  ;;  %v3107_v38 = vld [vmem:[#allocation29_spill] sm:$0xff] }
 0x112   : > { %1181 = vmatprep.subr.bf16.mxu0 %v2470_v37  ;;  %1224 = vmatprep.subr.bf16.mxu1 %v2476_v40  ;;  %v3106_v37 = vld [vmem:[#allocation28_spill] sm:$0xff]  ;;  %v3108_v40 = vld [vmem:[#allocation30_spill] sm:$0xff] }
 0x115   : > { %1182 = vmatpush1.bf16.msra.mxu0 %v2479_v41  ;;  %1225 = vmatpush1.bf16.msra.mxu1 %v2485_v43  ;;  %v3109_v41 = vld [vmem:[#allocation31_spill] sm:$0xff] }
 0x116   : > { %1888 = vmatprep.subr.msk.bf16.mxu0 %vm583_vm1, %v2482_v42  ;;  %1977 = vmatprep.subr.bf16.mxu1 %v3076_v44  ;;  %v3110_v42 = vld [vmem:[#allocation32_spill] sm:$0xff] }
 0x118   : > { %1885 = vmatmul.mubr.msk.bf16.vlgmr.msra.gmra.mxu0 %vm579_vm4, %v2529_v11  ;;  %1887 = vmatmul.mubr.msk.bf16.vlgmr.msra.gmra.mxu1 %vm579_vm4, %v2529_v11 }
 0x119   : > { %1258 = vmatpush1.bf16.msra.mxu0 %v2500_v60  ;;  %1978 = vmatpush3.bf16.msra.mxu1 %v2505_v62 }
 0x11a   : > { %1259 = vmatprep.subr.bf16.mxu0 %v2507_v63  ;;  %1979 = vmatprep.subr.bf16.mxu1 %v3076_v44 }
 0x11b   : > { %1285 = vmatprep.mubr.bf16.mxu0 %v3083_v54  ;;  %1989 = vmatprep.mubr.msk.bf16.mxu1 %vm2293_vm5, %v3076_v44 }
 0x11d   : > { %1260 = vmatpush1.bf16.msra.mxu0 %v2519_v8  ;;  %1980 = vmatpush3.bf16.msra.mxu1 %v2521_v9 }
 0x11e   : > { %1261 = vmatprep.subr.bf16.mxu0 %v2527_v10  ;;  %1981 = vmatprep.subr.bf16.mxu1 %v3076_v44 }
 0x121   : > { %1262 = vmatpush1.bf16.msra.mxu0 %v2536_v14  ;;  %1982 = vmatpush3.bf16.msra.mxu1 %v2538_v15 }
 0x122   : > { %1263 = vmatprep.subr.bf16.mxu0 %v2542_v16  ;;  %1983 = vmatprep.subr.bf16.mxu1 %v3076_v44 }
 0x125   : > { %1264 = vmatpush1.bf16.msra.mxu0 %v2546_v17  ;;  %1984 = vmatpush3.bf16.msra.mxu1 %v2548_v19 }
 0x126   : > { %1265 = vmatprep.subr.bf16.mxu0 %v2552_v24  ;;  %1985 = vmatprep.subr.bf16.mxu1 %v3076_v44 }
 0x129   : > { %1266 = vmatpush1.bf16.msra.mxu0 %v2556_v39  ;;  %1986 = vmatpush3.bf16.msra.mxu1 %v2558_v45 }
 0x12a   : > { %1267 = vmatprep.subr.bf16.mxu0 %v2562_v46  ;;  %1987 = vmatprep.subr.bf16.mxu1 %v3076_v44 }
 0x12d   : > { %1268 = vmatpush1.bf16.msra.mxu0 %v2566_v49  ;;  %1988 = vmatpush3.bf16.msra.mxu1 %v2568_v50 }
 0x12e   : > { %1891 = vmatprep.subr.msk.bf16.mxu0 %vm583_vm1, %v2570_v51  ;;  %1893 = vmatprep.subr.msk.bf16.mxu1 %vm583_vm1, %v2574_v52 }
 0x130   : > { %1889 = vmatmul.mubr.msk.bf16.vlgmr.msra.gmra.mxu0 %vm579_vm4, %v2529_v11  ;;  %1990 = vmatmul.mubr.msk.bf16.vlgmr.msra.gmra.mxu1 %vm579_vm4, %v2529_v11 }
 0x131   : > { %1342 = vmatpush1.bf16.msra.mxu0 %v2583_v55  ;;  %1385 = vmatpush1.bf16.msra.mxu1 %v2586_v56 }
 0x132   : > { %1343 = vmatprep.subr.bf16.mxu0 %v2588_v57  ;;  %1386 = vmatprep.subr.bf16.mxu1 %v2590_v58 }
 0x133   : > { %1369 = vmatprep.mubr.bf16.mxu0 %v3083_v54  ;;  %1412 = vmatprep.mubr.bf16.mxu1 %v3083_v54 }
 0x135   : > { %1344 = vmatpush1.bf16.msra.mxu0 %v2598_v59  ;;  %1387 = vmatpush1.bf16.msra.mxu1 %v2600_v3 }
 0x136   : > { %1345 = vmatprep.subr.bf16.mxu0 %v2604_v4  ;;  %1388 = vmatprep.subr.bf16.mxu1 %v2606_v5 }
 0x139   : > { %1346 = vmatpush1.bf16.msra.mxu0 %v3087_v12  ;;  %1389 = vmatpush1.bf16.msra.mxu1 %v3088_v13 }
 0x13a   : > { %1347 = vmatprep.subr.bf16.mxu0 %v3089_v18  ;;  %1390 = vmatprep.subr.bf16.mxu1 %v3090_v20 }
 0x13d   : > { %1348 = vmatpush1.bf16.msra.mxu0 %v3091_v21  ;;  %1391 = vmatpush1.bf16.msra.mxu1 %v3092_v22 }
 0x13e   : > { %1349 = vmatprep.subr.bf16.mxu0 %v3093_v23  ;;  %1392 = vmatprep.subr.bf16.mxu1 %v3094_v25 }
 0x141   : > { %1350 = vmatpush1.bf16.msra.mxu0 %v3095_v26  ;;  %1393 = vmatpush1.bf16.msra.mxu1 %v3096_v27 }
 0x142   : > { %1351 = vmatprep.subr.bf16.mxu0 %v3097_v28  ;;  %1394 = vmatprep.subr.bf16.mxu1 %v3098_v29  ;;  %v1551_v29 = vlaneseq }
 0x145   : > { %1352 = vmatpush1.bf16.msra.mxu0 %v3099_v30  ;;  %1395 = vmatpush1.bf16.msra.mxu1 %v3100_v31  ;;  %v2930_v31 = vshrl.u32 %v1551_v29, 7 }
 0x146   : > { %1895 = vmatprep.subr.msk.bf16.mxu0 %vm583_vm1, %v3101_v32  ;;  %1993 = vmatprep.subr.bf16.mxu1 %v3076_v44 }
 0x148   : > { %1892 = vmatmul.mubr.msk.bf16.vlgmr.msra.gmra.mxu0 %vm579_vm4, %v2529_v11  ;;  %1894 = vmatmul.mubr.msk.bf16.vlgmr.msra.gmra.mxu1 %vm579_vm4, %v2529_v11 }
 0x149   : > { %1428 = vmatpush1.bf16.msra.mxu0 %v3102_v33  ;;  %1994 = vmatpush3.bf16.msra.mxu1 %v3103_v34  ;;  %v1553_v33 = vsub.s32 0, %v2930_v31  ;;  %v2935_v34 = vld [vmem:[#allocation6] sm:$0x7f] }
 0x14a   : > { %1429 = vmatprep.subr.bf16.mxu0 %v3104_v35  ;;  %1995 = vmatprep.subr.bf16.mxu1 %v3076_v44  ;;  %v1561_v35 = vsub.s32 2, %v2930_v31 }
 0x14b   : > { %1455 = vmatprep.mubr.bf16.mxu0 %v3083_v54  ;;  %2005 = vmatprep.mubr.msk.bf16.mxu1 %vm2293_vm5, %v3076_v44 }
 0x14d   : > { %1430 = vmatpush1.bf16.msra.mxu0 %v3105_v36  ;;  %1996 = vmatpush3.bf16.msra.mxu1 %v3106_v37  ;;  %v1557_v37 = vsub.s32 1, %v2930_v31 }
 0x14e   : > { %1431 = vmatprep.subr.bf16.mxu0 %v3107_v38  ;;  %1997 = vmatprep.subr.bf16.mxu1 %v3076_v44  ;;  %v1565_v38 = vsub.s32 3, %v2930_v31 }
 0x14f   : > { %v1558_v29 = vrot.slane %v2935_v34, %v1557_v37 }
 0x150   : > { %v1566_v50 = vrot.slane %v2935_v34, %v1565_v38 }
 0x151   : > { %1432 = vmatpush1.bf16.msra.mxu0 %v3108_v40  ;;  %1998 = vmatpush3.bf16.msra.mxu1 %v3109_v41  ;;  %v1554_v41 = vrot.slane %v2935_v34, %v1553_v33 }
 0x152   : > { %1433 = vmatprep.subr.bf16.mxu0 %v3110_v42  ;;  %1999 = vmatprep.subr.bf16.mxu1 %v3076_v44 }
 0x155   : > { %1434 = vmatpush1.bf16.msra.mxu0 %v2698_v48  ;;  %2000 = vmatpush3.bf16.msra.mxu1 %v2700_v47 }
 0x156   : > { %1435 = vmatprep.subr.bf16.mxu0 %v2704_v53  ;;  %2001 = vmatprep.subr.bf16.mxu1 %v3076_v44 }
 0x159   : > { %1436 = vmatpush1.bf16.msra.mxu0 %v2708_v6  ;;  %2002 = vmatpush3.bf16.msra.mxu1 %v2710_v1 }
 0x15a   : > { %1437 = vmatprep.subr.bf16.mxu0 %v2714_v0  ;;  %2003 = vmatprep.subr.bf16.mxu1 %v3076_v44 }
 0x15d   : > { %1438 = vmatpush1.bf16.msra.mxu0 %v2718_v2  ;;  %2004 = vmatpush3.bf16.msra.mxu1 %v2720_v7 }
 0x160   : > { %1896 = vmatmul.mubr.msk.bf16.vlgmr.msra.gmra.mxu0 %vm579_vm4, %v2529_v11  ;;  %2006 = vmatmul.mubr.msk.bf16.vlgmr.msra.gmra.mxu1 %vm579_vm4, %v2529_v11 }
 0x178   : > { %v2858_v43 = vpop.f32.mrf.mxu1  ;;  %v639_v24 = vpop.f32.mrf.mxu0 }
 0x17a   : > { %v2860_v60 = vpop.f32.mrf.mxu1  ;;  %v2886_v39 = vpop.f32.mrf.mxu0 }
 0x17c   : > { %v2862_v61 = vpop.f32.mrf.mxu1  ;;  %v2888_v45 = vpop.f32.mrf.mxu0 }
 0x17e   : > { %v2864_v62 = vpop.f32.mrf.mxu1  ;;  %v2890_v46 = vpop.f32.mrf.mxu0 }
 0x190   : > { %v2866_v0 = vpop.f32.mrf.mxu1  ;;  %v2896_v51 = vpop.f32.mrf.mxu0 }
 0x192   : > { %v1959_v44 = vpop.f32.mrf.mxu1  ;;  %v2902_v57 = vpop.f32.mrf.mxu0 }
 0x194   : > { %v2868_v63 = vpop.f32.mrf.mxu1  ;;  %v2904_v59 = vpop.f32.mrf.mxu0 }
 0x196   : > { %v1960_v8 = vpop.f32.mrf.mxu1  ;;  %v2906_v3 = vpop.f32.mrf.mxu0 }
 0x1a8   : > { %v2870_v9 = vpop.f32.mrf.mxu1  ;;  %v1028_v4 = vpop.f32.mrf.mxu0 }
 0x1a9   : > { %v1509_v10 = vmax.f32 %v2858_v43, %v2870_v9  ;;  %v1507_v44 = vmax.f32 %v639_v24, %v1028_v4 }
 0x1aa   : > { %v2874_v11 = vpop.f32.mrf.mxu1  ;;  %v1030_v5 = vpop.f32.mrf.mxu0 }
 0x1ab   : > { %v1510_v14 = vmax.f32 %v2860_v60, %v2874_v11 }
 0x1ac   : > { %v2878_v15 = vpop.f32.mrf.mxu1  ;;  %v2908_v7 = vpop.f32.mrf.mxu0 }
 0x1ad   : > { %v1514_v37 = vmax.f32 %v2888_v45, %v2908_v7  ;;  %v3111_v60 = vmax.f32 %v2862_v61, %v2878_v15 }
 0x1ae   : > { %v2882_v17 = vpop.f32.mrf.mxu1  ;;  %v2910_v2 = vpop.f32.mrf.mxu0 }
 0x1af   : > { %v3112_v61 = vmax.f32 %v2864_v62, %v2882_v17 }
 0x1c0   : > { %v2892_v49 = vpop.f32.mrf.mxu1  ;;  %v2912_v47 = vpop.f32.mrf.mxu0 }
 0x1c2   : > { %v1975_v52 = vpop.f32.mrf.mxu1  ;;  %v2914_v48 = vpop.f32.mrf.mxu0 }
 0x1c4   : > { %v2898_v55 = vpop.f32.mrf.mxu1  ;;  %v2916_v1 = vpop.f32.mrf.mxu0 }
 0x1c6   : > { %v1976_v58 = vpop.f32.mrf.mxu1  ;;  %v2918_v54 = vpop.f32.mrf.mxu0 }
 0x1c7   : > { %v1562_v58 = vrot.slane %v2935_v34, %v1561_v35 }
 0x1d8   : > { %v1244_v53 = vpop.f32.mrf.mxu1  ;;  %v1201_v13 = vpop.f32.mrf.mxu0 }
 0x1da   : > { %v1246_v6 = vpop.f32.mrf.mxu1  ;;  %v1203_v20 = vpop.f32.mrf.mxu0 }
 0x1dc   : > { %v1248_v12 = vpop.f32.mrf.mxu1  ;;  %v1205_v23 = vpop.f32.mrf.mxu0 }
 0x1de   : > { %v2920_v18 = vpop.f32.mrf.mxu1  ;;  %v1207_v27 = vpop.f32.mrf.mxu0 }
 0x1f0   : > { %v2922_v21 = vpop.f32.mrf.mxu1  ;;  %v2926_v28 = vpop.f32.mrf.mxu0 }
 0x1f2   : > { %v1991_v22 = vpop.f32.mrf.mxu1  ;;  %v2928_v30 = vpop.f32.mrf.mxu0 }
 0x1f3   : > { %v1508_v22 = vmax.f32 %v2886_v39, %v1030_v5 }
 0x1f4   : > { %v2924_v25 = vpop.f32.mrf.mxu1  ;;  %v2932_v32 = vpop.f32.mrf.mxu0 }
 0x1f6   : > { %v1992_v26 = vpop.f32.mrf.mxu1  ;;  %v2938_v36 = vpop.f32.mrf.mxu0 }
 0x208   : > { %v1371_v40 = vpop.f32.mrf.mxu0  ;;  %v1414_v42 = vpop.f32.mrf.mxu1 }
 0x209   : > { %v1521_v8 = vmax.f32 %v1201_v13, %v1371_v40  ;;  %v1523_v52 = vmax.f32 %v1244_v53, %v1414_v42 }
 0x20a   : > { %v1373_v26 = vpop.f32.mrf.mxu0  ;;  %v1416_v56 = vpop.f32.mrf.mxu1 }
 0x20b   : > { %v1535_v19 = vmax.f32 %v1507_v44, %v1521_v8  ;;  %v1537_v33 = vmax.f32 %v1509_v10, %v1523_v52  ;;  %v1522_v16 = vmax.f32 %v1203_v20, %v1373_v26  ;;  %v1524_v24 = vmax.f32 %v1246_v6, %v1416_v56 }
 0x20c   : > { %v1375_v4 = vpop.f32.mrf.mxu0  ;;  %v1418_v53 = vpop.f32.mrf.mxu1  ;;  %v1515_v56 = vmax.f32 %v2890_v46, %v2910_v2 }
 0x20d   : > { %v1586_v13 = vadd.f32 %v1554_v41, %v1535_v19  ;;  %v1588_v39 = vadd.f32 %v1562_v58, %v1537_v33  ;;  %v1536_v5 = vmax.f32 %v1508_v22, %v1522_v16  ;;  %v1538_v35 = vmax.f32 %v1510_v14, %v1524_v24  ;;  %v1673_v22 = vld [vmem:[%s2965_s21 + $0x24] sm:$0x77] }
 0x20e   : > { %v1528_v38 = vmax.f32 %v1205_v23, %v1375_v4  ;;  %v1530_v43 = vmax.f32 %v1248_v12, %v1418_v53  ;;  %v1377_v9 = vpop.f32.mrf.mxu0  ;;  %v1420_v10 = vpop.f32.mrf.mxu1  ;;  %v1569_v24 = vsub.s32 4, %v2930_v31  ;;  %v1577_v4 = vsub.s32 6, %v2930_v31 }
 0x20f   : > { %v1587_v6 = vadd.f32 %v1558_v29, %v1536_v5  ;;  %v1589_v19 = vadd.f32 %v1566_v50, %v1538_v35  ;;  %v1529_v14 = vmax.f32 %v1207_v27, %v1377_v9  ;;  %v1531_v20 = vmax.f32 %v2920_v18, %v1420_v10 }
 0x210   : > { %v1542_v16 = vmax.f32 %v1514_v37, %v1528_v38  ;;  %v1544_v11 = vmax.f32 %v3111_v60, %v1530_v43  ;;  %v1600_v45 = vmax.f32 %v1586_v13, 0.0  ;;  %v1602_v7 = vmax.f32 %v1588_v39, 0.0 }
 0x211   : > { %v1601_v12 = vmax.f32 %v1587_v6, 0.0  ;;  %v1603_v23 = vmax.f32 %v1589_v19, 0.0  ;;  %v1543_v40 = vmax.f32 %v1515_v56, %v1529_v14  ;;  %v1545_v15 = vmax.f32 %v3112_v61, %v1531_v20 }
 0x212   : > { %v1593_v46 = vadd.f32 %v1554_v41, %v1542_v16  ;;  %v1595_v2 = vadd.f32 %v1562_v58, %v1544_v11  ;;  %v1670_v58 = vld [vmem:[%s2965_s21 + $0x1c] sm:$0x77]  ;;  %v1573_v53 = vsub.s32 5, %v2930_v31  ;;  %v1570_v39 = vrot.slane %v2935_v34, %v1569_v24 }
 0x213   : > { %v1909_v18 = vpack.c.bf16 %v1601_v12, %v1600_v45  ;;  %v1910_v27 = vpack.c.bf16 %v1603_v23, %v1602_v7  ;;  %v1594_v42 = vadd.f32 %v1558_v29, %v1543_v40  ;;  %v1596_v41 = vadd.f32 %v1566_v50, %v1545_v15  ;;  %v1676_v15 = vld [vmem:[%s2965_s21 + $0x2c] sm:$0x77] }
 0x214   : > { %v1607_v44 = vmax.f32 %v1593_v46, 0.0  ;;  %v1609_v8 = vmax.f32 %v1595_v2, 0.0  ;;  %v1511_v35 = vmax.f32 %v2896_v51, %v2912_v47  ;;  %v1578_v43 = vrot.slane %v2935_v34, %v1577_v4 }
 0x215   : > { %1658 = vst [vmem:[%s2965_s21] sm:$0xff] %v1909_v18  ;;  %1659 = vst [vmem:[%s2965_s21 + $0x8] sm:$0xff] %v1910_v27  ;;  %v1608_v52 = vmax.f32 %v1594_v42, 0.0  ;;  %v1610_v62 = vmax.f32 %v1596_v41, 0.0  ;;  %v1574_v10 = vrot.slane %v2935_v34, %v1573_v53  ;;  %v1512_v31 = vmax.f32 %v2902_v57, %v2914_v48 }
 0x216   : > { %v3115_v19 = vmax.f32 %v2866_v0, %v2892_v49  ;;  %v1518_v47 = vmax.f32 %v2904_v59, %v2916_v1  ;;  %v3116_v59 = vmax.f32 %v2868_v63, %v2898_v55  ;;  %v1681_v63 = vld [vmem:[%s2965_s21 + $0x34] sm:$0x7] }
 0x217   : > { %v1913_v26 = vpack.c.bf16 %v1608_v52, %v1607_v44  ;;  %v1914_v29 = vpack.c.bf16 %v1610_v62, %v1609_v8 }
 0x219   : > { %v1671_v33 = vsel %vm2976_vm12, %v1913_v26, %v1670_v58  ;;  %v1674_v50 = vsel %vm2976_vm12, %v1914_v29, %v1673_v22 }
 0x21a   : > { %1672 = vst [vmem:[%s2965_s21 + $0x1c] sm:$0x77] %v1671_v33  ;;  %1675 = vst [vmem:[%s2965_s21 + $0x24] sm:$0x77] %v1674_v50 }
 0x220   : > { %v1457_v13 = vpop.f32.mrf.mxu0  ;;  %v1500_v5 = vpop.f32.mrf.mxu1 }
 0x221   : > { %v1525_v37 = vmax.f32 %v2926_v28, %v1457_v13  ;;  %v1527_v38 = vmax.f32 %v2922_v21, %v1500_v5 }
 0x222   : > { %v1459_v9 = vpop.f32.mrf.mxu0  ;;  %v2007_v56 = vpop.f32.mrf.mxu1 }
 0x223   : > { %v1539_v6 = vmax.f32 %v1511_v35, %v1525_v37  ;;  %v1541_v16 = vmax.f32 %v3115_v19, %v1527_v38  ;;  %v1526_v51 = vmax.f32 %v2928_v30, %v1459_v9  ;;  %v1519_v30 = vmax.f32 %v2906_v3, %v2918_v54 }
 0x224   : > { %v1461_v21 = vpop.f32.mrf.mxu0  ;;  %v1503_v28 = vpop.f32.mrf.mxu1 }
 0x225   : > { %v1590_v60 = vadd.f32 %v1570_v39, %v1539_v6  ;;  %v1592_v11 = vadd.f32 %v1578_v43, %v1541_v16  ;;  %v1540_v14 = vmax.f32 %v1512_v31, %v1526_v51  ;;  %v1532_v34 = vmax.f32 %v2932_v32, %v1461_v21 }
 0x226   : > { %v1534_v20 = vmax.f32 %v2924_v25, %v1503_v28  ;;  %v1463_v57 = vpop.f32.mrf.mxu0  ;;  %v2008_v48 = vpop.f32.mrf.mxu1 }
 0x227   : > { %v1606_v45 = vmax.f32 %v1592_v11, 0.0  ;;  %v1591_v0 = vadd.f32 %v1574_v10, %v1540_v14  ;;  %v1546_v49 = vmax.f32 %v1518_v47, %v1532_v34  ;;  %v1533_v32 = vmax.f32 %v2938_v36, %v1463_v57 }
 0x228   : > { %v1548_v1 = vmax.f32 %v3116_v59, %v1534_v20  ;;  %v1604_v7 = vmax.f32 %v1590_v60, 0.0 }
 0x229   : > { %v1912_v25 = vpack.c.bf16 %v1606_v45, %v1606_v45  ;;  %v1605_v12 = vmax.f32 %v1591_v0, 0.0  ;;  %v1597_v23 = vadd.f32 %v1570_v39, %v1546_v49  ;;  %v1547_v2 = vmax.f32 %v1519_v30, %v1533_v32 }
 0x22a   : > { %v1599_v46 = vadd.f32 %v1578_v43, %v1548_v1 }
 0x22b   : > { %1662 = vst.msk [vmem:[%s2965_s21 + $0x18] sm:$0xf] %vm1661_vm13, %v1912_v25  ;;  %v1911_v3 = vpack.c.bf16 %v1605_v12, %v1604_v7  ;;  %v1598_v40 = vadd.f32 %v1574_v10, %v1547_v2  ;;  %v1611_v55 = vmax.f32 %v1597_v23, 0.0 }
 0x22c   : > { %v1613_v54 = vmax.f32 %v1599_v46, 0.0 }
 0x22d   : > { %1660 = vst [vmem:[%s2965_s21 + $0x10] sm:$0xff] %v1911_v3  ;;  %v1612_v61 = vmax.f32 %v1598_v40, 0.0 }
 0x22e   : > { %v1916_v36 = vpack.c.bf16 %v1613_v54, %v1613_v54 }
 0x22f   : > { %v1915_v27 = vpack.c.bf16 %v1612_v61, %v1611_v55 }
 0x230   : > { %v1682_v18 = vsel %vm1680_vm15, %v1916_v36, %v1681_v63 }
 0x231   : > { %1683 = vst [vmem:[%s2965_s21 + $0x34] sm:$0x7] %v1682_v18  ;;  %v1677_v42 = vsel %vm2976_vm12, %v1915_v27, %v1676_v15 }
 0x232   : > { %1678 = vst [vmem:[%s2965_s21 + $0x2c] sm:$0x77] %v1677_v42 }
 0x233 PF: > { %s16_s15 = sadd.s32 1, %s2282_s15  }
 0x234   : > { %p13_p2 = scmp.ge.s32.totalorder %s16_s15, 4  }
 0x236   :  { %15 = sbr.rel (!%p13_p2) target bundleno = 2 (0x2), region = 80 }
 0x23b   :  { %1705 = vsyncpa [#allocation3], 1 }
 0x23c   :  { %1707 = vsyncpa [#allocation3 + $0x1], 1 }
 0x23d   :  { %1708 = vsyncpa [#allocation5], 1 }

// kernel: snn_forward.4
= control target key start
LH: loop header
LB: loop body
LE: loop exit
PB: predicated region body
PF: predicated region fallthrough
CT: control target
= control target key end

     0   :  { %8 = vsyncpa [#allocation4], 0  ;;  %s4124_s0 = inlined_call_operand.vmem [shape: bf16[2,13,13,64], index: 0, kind: input, shape index: {}]   ;;  %s4125_s1 = inlined_call_operand.hbm [shape: bf16[576,128], index: 1, kind: input, shape index: {}]   ;;  %s4126_s2 = inlined_call_operand.hbm [shape: f32[1,128], index: 2, kind: input, shape index: {}]   ;;  %s4127_s3 = inlined_call_operand.vmem [shape: bf16[2,25,128], index: 3, kind: output, shape index: {}]  }
   0x1   :  { %9 = vsyncpa [#allocation6], 0  ;;  %s3168_s12 = smov 0  }
   0x2 LB: > { %s3174_s13 = sadd.s32 4294967295, %s3139_s12   ;;  %p2259_p0 = scmp.ge.s32.totalorder %s3139_s12, 1  ;;  %s3139_s12 = sphi %s3168_s12, %s15_s12  }
   0x3   : > { %p114_p1 = scmp.lt.s32.totalorder %s3139_s12, 3  ;;  %s3141_s14 = smov [#allocation3]  }
   0x4   : > { %s126_s15 = sshll.u32 %s3141_s14, 4  ;;  %p2970_p3 = scmp.eq.s32.totalorder %s3174_s13, 0  ;;  %s127_s15 = int_to_ptr.vmem [resolvable:$true] %s126_s15 }
   0x5   : > { %p3178_p2 = pnand %p2259_p0, %p114_p1  ;;  %s3142_s17 = smov [#allocation5]  }
   0x6   : > { %s140_s18 = sshll.u32 %s3142_s17, 4  ;;  %s3084_s20 = scalar_lea.vmem %s127_s15, 4608  ;;  %s141_s18 = int_to_ptr.vmem [resolvable:$true] %s140_s18 }
   0x7   : > { %p2963_p4 = pneg %p3178_p2  ;;  %p3085_p7 = scmp.ne.s32.totalorder %s127_s15, %s3084_s20 }
   0x8   : > { %p3092_p10 = scmp.lt.s32.totalorder %s127_s15, %s127_s15  ;;  %p3093_p11 = scmp.lt.s32.totalorder %s3084_s20, %s3084_s20 }
   0x9   : > { %p3187_p5 = pnand %p2970_p3, %p2963_p4 }
   0xa   : > { %p3094_p12 = por %p3093_p11, %p3092_p10 }
   0xb   : > { %p3075_p6 = pneg %p3187_p5 }
   0xd   : > { %p3087_p8 = pnand %p3085_p7, %p3075_p6 }
   0xf   : > { %p3088_p9 = pneg %p3087_p8 }
  0x11   : > { %p3095_p13 = pnand %p3094_p12, %p3088_p9 }
  0x13   : > { %3098 = shalt.err (!%p3095_p13)
}
  0x14   : > { %s3143_s21 = smov 64   ;;  %s3144_s22 = smov 4  }
  0x15   : > { %2966 = dma.hbm_to_vmem [thread:$0]  (!%p3187_p5), %s4125_s1, 4608, %s127_s15, [#allocation4], %s3143_s21, %s3143_s21, %s3144_s22  }
  0x16   : > { %s3110_s25 = scalar_lea.vmem %s141_s18, 16  ;;  %s3117_s26 = scalar_lea.vmem %s141_s18, 32 }
  0x17   : > { %p3111_p0 = scmp.ne.s32.totalorder %s141_s18, %s3110_s25  ;;  %p3118_p7 = scmp.lt.s32.totalorder %s141_s18, %s141_s18 }
  0x18   : > { %p3119_p8 = scmp.lt.s32.totalorder %s3117_s26, %s3110_s25 }
  0x19   : > { %p3113_p1 = pnand %p3111_p0, %p3075_p6 }
  0x1a   : > { %p3120_p9 = por %p3119_p8, %p3118_p7 }
  0x1b   : > { %p3114_p4 = pneg %p3113_p1 }
  0x1d   : > { %p3121_p10 = pnand %p3120_p9, %p3114_p4 }
  0x1f   : > { %3124 = shalt.err (!%p3121_p10)
}
  0x20   : > { %2969 = dma.hbm_to_vmem [thread:$0]  (!%p3187_p5), %s4126_s2, 16, %s141_s18, [#allocation6]  }
  0x21   : > { %161 = sbr.rel (%p3178_p2) target bundleno = 764 (0x2fc), region = 32 }
  0x26   : > { %3130 = dma.done.wait (%p2970_p3), [#allocation4], 4608  }
  0x27   : > { %3132 = vsyncadd (%p2970_p3), [#allocation4], 4294962688 }
  0x28   : > { %3134 = dma.done.wait (%p2970_p3), [#allocation6], 16  }
  0x29   : > { %3136 = vsyncadd (%p2970_p3), [#allocation6], 4294967280  ;;  %p189_p6 = scmp.lt.s32.totalorder %s3174_s13, 1  ;;  %s3145_s6 = smov 64   ;;  %v3248_v10 = vld [vmem:[#allocation3 + $0x78] sm:$0xff]   ;;  %v3264_v21 = vld [vmem:[#allocation3 + $0x70] sm:$0xff]  }
  0x2a   : > { %2344 = vmatprep.subr.bf16.mxu0 %v3248_v10  ;;  %v3262_v20 = vld [vmem:[#allocation3 + $0x38] sm:$0xff]   ;;  %v3272_v24 = vld [vmem:[#allocation3 + $0x30] sm:$0xff]   ;;  %v3286_v29 = vld [vmem:[#allocation3 + $0x68] sm:$0xff]   ;;  %v4129_v61 = vmov 0.0   ;;  %vm444_vm0 = vcmask 523264   ;;  %vm3147_vm1 = vmmov 0  }
  0x2b   : > { %s4147_s13 = smov (!%p189_p6, %s3174_s13), 1  ;;  %v3267_v23 = vld [vmem:[#allocation3 + $0xf8] sm:$0xff]   ;;  %2345 = vmatpush3.bf16.msra.mxu0 %v3262_v20  ;;  %v3293_v31 = vld [vmem:[#allocation3 + $0xf0] sm:$0xff]   ;;  %v3297_v33 = vld [vmem:[#allocation3 + $0x28] sm:$0xff]   ;;  %vm2174_vm2 = vcmask 1040384  }
  0x2c   : > { %s2954_s29 = smul.u32 104, %s4147_s13  ;;  %2346 = vmatprep.subr.bf16.mxu0 %v3264_v21  ;;  %2366 = vmatprep.subr.bf16.mxu1 %v3267_v23  ;;  %v3280_v27 = vld [vmem:[#allocation3 + $0xb8] sm:$0xff]   ;;  %v3302_v35 = vld [vmem:[#allocation3 + $0xb0] sm:$0xff]   ;;  %v3306_v36 = vld [vmem:[#allocation3 + $0x60] sm:$0xff]   ;;  %s2334_s7 = sshll.u32 %s4147_s13, 4 }
  0x2d   : > { %2367 = vmatpush3.bf16.msra.mxu1 %v3280_v27  ;;  %v3310_v37 = vld [vmem:[#allocation3 + $0xe8] sm:$0xff]   ;;  %v3313_v38 = vld [vmem:[#allocation3 + $0x20] sm:$0xff]   ;;  %v3327_v42 = vld [vmem:[#allocation3 + $0x58] sm:$0xff]   ;;  %s4113_s10 = scalar_lea.vmem %s4127_s3, %s2334_s7  ;;  %vm2175_vm3 = vsmask.f32 256 }
  0x2e   : > { %s3227_s5 = scalar_lea.vmem %s4124_s0, %s2954_s29  ;;  %2368 = vmatprep.subr.bf16.mxu1 %v3293_v31  ;;  %v3320_v40 = vld [vmem:[#allocation3 + $0xa8] sm:$0xff]   ;;  %v3331_v43 = vld [vmem:[#allocation3 + $0xe0] sm:$0xff]   ;;  %v3334_v44 = vld [vmem:[#allocation3 + $0x18] sm:$0xff]  }
  0x2f   : > { %v3230_v0 = vld [vmem:[%s3227_s5 + $0x8] sm:$0x7f]   ;;  %v3233_v1 = vld [vmem:[%s3227_s5 + $0x10] sm:$0x7f]   ;;  %v3238_v2 = vld [vmem:[%s3227_s5] sm:$0x7f]   ;;  %2347 = vmatpush3.bf16.msra.mxu0 %v3272_v24 }
  0x30   : > { %379 = vrot.lane.b32.xlu0 %v3230_v0, %s3145_s6  ;;  %v289_v3 = vshrl.u32 %v3233_v1, 16  ;;  %v291_v4 = vshll.u32 %v3233_v1, 16  ;;  %v275_v5 = vshrl.u32 %v3238_v2, 16  ;;  %v277_v6 = vshll.u32 %v3238_v2, 16  ;;  %v3246_v9 = vld [vmem:[%s3227_s5 + $0x18] sm:$0x7f]   ;;  %2348 = vmatprep.subr.bf16.mxu0 %v3286_v29  ;;  %vm2176_vm4 = vmand %vm2174_vm2, %vm2175_vm3 }
  0x31   : > { %v284_v7 = vshll.u32 %v3230_v0, 16  ;;  %v4128_v12 = vrot.slane %v3230_v0, 1  ;;  %v282_v14 = vshrl.u32 %v3230_v0, 16  ;;  %v298_v15 = vshll.u32 %v3246_v9, 16  ;;  %v3257_v17 = vld [vmem:[%s3227_s5 + $0x20] sm:$0x7f]   ;;  %2369 = vmatpush3.bf16.msra.mxu1 %v3302_v35 }
  0x32   : > { %v293_v8 = vrot.slane %v291_v4, 1  ;;  %v279_v11 = vrot.slane %v277_v6, 1  ;;  %v296_v19 = vshrl.u32 %v3246_v9, 16  ;;  %v305_v26 = vshll.u32 %v3257_v17, 16  ;;  %2370 = vmatprep.subr.bf16.mxu1 %v3310_v37  ;;  %v3339_v45 = vld [vmem:[#allocation3 + $0xa0] sm:$0xff]   ;;  %v3343_v46 = vld [vmem:[#allocation3 + $0x50] sm:$0xff]  }
  0x33   : > { %v286_v18 = vrot.slane %v284_v7, 1  ;;  %v300_v22 = vrot.slane %v298_v15, 1  ;;  %v3289_v30 = vrot.slane %v3233_v1, 1  ;;  %v303_v32 = vshrl.u32 %v3257_v17, 16  ;;  %2349 = vmatpush3.bf16.msra.mxu0 %v3297_v33  ;;  %v3347_v47 = vld [vmem:[#allocation3 + $0xd8] sm:$0xff]   ;;  %v3350_v48 = vld [vmem:[#allocation3 + $0x10] sm:$0xff]  }
  0x34   : > { %v3251_v13 = vor.u32 %v293_v8, %v289_v3  ;;  %v280_v16 = vor.u32 %v279_v11, %v275_v5  ;;  %v307_v34 = vrot.slane %v305_v26, 1  ;;  %2350 = vmatprep.subr.bf16.mxu0 %v3306_v36  ;;  %v3325_v41 = vrot.slane %v3246_v9, 1  ;;  %v3353_v49 = vld [vmem:[#allocation3 + $0x98] sm:$0xff]   ;;  %v3360_v51 = vld [vmem:[#allocation3 + $0x48] sm:$0xff]   ;;  %v3364_v52 = vld [vmem:[#allocation3 + $0xd0] sm:$0xff]  }
  0x35   : > { %v3277_v25 = vor.u32 %v286_v18, %v282_v14  ;;  %v3284_v28 = vor.u32 %v300_v22, %v296_v19  ;;  %2371 = vmatpush3.bf16.msra.mxu1 %v3320_v40  ;;  %v3358_v50 = vrot.slane %v3257_v17, 1  ;;  %v3367_v53 = vld [vmem:[#allocation3 + $0x8] sm:$0xff]   ;;  %v3370_v54 = vld [vmem:[#allocation3 + $0x90] sm:$0xff]   ;;  %v3374_v55 = vld [vmem:[#allocation3 + $0x40] sm:$0xff]  }
  0x36   : > { %348 = vrot.lane.b32.xlu1 %v3251_v13, %s3145_s6  ;;  %344 = vrot.lane.b32.xlu0 %v280_v16, %s3145_s6  ;;  %v3317_v39 = vor.u32 %v307_v34, %v303_v32  ;;  %v3378_v56 = vld [vmem:[#allocation3 + $0xc8] sm:$0xff]   ;;  %v3381_v57 = vld [vmem:[#allocation3] sm:$0xff]   ;;  %v3396_v62 = vld [vmem:[%s3227_s5 + $0x28] sm:$0x7f]   ;;  %v364_v34 = vrot.slane %v3238_v2, 1 }
  0x37   : > { %2351 = vmatpush3.bf16.msra.mxu0 %v3313_v38  ;;  %2372 = vmatprep.subr.bf16.mxu1 %v3331_v43  ;;  %v3384_v58 = vld [vmem:[#allocation3 + $0x88] sm:$0xff]   ;;  %v3386_v59 = vld [vmem:[#allocation3 + $0xc0] sm:$0xff]   ;;  %v310_v63 = vshrl.u32 %v3396_v62, 16  ;;  %v312_v3 = vshll.u32 %v3396_v62, 16  ;;  %v3402_v4 = vld [vmem:[%s3227_s5 + $0x30] sm:$0x7f]  }
  0x38   : > { %2352 = vmatprep.subr.bf16.mxu0 %v3327_v42  ;;  %v3390_v60 = vld [vmem:[#allocation3 + $0x80] sm:$0xff]   ;;  %v317_v6 = vshrl.u32 %v3402_v4, 16  ;;  %v319_v7 = vshll.u32 %v3402_v4, 16  ;;  %v3417_v15 = vrot.slane %v3396_v62, 1  ;;  %v3431_v32 = vrot.slane %v3402_v4, 1 }
  0x39   : > { %2373 = vmatpush3.bf16.msra.mxu1 %v3339_v45  ;;  %v314_v5 = vrot.slane %v312_v3, 1  ;;  %v3424_v16 = vld [vmem:[%s3227_s5 + $0x38] sm:$0x7f]  }
  0x3a   : > { %407 = vrot.lane.b32.xlu1 %v4128_v12, %s3145_s6  ;;  %381 = vrot.lane.b32.xlu0 %v3233_v1, %s3145_s6  ;;  %v321_v11 = vrot.slane %v319_v7, 1  ;;  %v326_v18 = vshll.u32 %v3424_v16, 16  ;;  %v324_v19 = vshrl.u32 %v3424_v16, 16  ;;  %v3451_v12 = vrot.slane %v3424_v16, 1 }
  0x3b   : > { %2353 = vmatpush3.bf16.msra.mxu0 %v3334_v44  ;;  %2374 = vmatprep.subr.bf16.mxu1 %v3347_v47  ;;  %v3406_v8 = vor.u32 %v314_v5, %v310_v63  ;;  %v3442_v5 = vld [vmem:[%s3227_s5 + $0x40] sm:$0x7f]  }
  0x3c   : > { %2354 = vmatprep.subr.bf16.mxu0 %v3343_v46  ;;  %v3410_v14 = vor.u32 %v321_v11, %v317_v6  ;;  %v328_v22 = vrot.slane %v326_v18, 1  ;;  %v333_v6 = vshll.u32 %v3442_v5, 16  ;;  %v331_v7 = vshrl.u32 %v3442_v5, 16 }
  0x3d   : > { %2375 = vmatpush3.bf16.msra.mxu1 %v3353_v49 }
  0x3e   : > { %346 = vrot.lane.b32.xlu1 %v3277_v25, %s3145_s6  ;;  %350 = vrot.lane.b32.xlu0 %v3284_v28, %s3145_s6  ;;  %v3428_v26 = vor.u32 %v328_v22, %v324_v19  ;;  %v335_v11 = vrot.slane %v333_v6, 1  ;;  %v3446_v19 = vld [vmem:[#allocation3 + $0x118] sm:$0xff]   ;;  %v3465_v6 = vld [vmem:[#allocation3 + $0x110] sm:$0xff]  }
  0x3f   : > { %2355 = vmatpush3.bf16.msra.mxu0 %v3350_v48  ;;  %2376 = vmatprep.subr.bf16.mxu1 %v3364_v52 }
  0x40   : > { %2356 = vmatprep.subr.bf16.mxu0 %v3360_v51  ;;  %v3448_v22 = vor.u32 %v335_v11, %v331_v7  ;;  %v4139_v7 = vrot.slane %v3230_v0, 1 }
  0x41   : > { %2377 = vmatpush3.bf16.msra.mxu1 %v3370_v54 }
  0x42   : > { %409 = vrot.lane.b32.xlu1 %v3289_v30, %s3145_s6  ;;  %383 = vrot.lane.b32.xlu0 %v3246_v9, %s3145_s6  ;;  %4137 = vst [vmem:[#allocation9_spill] sm:$0xff] %v3448_v22 }
  0x43   : > { %2357 = vmatpush3.bf16.msra.mxu0 %v3367_v53  ;;  %2378 = vmatprep.subr.bf16.mxu1 %v3378_v56 }
  0x44   : > { %2358 = vmatprep.subr.bf16.mxu0 %v3374_v55 }
  0x45   : > { %2379 = vmatpush3.bf16.msra.mxu1 %v3384_v58 }
  0x46   : > { %352 = vrot.lane.b32.xlu1 %v3317_v39, %s3145_s6  ;;  %411 = vrot.lane.b32.xlu0 %v3325_v41, %s3145_s6 }
  0x47   : > { %2359 = vmatpush3.bf16.msra.mxu0 %v3381_v57  ;;  %2380 = vmatprep.subr.bf16.mxu1 %v3386_v59 }
  0x48   : > { %2834 = vmatprep.subr.bf16.mxu0 %v4129_v61 }
  0x49   : > { %2381 = vmatpush3.bf16.msra.mxu1 %v3390_v60 }
  0x4a   : > { %385 = vrot.lane.b32.xlu1 %v3257_v17, %s3145_s6  ;;  %2393 = vmatprep.subr.bf16.mxu1 %v3248_v10 }
  0x4b   : > { %354 = vrot.lane.b32.xlu0 %v3406_v8, %s3145_s6 }
  0x4e   : > { %413 = vrot.lane.b32.xlu1 %v3358_v50, %s3145_s6 }
  0x4f   : > { %387 = vrot.lane.b32.xlu0 %v3396_v62, %s3145_s6 }
  0x52   : > { %356 = vrot.lane.b32.xlu1 %v3410_v14, %s3145_s6 }
  0x53   : > { %415 = vrot.lane.b32.xlu0 %v3417_v15, %s3145_s6 }
  0x56   : > { %389 = vrot.lane.b32.xlu1 %v3402_v4, %s3145_s6 }
  0x57   : > { %358 = vrot.lane.b32.xlu0 %v3428_v26, %s3145_s6 }
  0x5a   : > { %417 = vrot.lane.b32.xlu1 %v3431_v32, %s3145_s6 }
  0x5b   : > { %391 = vrot.lane.b32.xlu0 %v3424_v16, %s3145_s6 }
  0x5e   : > { %360 = vrot.lane.b32.xlu1 %v3448_v22, %s3145_s6 }
  0x5f   : > { %419 = vrot.lane.b32.xlu0 %v3451_v12, %s3145_s6 }
  0x62   : > { %393 = vrot.lane.b32.xlu1 %v3442_v5, %s3145_s6 }
  0xa2   : > { %v380_v63 = vpop.permute.xlu0 %379 }
  0xa3   : > { %v477_v3 = vsel %vm444_vm0, %v364_v34, %v380_v63 }
  0xa4   : > { %883 = vmatprep.mubr.bf16.mxu0 %v477_v3 }
  0xa8   : > { %v349_v18 = vpop.permute.xlu1 %348  ;;  %v345_v61 = vpop.permute.xlu0 %344 }
  0xa9   : > { %v3455_v34 = vsel %vm444_vm0, %v3233_v1, %v349_v18  ;;  %v446_v63 = vsel %vm444_vm0, %v3238_v2, %v345_v61  ;;  %v4138_v1 = vmov 0.0   ;;  %v3480_v18 = vld [vmem:[#allocation3 + $0x108] sm:$0xff]  }
  0xaa   : > { %924 = vmatprep.mubr.bf16.mxu1 %v3455_v34  ;;  %884 = vmatmul.mubr.bf16.vlgmr.msra.gmra.mxu0 %v446_v63 }
  0xab   : > { %2835 = vmatpush3.bf16.msra.mxu0 %v3446_v19  ;;  %2842 = vmatprep.mubr.msk.bf16.mxu0 %vm3147_vm1, %v4138_v1 }
  0xac   : > { %v408_v3 = vpop.permute.xlu1 %407  ;;  %2836 = vmatprep.subr.bf16.mxu0 %v4138_v1  ;;  %v382_v61 = vpop.permute.xlu0 %381 }
  0xad   : > { %v517_v2 = vsel %vm444_vm0, %v3277_v25, %v408_v3  ;;  %v481_v11 = vsel %vm444_vm0, %v4139_v7, %v382_v61  ;;  %v3486_v25 = vld [vmem:[#allocation3 + $0x100] sm:$0xff]   ;;  %v3523_v61 = vld [vmem:[%s3227_s5 + $0x48] sm:$0x7f]  }
  0xae   : > { %925 = vmatmul.mubr.bf16.vlgmr.msra.gmra.mxu1 %v517_v2  ;;  %v338_v7 = vshrl.u32 %v3523_v61, 16 }
  0xaf   : > { %2394 = vmatpush3.bf16.msra.mxu1 %v3262_v20  ;;  %1008 = vmatprep.mubr.bf16.mxu1 %v481_v11 }
  0xb0   : > { %2837 = vmatpush3.bf16.msra.mxu0 %v3465_v6  ;;  %2395 = vmatprep.subr.bf16.mxu1 %v3264_v21  ;;  %v351_v63 = vpop.permute.xlu0 %350 }
  0xb1   : > { %2838 = vmatprep.subr.bf16.mxu0 %v4138_v1  ;;  %v3495_v3 = vsel %vm444_vm0, %v3246_v9, %v351_v63  ;;  %v347_v9 = vpop.permute.xlu1 %346 }
  0xb2   : > { %v449_v2 = vsel %vm444_vm0, %v3230_v0, %v347_v9  ;;  %v340_v0 = vshll.u32 %v3523_v61, 16  ;;  %v3539_v9 = vrot.slane %v3442_v5, 1 }
  0xb3   : > { %2396 = vmatpush3.bf16.msra.mxu1 %v3272_v24 }
  0xb4   : > { %2839 = vmatpush3.bf16.msra.mxu0 %v3480_v18  ;;  %2397 = vmatprep.subr.bf16.mxu1 %v3286_v29  ;;  %v342_v11 = vrot.slane %v340_v0, 1  ;;  %v384_v0 = vpop.permute.xlu0 %383 }
  0xb5   : > { %2840 = vmatprep.subr.bf16.mxu0 %v4138_v1  ;;  %421 = vrot.lane.b32.xlu1 %v3539_v9, %s3145_s6  ;;  %v485_v22 = vsel %vm444_vm0, %v3289_v30, %v384_v0 }
  0xb6   : > { %v3536_v63 = vor.u32 %v342_v11, %v338_v7 }
  0xb7   : > { %2398 = vmatpush3.bf16.msra.mxu1 %v3297_v33 }
  0xb8   : > { %2841 = vmatpush3.bf16.msra.mxu0 %v3486_v25  ;;  %2399 = vmatprep.subr.bf16.mxu1 %v3306_v36  ;;  %4140 = vst [vmem:[#allocation10_spill] sm:$0xff] %v3536_v63  ;;  %v412_v0 = vpop.permute.xlu0 %411 }
  0xb9   : > { %2415 = vmatprep.subr.bf16.mxu0 %v3267_v23  ;;  %362 = vrot.lane.b32.xlu0 %v3536_v63, %s3145_s6 }
  0xbb   : > { %2843 = vmatmul.mubr.msk.bf16.vlgmr.msra.gmra.mxu0 %vm444_vm0, %v3289_v30  ;;  %2400 = vmatpush3.bf16.msra.mxu1 %v3313_v38 }
  0xbc   : > { %2416 = vmatpush3.bf16.msra.mxu0 %v3280_v27  ;;  %2401 = vmatprep.subr.bf16.mxu1 %v3327_v42 }
  0xbd   : > { %2417 = vmatprep.subr.bf16.mxu0 %v3293_v31  ;;  %1049 = vmatprep.mubr.bf16.mxu0 %v3495_v3 }
  0xbe   : > { %395 = vrot.lane.b32.xlu0 %v3523_v61, %s3145_s6 }
  0xbf   : > { %2402 = vmatpush3.bf16.msra.mxu1 %v3334_v44 }
  0xc0   : > { %2418 = vmatpush3.bf16.msra.mxu0 %v3302_v35  ;;  %2403 = vmatprep.subr.bf16.mxu1 %v3343_v46 }
  0xc1   : > { %2419 = vmatprep.subr.bf16.mxu0 %v3310_v37 }
  0xc3   : > { %2404 = vmatpush3.bf16.msra.mxu1 %v3350_v48 }
  0xc4   : > { %2420 = vmatpush3.bf16.msra.mxu0 %v3320_v40  ;;  %2405 = vmatprep.subr.bf16.mxu1 %v3360_v51 }
  0xc5   : > { %2421 = vmatprep.subr.bf16.mxu0 %v3331_v43 }
  0xc7   : > { %2406 = vmatpush3.bf16.msra.mxu1 %v3367_v53 }
  0xc8   : > { %2422 = vmatpush3.bf16.msra.mxu0 %v3339_v45  ;;  %2407 = vmatprep.subr.bf16.mxu1 %v3374_v55 }
  0xc9   : > { %2423 = vmatprep.subr.bf16.mxu0 %v3347_v47 }
  0xcb   : > { %2408 = vmatpush3.bf16.msra.mxu1 %v3381_v57 }
  0xcc   : > { %2424 = vmatpush3.bf16.msra.mxu0 %v3353_v49  ;;  %2846 = vmatprep.subr.bf16.mxu1 %v4138_v1 }
  0xcd   : > { %2425 = vmatprep.subr.bf16.mxu0 %v3364_v52 }
  0xce   : > { %1009 = vmatmul.mubr.bf16.vlgmr.msra.gmra.mxu1 %v449_v2  ;;  %v410_v2 = vpop.permute.xlu1 %409 }
  0xcf   : > { %2847 = vmatpush3.bf16.msra.mxu1 %v3446_v19  ;;  %2854 = vmatprep.mubr.msk.bf16.mxu1 %vm3147_vm1, %v4138_v1  ;;  %v521_v7 = vsel %vm444_vm0, %v3251_v13, %v410_v2 }
  0xd0   : > { %2426 = vmatpush3.bf16.msra.mxu0 %v3370_v54  ;;  %2848 = vmatprep.subr.bf16.mxu1 %v4138_v1 }
  0xd1   : > { %2427 = vmatprep.subr.bf16.mxu0 %v3378_v56 }
  0xd2   : > { %v353_v11 = vpop.permute.xlu1 %352 }
  0xd3   : > { %2849 = vmatpush3.bf16.msra.mxu1 %v3465_v6  ;;  %v3561_v13 = vsel %vm444_vm0, %v3257_v17, %v353_v11  ;;  %v3588_v17 = vld [vmem:[%s3227_s5 + $0x50] sm:$0x7f]   ;;  %v3602_v11 = vrot.slane %v3523_v61, 1 }
  0xd4   : > { %2428 = vmatpush3.bf16.msra.mxu0 %v3384_v58  ;;  %2850 = vmatprep.subr.bf16.mxu1 %v4138_v1  ;;  %v402_v30 = vshll.u32 %v3588_v17, 16 }
  0xd5   : > { %2429 = vmatprep.subr.bf16.mxu0 %v3386_v59  ;;  %423 = vrot.lane.b32.xlu0 %v3602_v11, %s3145_s6 }
  0xd6   : > { %v404_v2 = vrot.slane %v402_v30, 1  ;;  %v386_v63 = vpop.permute.xlu1 %385  ;;  %v525_v30 = vsel %vm444_vm0, %v3284_v28, %v412_v0  ;;  %v355_v28 = vpop.permute.xlu0 %354 }
  0xd7   : > { %2851 = vmatpush3.bf16.msra.mxu1 %v3480_v18 }
  0xd8   : > { %2430 = vmatpush3.bf16.msra.mxu0 %v3390_v60  ;;  %2852 = vmatprep.subr.bf16.mxu1 %v4138_v1 }
  0xd9   : > { %2442 = vmatprep.subr.bf16.mxu0 %v3248_v10 }
  0xda   : > { %v414_v0 = vpop.permute.xlu1 %413 }
  0xdb   : > { %1050 = vmatmul.mubr.bf16.vlgmr.msra.gmra.mxu0 %v521_v7  ;;  %2853 = vmatpush3.bf16.msra.mxu1 %v3486_v25 }
  0xdc   : > { %2443 = vmatpush3.bf16.msra.mxu0 %v3262_v20  ;;  %2464 = vmatprep.subr.bf16.mxu1 %v3267_v23 }
  0xdd   : > { %2444 = vmatprep.subr.bf16.mxu0 %v3264_v21  ;;  %1137 = vmatprep.mubr.bf16.mxu0 %v485_v22  ;;  %v400_v22 = vshrl.u32 %v3588_v17, 16 }
  0xde   : > { %2855 = vmatmul.mubr.msk.bf16.vlgmr.msra.gmra.mxu1 %vm444_vm0, %v3325_v41 }
  0xdf   : > { %2465 = vmatpush3.bf16.msra.mxu1 %v3280_v27  ;;  %1178 = vmatprep.mubr.bf16.mxu1 %v3561_v13  ;;  %v3599_v7 = vor.u32 %v404_v2, %v400_v22  ;;  %v489_v22 = vsel %vm444_vm0, %v3325_v41, %v386_v63  ;;  %v3636_v41 = vsel %vm444_vm0, %v3396_v62, %v355_v28  ;;  %v3663_v62 = vld [vmem:[%s3227_s5 + $0x58] sm:$0x7f]  }
  0xe0   : > { %2445 = vmatpush3.bf16.msra.mxu0 %v3272_v24  ;;  %2466 = vmatprep.subr.bf16.mxu1 %v3293_v31  ;;  %v433_v63 = vshrl.u32 %v3663_v62, 16  ;;  %v529_v28 = vsel %vm444_vm0, %v3317_v39, %v414_v0 }
  0xe1   : > { %2446 = vmatprep.subr.bf16.mxu0 %v3286_v29  ;;  %4141 = vst [vmem:[#allocation11_spill] sm:$0xff] %v3599_v7  ;;  %439 = vrot.lane.b32.xlu1 %v3599_v7, %s3145_s6 }
  0xe3   : > { %2467 = vmatpush3.bf16.msra.mxu1 %v3302_v35 }
  0xe4   : > { %2447 = vmatpush3.bf16.msra.mxu0 %v3297_v33  ;;  %2468 = vmatprep.subr.bf16.mxu1 %v3310_v37 }
  0xe5   : > { %2448 = vmatprep.subr.bf16.mxu0 %v3306_v36  ;;  %397 = vrot.lane.b32.xlu1 %v3588_v17, %s3145_s6 }
  0xe7   : > { %2469 = vmatpush3.bf16.msra.mxu1 %v3320_v40 }
  0xe8   : > { %2449 = vmatpush3.bf16.msra.mxu0 %v3313_v38  ;;  %2470 = vmatprep.subr.bf16.mxu1 %v3331_v43 }
  0xe9   : > { %2450 = vmatprep.subr.bf16.mxu0 %v3327_v42 }
  0xeb   : > { %2471 = vmatpush3.bf16.msra.mxu1 %v3339_v45 }
  0xec   : > { %2451 = vmatpush3.bf16.msra.mxu0 %v3334_v44  ;;  %2472 = vmatprep.subr.bf16.mxu1 %v3347_v47 }
  0xed   : > { %2452 = vmatprep.subr.bf16.mxu0 %v3343_v46 }
  0xef   : > { %2473 = vmatpush3.bf16.msra.mxu1 %v3353_v49 }
  0xf0   : > { %2453 = vmatpush3.bf16.msra.mxu0 %v3350_v48  ;;  %2474 = vmatprep.subr.bf16.mxu1 %v3364_v52 }
  0xf1   : > { %2454 = vmatprep.subr.bf16.mxu0 %v3360_v51 }
  0xf3   : > { %2475 = vmatpush3.bf16.msra.mxu1 %v3370_v54 }
  0xf4   : > { %2455 = vmatpush3.bf16.msra.mxu0 %v3367_v53  ;;  %2476 = vmatprep.subr.bf16.mxu1 %v3378_v56 }
  0xf5   : > { %2456 = vmatprep.subr.bf16.mxu0 %v3374_v55 }
  0xf7   : > { %2477 = vmatpush3.bf16.msra.mxu1 %v3384_v58 }
  0xf8   : > { %2457 = vmatpush3.bf16.msra.mxu0 %v3381_v57  ;;  %2478 = vmatprep.subr.bf16.mxu1 %v3386_v59 }
  0xf9   : > { %2858 = vmatprep.subr.bf16.mxu0 %v4138_v1 }
  0xfb   : > { %1138 = vmatmul.mubr.bf16.vlgmr.msra.gmra.mxu0 %v3455_v34  ;;  %2479 = vmatpush3.bf16.msra.mxu1 %v3390_v60  ;;  %v435_v34 = vshll.u32 %v3663_v62, 16 }
  0xfc   : > { %2859 = vmatpush3.bf16.msra.mxu0 %v3446_v19  ;;  %2491 = vmatprep.subr.bf16.mxu1 %v3248_v10 }
  0xfd   : > { %2860 = vmatprep.subr.bf16.mxu0 %v4138_v1  ;;  %2866 = vmatprep.mubr.msk.bf16.mxu0 %vm3147_vm1, %v4138_v1  ;;  %v437_v2 = vrot.slane %v435_v34, 1  ;;  %v357_v34 = vpop.permute.xlu1 %356 }
  0xfe   : > { %1179 = vmatmul.mubr.bf16.vlgmr.msra.gmra.mxu1 %v525_v30  ;;  %v4133_v30 = vrot.slane %v3588_v17, 1 }
  0xff   : > { %2492 = vmatpush3.bf16.msra.mxu1 %v3262_v20  ;;  %1262 = vmatprep.mubr.bf16.mxu1 %v489_v22  ;;  %v388_v22 = vpop.permute.xlu0 %387 }
 0x100   : > { %2861 = vmatpush3.bf16.msra.mxu0 %v3465_v6  ;;  %2493 = vmatprep.subr.bf16.mxu1 %v3264_v21 }
 0x101   : > { %2862 = vmatprep.subr.bf16.mxu0 %v4138_v1  ;;  %425 = vrot.lane.b32.xlu1 %v4133_v30, %s3145_s6 }
 0x103   : > { %2494 = vmatpush3.bf16.msra.mxu1 %v3272_v24  ;;  %v416_v39 = vpop.permute.xlu0 %415 }
 0x104   : > { %2863 = vmatpush3.bf16.msra.mxu0 %v3480_v18  ;;  %2495 = vmatprep.subr.bf16.mxu1 %v3286_v29 }
 0x105   : > { %2864 = vmatprep.subr.bf16.mxu0 %v4138_v1 }
 0x107   : > { %2496 = vmatpush3.bf16.msra.mxu1 %v3297_v33 }
 0x108   : > { %2865 = vmatpush3.bf16.msra.mxu0 %v3486_v25  ;;  %2497 = vmatprep.subr.bf16.mxu1 %v3306_v36 }
 0x109   : > { %2513 = vmatprep.subr.bf16.mxu0 %v3267_v23 }
 0x10b   : > { %2867 = vmatmul.mubr.msk.bf16.vlgmr.msra.gmra.mxu0 %vm444_vm0, %v3358_v50  ;;  %2498 = vmatpush3.bf16.msra.mxu1 %v3313_v38 }
 0x10c   : > { %2514 = vmatpush3.bf16.msra.mxu0 %v3280_v27  ;;  %2499 = vmatprep.subr.bf16.mxu1 %v3327_v42 }
 0x10d   : > { %2515 = vmatprep.subr.bf16.mxu0 %v3293_v31  ;;  %1303 = vmatprep.mubr.bf16.mxu0 %v3636_v41 }
 0x10f   : > { %2500 = vmatpush3.bf16.msra.mxu1 %v3334_v44 }
 0x110   : > { %2516 = vmatpush3.bf16.msra.mxu0 %v3302_v35  ;;  %2501 = vmatprep.subr.bf16.mxu1 %v3343_v46 }
 0x111   : > { %2517 = vmatprep.subr.bf16.mxu0 %v3310_v37 }
 0x113   : > { %2502 = vmatpush3.bf16.msra.mxu1 %v3350_v48 }
 0x114   : > { %2518 = vmatpush3.bf16.msra.mxu0 %v3320_v40  ;;  %2503 = vmatprep.subr.bf16.mxu1 %v3360_v51 }
 0x115   : > { %2519 = vmatprep.subr.bf16.mxu0 %v3331_v43 }
 0x117   : > { %2504 = vmatpush3.bf16.msra.mxu1 %v3367_v53 }
 0x118   : > { %2520 = vmatpush3.bf16.msra.mxu0 %v3339_v45  ;;  %2505 = vmatprep.subr.bf16.mxu1 %v3374_v55 }
 0x119   : > { %2521 = vmatprep.subr.bf16.mxu0 %v3347_v47 }
 0x11b   : > { %2506 = vmatpush3.bf16.msra.mxu1 %v3381_v57 }
 0x11c   : > { %2522 = vmatpush3.bf16.msra.mxu0 %v3353_v49  ;;  %2870 = vmatprep.subr.bf16.mxu1 %v4138_v1 }
 0x11d   : > { %2523 = vmatprep.subr.bf16.mxu0 %v3364_v52 }
 0x11e   : > { %1263 = vmatmul.mubr.bf16.vlgmr.msra.gmra.mxu1 %v3495_v3  ;;  %v438_v3 = vor.u32 %v437_v2, %v433_v63  ;;  %v493_v63 = vsel %vm444_vm0, %v3358_v50, %v388_v22  ;;  %v3695_v2 = vsel %vm444_vm0, %v3402_v4, %v357_v34  ;;  %v390_v50 = vpop.permute.xlu1 %389  ;;  %v533_v4 = vsel %vm444_vm0, %v3406_v8, %v416_v39  ;;  %v3811_v22 = vld [vmem:[#allocation3 + $0x38] sm:$0xff]  }
 0x11f   : > { %2871 = vmatpush3.bf16.msra.mxu1 %v3446_v19  ;;  %2878 = vmatprep.mubr.msk.bf16.mxu1 %vm3147_vm1, %v4138_v1  ;;  %v3828_v39 = vld [vmem:[#allocation3 + $0xb8] sm:$0xff]  }
 0x120   : > { %2524 = vmatpush3.bf16.msra.mxu0 %v3370_v54  ;;  %2872 = vmatprep.subr.bf16.mxu1 %v4138_v1 }
 0x121   : > { %2525 = vmatprep.subr.bf16.mxu0 %v3378_v56  ;;  %441 = vrot.lane.b32.xlu0 %v438_v3, %s3145_s6  ;;  %v497_v3 = vsel %vm444_vm0, %v3417_v15, %v390_v50  ;;  %v3832_v50 = vld [vmem:[#allocation3 + $0x30] sm:$0xff]  }
 0x123   : > { %2873 = vmatpush3.bf16.msra.mxu1 %v3465_v6 }
 0x124   : > { %2526 = vmatpush3.bf16.msra.mxu0 %v3384_v58  ;;  %2874 = vmatprep.subr.bf16.mxu1 %v4138_v1 }
 0x125   : > { %2527 = vmatprep.subr.bf16.mxu0 %v3386_v59 }
 0x127   : > { %2875 = vmatpush3.bf16.msra.mxu1 %v3480_v18 }
 0x128   : > { %2528 = vmatpush3.bf16.msra.mxu0 %v3390_v60  ;;  %2876 = vmatprep.subr.bf16.mxu1 %v4138_v1 }
 0x129   : > { %2540 = vmatprep.subr.bf16.mxu0 %v3248_v10 }
 0x12b   : > { %1304 = vmatmul.mubr.bf16.vlgmr.msra.gmra.mxu0 %v529_v28  ;;  %2877 = vmatpush3.bf16.msra.mxu1 %v3486_v25 }
 0x12c   : > { %2541 = vmatpush3.bf16.msra.mxu0 %v3262_v20  ;;  %2562 = vmatprep.subr.bf16.mxu1 %v3267_v23 }
 0x12d   : > { %2542 = vmatprep.subr.bf16.mxu0 %v3264_v21  ;;  %1391 = vmatprep.mubr.bf16.mxu0 %v493_v63  ;;  %v3821_v63 = vld [vmem:[#allocation3 + $0x70] sm:$0xff]  }
 0x12e   : > { %2879 = vmatmul.mubr.msk.bf16.vlgmr.msra.gmra.mxu1 %vm444_vm0, %v3417_v15 }
 0x12f   : > { %2563 = vmatpush3.bf16.msra.mxu1 %v3280_v27  ;;  %1432 = vmatprep.mubr.bf16.mxu1 %v3695_v2 }
 0x130   : > { %2543 = vmatpush3.bf16.msra.mxu0 %v3272_v24  ;;  %2564 = vmatprep.subr.bf16.mxu1 %v3293_v31 }
 0x131   : > { %2544 = vmatprep.subr.bf16.mxu0 %v3286_v29 }
 0x133   : > { %2565 = vmatpush3.bf16.msra.mxu1 %v3302_v35 }
 0x134   : > { %2545 = vmatpush3.bf16.msra.mxu0 %v3297_v33  ;;  %2566 = vmatprep.subr.bf16.mxu1 %v3310_v37 }
 0x135   : > { %2546 = vmatprep.subr.bf16.mxu0 %v3306_v36 }
 0x137   : > { %2567 = vmatpush3.bf16.msra.mxu1 %v3320_v40 }
 0x138   : > { %2547 = vmatpush3.bf16.msra.mxu0 %v3313_v38  ;;  %2568 = vmatprep.subr.bf16.mxu1 %v3331_v43 }
 0x139   : > { %2548 = vmatprep.subr.bf16.mxu0 %v3327_v42 }
 0x13b   : > { %2569 = vmatpush3.bf16.msra.mxu1 %v3339_v45 }
 0x13c   : > { %2549 = vmatpush3.bf16.msra.mxu0 %v3334_v44  ;;  %2570 = vmatprep.subr.bf16.mxu1 %v3347_v47 }
 0x13d   : > { %2550 = vmatprep.subr.bf16.mxu0 %v3343_v46 }
 0x13f   : > { %2571 = vmatpush3.bf16.msra.mxu1 %v3353_v49 }
 0x140   : > { %2551 = vmatpush3.bf16.msra.mxu0 %v3350_v48  ;;  %2572 = vmatprep.subr.bf16.mxu1 %v3364_v52 }
 0x141   : > { %2552 = vmatprep.subr.bf16.mxu0 %v3360_v51 }
 0x143   : > { %2573 = vmatpush3.bf16.msra.mxu1 %v3370_v54 }
 0x144   : > { %2553 = vmatpush3.bf16.msra.mxu0 %v3367_v53  ;;  %2574 = vmatprep.subr.bf16.mxu1 %v3378_v56 }
 0x145   : > { %2554 = vmatprep.subr.bf16.mxu0 %v3374_v55 }
 0x147   : > { %2575 = vmatpush3.bf16.msra.mxu1 %v3384_v58 }
 0x148   : > { %2555 = vmatpush3.bf16.msra.mxu0 %v3381_v57  ;;  %2576 = vmatprep.subr.bf16.mxu1 %v3386_v59 }
 0x149   : > { %2882 = vmatprep.subr.bf16.mxu0 %v4138_v1 }
 0x14b   : > { %1392 = vmatmul.mubr.bf16.vlgmr.msra.gmra.mxu0 %v3561_v13  ;;  %2577 = vmatpush3.bf16.msra.mxu1 %v3390_v60 }
 0x14c   : > { %2883 = vmatpush3.bf16.msra.mxu0 %v3446_v19  ;;  %2589 = vmatprep.subr.bf16.mxu1 %v3248_v10  ;;  %v359_v10 = vpop.permute.xlu0 %358 }
 0x14d   : > { %2884 = vmatprep.subr.bf16.mxu0 %v4138_v1  ;;  %2890 = vmatprep.mubr.msk.bf16.mxu0 %vm3147_vm1, %v4138_v1 }
 0x14e   : > { %1433 = vmatmul.mubr.bf16.vlgmr.msra.gmra.mxu1 %v533_v4  ;;  %v3836_v4 = vld [vmem:[#allocation3 + $0x68] sm:$0xff]  }
 0x14f   : > { %2590 = vmatpush3.bf16.msra.mxu1 %v3262_v20  ;;  %1516 = vmatprep.mubr.bf16.mxu1 %v497_v3  ;;  %v3754_v20 = vsel %vm444_vm0, %v3424_v16, %v359_v10  ;;  %v3803_v16 = vld [vmem:[#allocation3 + $0x78] sm:$0xff]  }
 0x150   : > { %2885 = vmatpush3.bf16.msra.mxu0 %v3465_v6  ;;  %2591 = vmatprep.subr.bf16.mxu1 %v3264_v21 }
 0x151   : > { %2886 = vmatprep.subr.bf16.mxu0 %v4138_v1 }
 0x153   : > { %2592 = vmatpush3.bf16.msra.mxu1 %v3272_v24 }
 0x154   : > { %2887 = vmatpush3.bf16.msra.mxu0 %v3480_v18  ;;  %2593 = vmatprep.subr.bf16.mxu1 %v3286_v29  ;;  %v392_v29 = vpop.permute.xlu0 %391 }
 0x155   : > { %2888 = vmatprep.subr.bf16.mxu0 %v4138_v1 }
 0x157   : > { %2594 = vmatpush3.bf16.msra.mxu1 %v3297_v33 }
 0x158   : > { %2889 = vmatpush3.bf16.msra.mxu0 %v3486_v25  ;;  %2595 = vmatprep.subr.bf16.mxu1 %v3306_v36 }
 0x159   : > { %2611 = vmatprep.subr.bf16.mxu0 %v3267_v23 }
 0x15b   : > { %2891 = vmatmul.mubr.msk.bf16.vlgmr.msra.gmra.mxu0 %vm444_vm0, %v3431_v32  ;;  %2596 = vmatpush3.bf16.msra.mxu1 %v3313_v38 }
 0x15c   : > { %2612 = vmatpush3.bf16.msra.mxu0 %v3280_v27  ;;  %2597 = vmatprep.subr.bf16.mxu1 %v3327_v42  ;;  %v418_v27 = vpop.permute.xlu1 %417 }
 0x15d   : > { %2613 = vmatprep.subr.bf16.mxu0 %v3293_v31  ;;  %1557 = vmatprep.mubr.bf16.mxu0 %v3754_v20  ;;  %v537_v8 = vsel %vm444_vm0, %v3410_v14, %v418_v27  ;;  %v3814_v14 = vld [vmem:[#allocation3 + $0xf8] sm:$0xff]  }
 0x15f   : > { %2598 = vmatpush3.bf16.msra.mxu1 %v3334_v44 }
 0x160   : > { %2614 = vmatpush3.bf16.msra.mxu0 %v3302_v35  ;;  %2599 = vmatprep.subr.bf16.mxu1 %v3343_v46  ;;  %v361_v13 = vpop.permute.xlu1 %360 }
 0x161   : > { %2615 = vmatprep.subr.bf16.mxu0 %v3310_v37  ;;  %v3819_v28 = vsel %vm444_vm0, %v3442_v5, %v361_v13  ;;  %v3888_v13 = vld [vmem:[#allocation3 + $0x28] sm:$0xff]  }
 0x163   : > { %2600 = vmatpush3.bf16.msra.mxu1 %v3350_v48 }
 0x164   : > { %2616 = vmatpush3.bf16.msra.mxu0 %v3320_v40  ;;  %2601 = vmatprep.subr.bf16.mxu1 %v3360_v51 }
 0x165   : > { %2617 = vmatprep.subr.bf16.mxu0 %v3331_v43 }
 0x167   : > { %2602 = vmatpush3.bf16.msra.mxu1 %v3367_v53 }
 0x168   : > { %2618 = vmatpush3.bf16.msra.mxu0 %v3339_v45  ;;  %2603 = vmatprep.subr.bf16.mxu1 %v3374_v55 }
 0x169   : > { %2619 = vmatprep.subr.bf16.mxu0 %v3347_v47 }
 0x16a   : > { %v3778_v21 = vpop.f32.mrf.mxu0 }
 0x16b   : > { %2604 = vmatpush3.bf16.msra.mxu1 %v3381_v57 }
 0x16c   : > { %2620 = vmatpush3.bf16.msra.mxu0 %v3353_v49  ;;  %2894 = vmatprep.subr.bf16.mxu1 %v4138_v1  ;;  %v3787_v23 = vpop.f32.mrf.mxu0 }
 0x16d   : > { %2621 = vmatprep.subr.bf16.mxu0 %v3364_v52 }
 0x16e   : > { %1517 = vmatmul.mubr.bf16.vlgmr.msra.gmra.mxu1 %v3636_v41  ;;  %v3793_v24 = vpop.f32.mrf.mxu0  ;;  %v501_v41 = vsel %vm444_vm0, %v3431_v32, %v392_v29  ;;  %v2382_v3 = vpop.f32.mrf.mxu1 }
 0x16f   : > { %2895 = vmatpush3.bf16.msra.mxu1 %v3446_v19  ;;  %2902 = vmatprep.mubr.msk.bf16.mxu1 %vm3147_vm1, %v4138_v1 }
 0x170   : > { %2622 = vmatpush3.bf16.msra.mxu0 %v3370_v54  ;;  %2896 = vmatprep.subr.bf16.mxu1 %v4138_v1  ;;  %v3801_v15 = vpop.f32.mrf.mxu0  ;;  %v2383_v10 = vpop.f32.mrf.mxu1 }
 0x171   : > { %2623 = vmatprep.subr.bf16.mxu0 %v3378_v56 }
 0x173   : > { %2897 = vmatpush3.bf16.msra.mxu1 %v3465_v6 }
 0x174   : > { %2624 = vmatpush3.bf16.msra.mxu0 %v3384_v58  ;;  %2898 = vmatprep.subr.bf16.mxu1 %v4138_v1 }
 0x175   : > { %2625 = vmatprep.subr.bf16.mxu0 %v3386_v59 }
 0x177   : > { %2899 = vmatpush3.bf16.msra.mxu1 %v3480_v18 }
 0x178   : > { %2626 = vmatpush3.bf16.msra.mxu0 %v3390_v60  ;;  %2900 = vmatprep.subr.bf16.mxu1 %v4138_v1 }
 0x179   : > { %2638 = vmatprep.subr.bf16.mxu0 %v3803_v16 }
 0x17b   : > { %v3808_v0 = vpop.f32.mrf.mxu0  ;;  %1558 = vmatmul.mubr.bf16.vlgmr.msra.gmra.mxu0 %v537_v8  ;;  %2901 = vmatpush3.bf16.msra.mxu1 %v3486_v25 }
 0x17c   : > { %2639 = vmatpush3.bf16.msra.mxu0 %v3811_v22  ;;  %2660 = vmatprep.subr.bf16.mxu1 %v3814_v14 }
 0x17d   : > { %v2844_v34 = vpop.f32.mrf.mxu0  ;;  %2640 = vmatprep.subr.bf16.mxu0 %v3821_v63  ;;  %1645 = vmatprep.mubr.bf16.mxu0 %v501_v41 }
 0x17e   : > { %2903 = vmatmul.mubr.msk.bf16.vlgmr.msra.gmra.mxu1 %vm444_vm0, %v3451_v12  ;;  %v3892_v34 = vld [vmem:[#allocation3 + $0x60] sm:$0xff]  }
 0x17f   : > { %v3826_v32 = vpop.f32.mrf.mxu0  ;;  %2661 = vmatpush3.bf16.msra.mxu1 %v3828_v39  ;;  %1686 = vmatprep.mubr.bf16.mxu1 %v3819_v28 }
 0x180   : > { %2641 = vmatpush3.bf16.msra.mxu0 %v3832_v50  ;;  %2662 = vmatprep.subr.bf16.mxu1 %v3293_v31  ;;  %v2385_v31 = vpop.f32.mrf.mxu1 }
 0x181   : > { %v2845_v5 = vpop.f32.mrf.mxu0  ;;  %2642 = vmatprep.subr.bf16.mxu0 %v3836_v4 }
 0x182   : > { %v3902_v5 = vld [vmem:[#allocation3 + $0x20] sm:$0xff]  }
 0x183   : > { %2663 = vmatpush3.bf16.msra.mxu1 %v3302_v35 }
 0x184   : > { %2643 = vmatpush3.bf16.msra.mxu0 %v3297_v33  ;;  %2664 = vmatprep.subr.bf16.mxu1 %v3310_v37  ;;  %v2386_v33 = vpop.f32.mrf.mxu1 }
 0x185   : > { %2644 = vmatprep.subr.bf16.mxu0 %v3306_v36 }
 0x187   : > { %2665 = vmatpush3.bf16.msra.mxu1 %v3320_v40  ;;  %v394_v40 = vpop.permute.xlu1 %393 }
 0x188   : > { %2645 = vmatpush3.bf16.msra.mxu0 %v3313_v38  ;;  %2666 = vmatprep.subr.bf16.mxu1 %v3331_v43  ;;  %v420_v38 = vpop.permute.xlu0 %419 }
 0x189   : > { %2646 = vmatprep.subr.bf16.mxu0 %v3327_v42  ;;  %v541_v43 = vsel %vm444_vm0, %v3428_v26, %v420_v38  ;;  %v3931_v38 = vld [vmem:[#allocation3 + $0x48] sm:$0xff]  }
 0x18b   : > { %2667 = vmatpush3.bf16.msra.mxu1 %v3339_v45 }
 0x18c   : > { %2647 = vmatpush3.bf16.msra.mxu0 %v3334_v44  ;;  %2668 = vmatprep.subr.bf16.mxu1 %v3347_v47  ;;  %v2384_v44 = vadd.f32 %v2383_v10, %v2382_v3  ;;  %v363_v41 = vpop.permute.xlu0 %362  ;;  %v3906_v3 = vld [vmem:[#allocation3 + $0x58] sm:$0xff]   ;;  %v3909_v10 = vld [vmem:[#allocation3 + $0xf0] sm:$0xff]  }
 0x18d   : > { %2648 = vmatprep.subr.bf16.mxu0 %v3343_v46  ;;  %v505_v46 = vsel %vm444_vm0, %v3451_v12, %v394_v40  ;;  %v3934_v40 = vld [vmem:[#allocation3 + $0xe0] sm:$0xff]  }
 0x18e   : > { %v2409_v35 = vpop.f32.mrf.mxu1 }
 0x18f   : > { %2669 = vmatpush3.bf16.msra.mxu1 %v3353_v49 }
 0x190   : > { %2649 = vmatpush3.bf16.msra.mxu0 %v3350_v48  ;;  %2670 = vmatprep.subr.bf16.mxu1 %v3364_v52  ;;  %v2410_v36 = vpop.f32.mrf.mxu1  ;;  %v2362_v48 = vadd.f32 %v3787_v23, %v3778_v21 }
 0x191   : > { %2650 = vmatprep.subr.bf16.mxu0 %v3360_v51  ;;  %v2411_v49 = vadd.f32 %v2410_v36, %v2409_v35  ;;  %v3922_v35 = vld [vmem:[#allocation3 + $0xe8] sm:$0xff]   ;;  %v3925_v36 = vld [vmem:[#allocation3 + $0x10] sm:$0xff]  }
 0x192   : > { %v2412_v37 = vpop.f32.mrf.mxu1 }
 0x193   : > { %2671 = vmatpush3.bf16.msra.mxu1 %v3370_v54  ;;  %v2387_v54 = vadd.f32 %v2386_v33, %v2385_v31  ;;  %v3916_v31 = vld [vmem:[#allocation3 + $0xb0] sm:$0xff]  }
 0x194   : > { %2651 = vmatpush3.bf16.msra.mxu0 %v3367_v53  ;;  %2672 = vmatprep.subr.bf16.mxu1 %v3378_v56  ;;  %v2413_v45 = vpop.f32.mrf.mxu1  ;;  %v3919_v33 = vld [vmem:[#allocation3 + $0x50] sm:$0xff]  }
 0x195   : > { %2652 = vmatprep.subr.bf16.mxu0 %v3374_v55  ;;  %v927_v55 = vadd.f32 %v2384_v44, %v2362_v48  ;;  %v3943_v44 = vld [vmem:[#allocation3 + $0x40] sm:$0xff]  }
 0x197   : > { %2673 = vmatpush3.bf16.msra.mxu1 %v3384_v58 }
 0x198   : > { %2653 = vmatpush3.bf16.msra.mxu0 %v3381_v57  ;;  %2674 = vmatprep.subr.bf16.mxu1 %v3386_v59  ;;  %v2365_v57 = vadd.f32 %v3801_v15, %v3793_v24  ;;  %v968_v59 = vadd.f32 %v3808_v0, %v927_v55  ;;  %v422_v55 = vpop.permute.xlu1 %421 }
 0x199   : > { %2906 = vmatprep.subr.bf16.mxu0 %v4138_v1 }
 0x19a   : > { %v930_v23 = vadd.f32 %v2387_v54, %v2365_v57  ;;  %v3981_v54 = vld [vmem:[#allocation3 + $0xc0] sm:$0xff]  }
 0x19b   : > { %v2431_v42 = vpop.f32.mrf.mxu0  ;;  %1646 = vmatmul.mubr.bf16.vlgmr.msra.gmra.mxu0 %v3695_v2  ;;  %2675 = vmatpush3.bf16.msra.mxu1 %v3390_v60  ;;  %v2414_v60 = vadd.f32 %v2413_v45, %v2412_v37  ;;  %v3928_v37 = vld [vmem:[#allocation3 + $0xa8] sm:$0xff]   ;;  %v3946_v45 = vld [vmem:[#allocation3 + $0xd8] sm:$0xff]  }
 0x19c   : > { %2907 = vmatpush3.bf16.msra.mxu0 %v3446_v19  ;;  %2687 = vmatprep.subr.bf16.mxu1 %v3803_v16  ;;  %v971_v24 = vadd.f32 %v3826_v32, %v930_v23  ;;  %v3898_v32 = vsel %vm444_vm0, %v3523_v61, %v363_v41  ;;  %v3913_v61 = vld [vmem:[#allocation3 + $0x18] sm:$0xff]  }
 0x19d   : > { %v2432_v47 = vpop.f32.mrf.mxu0  ;;  %2908 = vmatprep.subr.bf16.mxu0 %v4138_v1  ;;  %2914 = vmatprep.mubr.msk.bf16.mxu0 %vm3147_vm1, %v4138_v1 }
 0x19e   : > { %v2433_v51 = vadd.f32 %v2432_v47, %v2431_v42  ;;  %v1092_v52 = vpop.f32.mrf.mxu1  ;;  %1687 = vmatmul.mubr.bf16.vlgmr.msra.gmra.mxu1 %v541_v43  ;;  %v3937_v42 = vld [vmem:[#allocation3 + $0x8] sm:$0xff]   ;;  %v3940_v43 = vld [vmem:[#allocation3 + $0xa0] sm:$0xff]   ;;  %v3952_v47 = vld [vmem:[#allocation3 + $0x98] sm:$0xff]  }
 0x19f   : > { %v2434_v53 = vpop.f32.mrf.mxu0  ;;  %2688 = vmatpush3.bf16.msra.mxu1 %v3811_v22  ;;  %1770 = vmatprep.mubr.bf16.mxu1 %v505_v46  ;;  %v3949_v46 = vld [vmem:[#allocation3] sm:$0xff]  }
 0x1a0   : > { %v1052_v12 = vadd.f32 %v2433_v51, %v2411_v49  ;;  %2909 = vmatpush3.bf16.msra.mxu0 %v3465_v6  ;;  %v2856_v56 = vpop.f32.mrf.mxu1  ;;  %2689 = vmatprep.subr.bf16.mxu1 %v3821_v63  ;;  %v3958_v49 = vld [vmem:[#allocation3 + $0xd0] sm:$0xff]  }
 0x1a1   : > { %v2435_v58 = vpop.f32.mrf.mxu0  ;;  %2910 = vmatprep.subr.bf16.mxu0 %v4138_v1  ;;  %v3965_v51 = vld [vmem:[#allocation3 + $0x90] sm:$0xff]   ;;  %v3985_v56 = vld [vmem:[#allocation3 + $0x80] sm:$0xff]  }
 0x1a2   : > { %v1093_v26 = vadd.f32 %v1092_v52, %v1052_v12  ;;  %v2436_v2 = vadd.f32 %v2435_v58, %v2434_v53  ;;  %v1095_v21 = vpop.f32.mrf.mxu1  ;;  %v3971_v53 = vld [vmem:[#allocation3 + $0xc8] sm:$0xff]   ;;  %v396_v12 = vpop.permute.xlu0 %395 }
 0x1a3   : > { %2690 = vmatpush3.bf16.msra.mxu1 %v3832_v50 }
 0x1a4   : > { %v1099_v27 = vmax.f32 %v968_v59, %v1093_v26  ;;  %v1055_v29 = vadd.f32 %v2436_v2, %v2414_v60  ;;  %2911 = vmatpush3.bf16.msra.mxu0 %v3480_v18  ;;  %v2857_v8 = vpop.f32.mrf.mxu1  ;;  %2691 = vmatprep.subr.bf16.mxu1 %v3836_v4  ;;  %v440_v59 = vpop.permute.xlu1 %439  ;;  %v509_v60 = vsel %vm444_vm0, %v3539_v9, %v396_v12  ;;  %v4143_v12 = vld [vmem:[#allocation10_spill] sm:$0xff] }
 0x1a5   : > { %2912 = vmatprep.subr.bf16.mxu0 %v4138_v1 }
 0x1a6   : > { %1101 = vst [vmem:[#allocation2] sm:$0xff] %v1099_v27  ;;  %v1096_v15 = vadd.f32 %v1095_v21, %v1055_v29  ;;  %v424_v41 = vpop.permute.xlu0 %423 }
 0x1a7   : > { %2692 = vmatpush3.bf16.msra.mxu1 %v3888_v13 }
 0x1a8   : > { %v1100_v0 = vmax.f32 %v971_v24, %v1096_v15  ;;  %2913 = vmatpush3.bf16.msra.mxu0 %v3486_v25  ;;  %2693 = vmatprep.subr.bf16.mxu1 %v3892_v34 }
 0x1a9   : > { %2709 = vmatprep.subr.bf16.mxu0 %v3814_v14 }
 0x1aa   : > { %1102 = vst [vmem:[#allocation2 + $0x8] sm:$0x3] %v1100_v0  ;;  %v398_v0 = vpop.permute.xlu1 %397 }
 0x1ab   : > { %2915 = vmatmul.mubr.msk.bf16.vlgmr.msra.gmra.mxu0 %vm444_vm0, %v3539_v9  ;;  %2694 = vmatpush3.bf16.msra.mxu1 %v3902_v5 }
 0x1ac   : > { %2710 = vmatpush3.bf16.msra.mxu0 %v3828_v39  ;;  %2695 = vmatprep.subr.bf16.mxu1 %v3906_v3 }
 0x1ad   : > { %2711 = vmatprep.subr.bf16.mxu0 %v3909_v10  ;;  %1811 = vmatprep.mubr.bf16.mxu0 %v3898_v32 }
 0x1af   : > { %2696 = vmatpush3.bf16.msra.mxu1 %v3913_v61 }
 0x1b0   : > { %2712 = vmatpush3.bf16.msra.mxu0 %v3916_v31  ;;  %2697 = vmatprep.subr.bf16.mxu1 %v3919_v33 }
 0x1b1   : > { %2713 = vmatprep.subr.bf16.mxu0 %v3922_v35 }
 0x1b3   : > { %2698 = vmatpush3.bf16.msra.mxu1 %v3925_v36 }
 0x1b4   : > { %2714 = vmatpush3.bf16.msra.mxu0 %v3928_v37  ;;  %2699 = vmatprep.subr.bf16.mxu1 %v3931_v38 }
 0x1b5   : > { %2715 = vmatprep.subr.bf16.mxu0 %v3934_v40 }
 0x1b7   : > { %2700 = vmatpush3.bf16.msra.mxu1 %v3937_v42 }
 0x1b8   : > { %2716 = vmatpush3.bf16.msra.mxu0 %v3940_v43  ;;  %2701 = vmatprep.subr.bf16.mxu1 %v3943_v44 }
 0x1b9   : > { %2717 = vmatprep.subr.bf16.mxu0 %v3946_v45 }
 0x1bb   : > { %2702 = vmatpush3.bf16.msra.mxu1 %v3949_v46  ;;  %v3956_v48 = vpop.f32.mrf.mxu0 }
 0x1bc   : > { %2718 = vmatpush3.bf16.msra.mxu0 %v3952_v47  ;;  %2918 = vmatprep.subr.bf16.mxu1 %v4138_v1 }
 0x1bd   : > { %2719 = vmatprep.subr.bf16.mxu0 %v3958_v49  ;;  %v3969_v52 = vpop.f32.mrf.mxu0 }
 0x1be   : > { %1771 = vmatmul.mubr.bf16.vlgmr.msra.gmra.mxu1 %v3754_v20  ;;  %v3975_v20 = vld [vmem:[#allocation3 + $0x88] sm:$0xff]   ;;  %v2480_v21 = vpop.f32.mrf.mxu1 }
 0x1bf   : > { %2919 = vmatpush3.bf16.msra.mxu1 %v3446_v19  ;;  %2926 = vmatprep.mubr.msk.bf16.mxu1 %vm3147_vm1, %v4138_v1  ;;  %v3979_v19 = vpop.f32.mrf.mxu0 }
 0x1c0   : > { %2720 = vmatpush3.bf16.msra.mxu0 %v3965_v51  ;;  %2920 = vmatprep.subr.bf16.mxu1 %v4138_v1  ;;  %v2481_v23 = vpop.f32.mrf.mxu1 }
 0x1c1   : > { %2721 = vmatprep.subr.bf16.mxu0 %v3971_v53  ;;  %v3991_v58 = vpop.f32.mrf.mxu0 }
 0x1c2   : > { %v2483_v27 = vpop.f32.mrf.mxu1  ;;  %v2463_v7 = vadd.f32 %v3991_v58, %v3979_v19 }
 0x1c3   : > { %2921 = vmatpush3.bf16.msra.mxu1 %v3465_v6  ;;  %v4142_v6 = vld [vmem:[#allocation9_spill] sm:$0xff] }
 0x1c4   : > { %2722 = vmatpush3.bf16.msra.mxu0 %v3975_v20  ;;  %2922 = vmatprep.subr.bf16.mxu1 %v4138_v1  ;;  %v545_v57 = vsel %vm444_vm0, %v4142_v6, %v422_v55  ;;  %v2484_v29 = vpop.f32.mrf.mxu1  ;;  %v549_v6 = vsel %vm444_vm0, %v4143_v12, %v424_v41 }
 0x1c5   : > { %2723 = vmatprep.subr.bf16.mxu0 %v3981_v54 }
 0x1c7   : > { %2923 = vmatpush3.bf16.msra.mxu1 %v3480_v18  ;;  %v556_v18 = vsel %vm444_vm0, %v3588_v17, %v440_v59 }
 0x1c8   : > { %2724 = vmatpush3.bf16.msra.mxu0 %v3985_v56  ;;  %2924 = vmatprep.subr.bf16.mxu1 %v4138_v1 }
 0x1c9   : > { %2736 = vmatprep.subr.bf16.mxu0 %v3803_v16 }
 0x1cb   : > { %v3996_v26 = vpop.f32.mrf.mxu0  ;;  %1812 = vmatmul.mubr.bf16.vlgmr.msra.gmra.mxu0 %v545_v57  ;;  %2925 = vmatpush3.bf16.msra.mxu1 %v3486_v25  ;;  %v2482_v57 = vadd.f32 %v2481_v23, %v2480_v21 }
 0x1cc   : > { %2737 = vmatpush3.bf16.msra.mxu0 %v3811_v22  ;;  %2758 = vmatprep.subr.bf16.mxu1 %v3814_v14 }
 0x1cd   : > { %v2868_v2 = vpop.f32.mrf.mxu0  ;;  %2738 = vmatprep.subr.bf16.mxu0 %v3821_v63  ;;  %1900 = vmatprep.mubr.bf16.mxu0 %v509_v60  ;;  %v4040_v60 = vld [vmem:[#allocation3 + $0x118] sm:$0xff]  }
 0x1ce   : > { %2927 = vmatmul.mubr.msk.bf16.vlgmr.msra.gmra.mxu1 %vm444_vm0, %v3602_v11 }
 0x1cf   : > { %v4006_v9 = vpop.f32.mrf.mxu0  ;;  %2759 = vmatpush3.bf16.msra.mxu1 %v3828_v39  ;;  %1941 = vmatprep.mubr.bf16.mxu1 %v556_v18  ;;  %v513_v18 = vsel %vm444_vm0, %v3602_v11, %v398_v0  ;;  %v3070_v0 = vld [vmem:[#allocation3 + $0x110] sm:$0xff]  }
 0x1d0   : > { %2739 = vmatpush3.bf16.msra.mxu0 %v3832_v50  ;;  %2760 = vmatprep.subr.bf16.mxu1 %v3909_v10 }
 0x1d1   : > { %v2869_v25 = vpop.f32.mrf.mxu0  ;;  %2740 = vmatprep.subr.bf16.mxu0 %v3836_v4 }
 0x1d3   : > { %2761 = vmatpush3.bf16.msra.mxu1 %v3916_v31 }
 0x1d4   : > { %2741 = vmatpush3.bf16.msra.mxu0 %v3888_v13  ;;  %2762 = vmatprep.subr.bf16.mxu1 %v3922_v35 }
 0x1d5   : > { %2742 = vmatprep.subr.bf16.mxu0 %v3892_v34 }
 0x1d7   : > { %2763 = vmatpush3.bf16.msra.mxu1 %v3928_v37 }
 0x1d8   : > { %2743 = vmatpush3.bf16.msra.mxu0 %v3902_v5  ;;  %2764 = vmatprep.subr.bf16.mxu1 %v3934_v40 }
 0x1d9   : > { %2744 = vmatprep.subr.bf16.mxu0 %v3906_v3 }
 0x1db   : > { %2765 = vmatpush3.bf16.msra.mxu1 %v3940_v43 }
 0x1dc   : > { %2745 = vmatpush3.bf16.msra.mxu0 %v3913_v61  ;;  %2766 = vmatprep.subr.bf16.mxu1 %v3946_v45 }
 0x1dd   : > { %2746 = vmatprep.subr.bf16.mxu0 %v3919_v33 }
 0x1de   : > { %v2507_v8 = vpop.f32.mrf.mxu1 }
 0x1df   : > { %2767 = vmatpush3.bf16.msra.mxu1 %v3952_v47 }
 0x1e0   : > { %2747 = vmatpush3.bf16.msra.mxu0 %v3925_v36  ;;  %2768 = vmatprep.subr.bf16.mxu1 %v3958_v49  ;;  %v2508_v24 = vpop.f32.mrf.mxu1 }
 0x1e1   : > { %2748 = vmatprep.subr.bf16.mxu0 %v3931_v38  ;;  %v2509_v25 = vadd.f32 %v2508_v24, %v2507_v8 }
 0x1e2   : > { %v2510_v15 = vpop.f32.mrf.mxu1 }
 0x1e3   : > { %2769 = vmatpush3.bf16.msra.mxu1 %v3965_v51 }
 0x1e4   : > { %2749 = vmatpush3.bf16.msra.mxu0 %v3937_v42  ;;  %2770 = vmatprep.subr.bf16.mxu1 %v3971_v53  ;;  %v2511_v59 = vpop.f32.mrf.mxu1 }
 0x1e5   : > { %2750 = vmatprep.subr.bf16.mxu0 %v3943_v44  ;;  %v2512_v8 = vadd.f32 %v2511_v59, %v2510_v15 }
 0x1e7   : > { %2771 = vmatpush3.bf16.msra.mxu1 %v3975_v20 }
 0x1e8   : > { %2751 = vmatpush3.bf16.msra.mxu0 %v3949_v46  ;;  %2772 = vmatprep.subr.bf16.mxu1 %v3981_v54 }
 0x1e9   : > { %2930 = vmatprep.subr.bf16.mxu0 %v4138_v1 }
 0x1eb   : > { %v2529_v55 = vpop.f32.mrf.mxu0  ;;  %1901 = vmatmul.mubr.bf16.vlgmr.msra.gmra.mxu0 %v3819_v28  ;;  %2773 = vmatpush3.bf16.msra.mxu1 %v3985_v56  ;;  %v2460_v28 = vadd.f32 %v3969_v52, %v3956_v48 }
 0x1ec   : > { %2931 = vmatpush3.bf16.msra.mxu0 %v4040_v60  ;;  %2785 = vmatprep.subr.bf16.mxu1 %v3803_v16  ;;  %v2485_v16 = vadd.f32 %v2484_v29, %v2483_v27 }
 0x1ed   : > { %v2530_v2 = vpop.f32.mrf.mxu0  ;;  %2932 = vmatprep.subr.bf16.mxu0 %v4138_v1  ;;  %2938 = vmatprep.mubr.msk.bf16.mxu0 %vm3147_vm1, %v4138_v1  ;;  %v1181_v12 = vadd.f32 %v2482_v57, %v2460_v28  ;;  %v3072_v57 = vld [vmem:[#allocation3 + $0x100] sm:$0xff]  }
 0x1ee   : > { %v2531_v21 = vadd.f32 %v2530_v2, %v2529_v55  ;;  %v1346_v23 = vpop.f32.mrf.mxu1  ;;  %1942 = vmatmul.mubr.bf16.vlgmr.msra.gmra.mxu1 %v549_v6  ;;  %v1184_v27 = vadd.f32 %v2485_v16, %v2463_v7 }
 0x1ef   : > { %v2532_v41 = vpop.f32.mrf.mxu0  ;;  %2786 = vmatpush3.bf16.msra.mxu1 %v3811_v22  ;;  %2026 = vmatprep.mubr.bf16.mxu1 %v513_v18  ;;  %v1222_v52 = vadd.f32 %v3996_v26, %v1181_v12  ;;  %v442_v26 = vpop.permute.xlu0 %441 }
 0x1f0   : > { %v1306_v11 = vadd.f32 %v2531_v21, %v2509_v25  ;;  %2933 = vmatpush3.bf16.msra.mxu0 %v3070_v0  ;;  %v2880_v30 = vpop.f32.mrf.mxu1  ;;  %2787 = vmatprep.subr.bf16.mxu1 %v3821_v63  ;;  %v1225_v19 = vadd.f32 %v4006_v9, %v1184_v27  ;;  %v559_v7 = vsel %vm444_vm0, %v3663_v62, %v442_v26 }
 0x1f1   : > { %v2533_v48 = vpop.f32.mrf.mxu0  ;;  %2934 = vmatprep.subr.bf16.mxu0 %v4138_v1  ;;  %v3071_v30 = vld [vmem:[#allocation3 + $0x108] sm:$0xff]  }
 0x1f2   : > { %v1347_v24 = vadd.f32 %v1346_v23, %v1306_v11  ;;  %v2534_v22 = vadd.f32 %v2533_v48, %v2532_v41  ;;  %v1349_v55 = vpop.f32.mrf.mxu1 }
 0x1f3   : > { %2788 = vmatpush3.bf16.msra.mxu1 %v3832_v50  ;;  %v4144_v50 = vrot.slane %v3588_v17, 1 }
 0x1f4   : > { %v1353_v29 = vmax.f32 %v1222_v52, %v1347_v24  ;;  %v1309_v6 = vadd.f32 %v2534_v22, %v2512_v8  ;;  %2935 = vmatpush3.bf16.msra.mxu0 %v3071_v30  ;;  %v2881_v63 = vpop.f32.mrf.mxu1  ;;  %2789 = vmatprep.subr.bf16.mxu1 %v3836_v4  ;;  %v426_v4 = vpop.permute.xlu1 %425 }
 0x1f5   : > { %2936 = vmatprep.subr.bf16.mxu0 %v4138_v1 }
 0x1f6   : > { %1355 = vst [vmem:[#allocation2 + $0xa] sm:$0xff] %v1353_v29  ;;  %v1350_v58 = vadd.f32 %v1349_v55, %v1309_v6 }
 0x1f7   : > { %2790 = vmatpush3.bf16.msra.mxu1 %v3888_v13  ;;  %v4145_v13 = vld [vmem:[#allocation11_spill] sm:$0xff] }
 0x1f8   : > { %v1354_v15 = vmax.f32 %v1225_v19, %v1350_v58  ;;  %2937 = vmatpush3.bf16.msra.mxu0 %v3072_v57  ;;  %2791 = vmatprep.subr.bf16.mxu1 %v3892_v34  ;;  %v553_v34 = vsel %vm444_vm0, %v4145_v13, %v426_v4 }
 0x1f9   : > { %2807 = vmatprep.subr.bf16.mxu0 %v3814_v14 }
 0x1fa   : > { %1356 = vst [vmem:[#allocation2 + $0x12] sm:$0x3] %v1354_v15 }
 0x1fb   : > { %2939 = vmatmul.mubr.msk.bf16.vlgmr.msra.gmra.mxu0 %vm444_vm0, %v4144_v50  ;;  %2792 = vmatpush3.bf16.msra.mxu1 %v3902_v5  ;;  %v443_v5 = vrot.slane %v3663_v62, 1 }
 0x1fc   : > { %2808 = vmatpush3.bf16.msra.mxu0 %v3828_v39  ;;  %2793 = vmatprep.subr.bf16.mxu1 %v3906_v3 }
 0x1fd   : > { %2809 = vmatprep.subr.bf16.mxu0 %v3909_v10  ;;  %2067 = vmatprep.mubr.bf16.mxu0 %v559_v7 }
 0x1ff   : > { %2794 = vmatpush3.bf16.msra.mxu1 %v3913_v61 }
 0x200   : > { %2810 = vmatpush3.bf16.msra.mxu0 %v3916_v31  ;;  %2795 = vmatprep.subr.bf16.mxu1 %v3919_v33 }
 0x201   : > { %2811 = vmatprep.subr.bf16.mxu0 %v3922_v35 }
 0x203   : > { %2796 = vmatpush3.bf16.msra.mxu1 %v3925_v36 }
 0x204   : > { %2812 = vmatpush3.bf16.msra.mxu0 %v3928_v37  ;;  %2797 = vmatprep.subr.bf16.mxu1 %v3931_v38 }
 0x205   : > { %2813 = vmatprep.subr.bf16.mxu0 %v3934_v40 }
 0x207   : > { %2798 = vmatpush3.bf16.msra.mxu1 %v3937_v42 }
 0x208   : > { %2814 = vmatpush3.bf16.msra.mxu0 %v3940_v43  ;;  %2799 = vmatprep.subr.bf16.mxu1 %v3943_v44 }
 0x209   : > { %2815 = vmatprep.subr.bf16.mxu0 %v3946_v45 }
 0x20b   : > { %2800 = vmatpush3.bf16.msra.mxu1 %v3949_v46  ;;  %v2556_v17 = vpop.f32.mrf.mxu0 }
 0x20c   : > { %2816 = vmatpush3.bf16.msra.mxu0 %v3952_v47  ;;  %2942 = vmatprep.subr.bf16.mxu1 %v4138_v1 }
 0x20d   : > { %2817 = vmatprep.subr.bf16.mxu0 %v3958_v49  ;;  %v2557_v14 = vpop.f32.mrf.mxu0 }
 0x20e   : > { %2027 = vmatmul.mubr.bf16.vlgmr.msra.gmra.mxu1 %v3898_v32  ;;  %v2578_v33 = vpop.f32.mrf.mxu1  ;;  %v2558_v62 = vadd.f32 %v2557_v14, %v2556_v17 }
 0x20f   : > { %2943 = vmatpush3.bf16.msra.mxu1 %v4040_v60  ;;  %2950 = vmatprep.mubr.msk.bf16.mxu1 %vm3147_vm1, %v4138_v1  ;;  %v2559_v39 = vpop.f32.mrf.mxu0 }
 0x210   : > { %2818 = vmatpush3.bf16.msra.mxu0 %v3965_v51  ;;  %2944 = vmatprep.subr.bf16.mxu1 %v4138_v1  ;;  %v2579_v35 = vpop.f32.mrf.mxu1 }
 0x211   : > { %2819 = vmatprep.subr.bf16.mxu0 %v3971_v53  ;;  %v2560_v32 = vpop.f32.mrf.mxu0 }
 0x212   : > { %v2581_v36 = vpop.f32.mrf.mxu1  ;;  %v2561_v9 = vadd.f32 %v2560_v32, %v2559_v39 }
 0x213   : > { %2945 = vmatpush3.bf16.msra.mxu1 %v3070_v0 }
 0x214   : > { %2820 = vmatpush3.bf16.msra.mxu0 %v3975_v20  ;;  %2946 = vmatprep.subr.bf16.mxu1 %v4138_v1  ;;  %v2582_v37 = vpop.f32.mrf.mxu1 }
 0x215   : > { %2821 = vmatprep.subr.bf16.mxu0 %v3981_v54  ;;  %v2583_v53 = vadd.f32 %v2582_v37, %v2581_v36 }
 0x217   : > { %2947 = vmatpush3.bf16.msra.mxu1 %v3071_v30  ;;  %v1438_v21 = vadd.f32 %v2583_v53, %v2561_v9 }
 0x218   : > { %2822 = vmatpush3.bf16.msra.mxu0 %v3985_v56  ;;  %2948 = vmatprep.subr.bf16.mxu1 %v4138_v1  ;;  %v2580_v1 = vadd.f32 %v2579_v35, %v2578_v33 }
 0x21a   : > { %v1435_v20 = vadd.f32 %v2580_v1, %v2558_v62  ;;  %v2121_v62 = vld [vmem:[#allocation2] ss:$2 sm:$0xff] }
 0x21b   : > { %v1475_v3 = vpop.f32.mrf.mxu0  ;;  %2068 = vmatmul.mubr.bf16.vlgmr.msra.gmra.mxu0 %v553_v34  ;;  %2949 = vmatpush3.bf16.msra.mxu1 %v3072_v57 }
 0x21c   : > { %v1476_v60 = vadd.f32 %v1475_v3, %v1435_v20 }
 0x21d   : > { %v2892_v10 = vpop.f32.mrf.mxu0 }
 0x21e   : > { %2951 = vmatmul.mubr.msk.bf16.vlgmr.msra.gmra.mxu1 %vm444_vm0, %v443_v5 }
 0x21f   : > { %v1478_v61 = vpop.f32.mrf.mxu0 }
 0x220   : > { %v1479_v12 = vadd.f32 %v1478_v61, %v1438_v21 }
 0x221   : > { %v2893_v31 = vpop.f32.mrf.mxu0 }
 0x22e   : > { %v2605_v38 = vpop.f32.mrf.mxu1 }
 0x230   : > { %v2606_v40 = vpop.f32.mrf.mxu1 }
 0x231   : > { %v2607_v46 = vadd.f32 %v2606_v40, %v2605_v38 }
 0x232   : > { %v2608_v42 = vpop.f32.mrf.mxu1 }
 0x234   : > { %v2609_v44 = vpop.f32.mrf.mxu1 }
 0x235   : > { %v2610_v18 = vadd.f32 %v2609_v44, %v2608_v42 }
 0x23b   : > { %v2627_v43 = vpop.f32.mrf.mxu0 }
 0x23d   : > { %v2628_v45 = vpop.f32.mrf.mxu0 }
 0x23e   : > { %v2629_v47 = vadd.f32 %v2628_v45, %v2627_v43  ;;  %v1600_v49 = vpop.f32.mrf.mxu1 }
 0x23f   : > { %v2630_v51 = vpop.f32.mrf.mxu0 }
 0x240   : > { %v1560_v54 = vadd.f32 %v2629_v47, %v2607_v46  ;;  %v2904_v56 = vpop.f32.mrf.mxu1  ;;  %v2129_v46 = vld [vmem:[#allocation2 + $0x1] ss:$2 sm:$0xff] }
 0x241   : > { %v2631_v59 = vpop.f32.mrf.mxu0 }
 0x242   : > { %v1601_v2 = vadd.f32 %v1600_v49, %v1560_v54  ;;  %v2632_v28 = vadd.f32 %v2631_v59, %v2630_v51  ;;  %v1603_v25 = vpop.f32.mrf.mxu1  ;;  %v2136_v49 = vmax.f32 %v2121_v62, %v2129_v46  ;;  %v4105_v51 = vld [vmem:[#allocation5] ss:$0 sm:$0xff] }
 0x244   : > { %v1607_v23 = vmax.f32 %v1476_v60, %v1601_v2  ;;  %v1563_v41 = vadd.f32 %v2632_v28, %v2610_v18  ;;  %v2905_v16 = vpop.f32.mrf.mxu1  ;;  %v2147_v54 = vadd.f32 %v4105_v51, %v2136_v49 }
 0x246   : > { %1609 = vst [vmem:[#allocation2 + $0x14] sm:$0xff] %v1607_v23  ;;  %v1604_v11 = vadd.f32 %v1603_v25, %v1563_v41  ;;  %v2151_v59 = vmax.f32 %v2147_v54, 0.0 }
 0x248   : > { %v1608_v0 = vmax.f32 %v1479_v12, %v1604_v11 }
 0x24a   : > { %1610 = vst [vmem:[#allocation2 + $0x1c] sm:$0x3] %v1608_v0 }
 0x25b   : > { %v2654_v48 = vpop.f32.mrf.mxu0 }
 0x25d   : > { %v2655_v52 = vpop.f32.mrf.mxu0 }
 0x25e   : > { %v2676_v6 = vpop.f32.mrf.mxu1  ;;  %v2656_v14 = vadd.f32 %v2655_v52, %v2654_v48 }
 0x25f   : > { %v2657_v8 = vpop.f32.mrf.mxu0 }
 0x260   : > { %v2677_v30 = vpop.f32.mrf.mxu1 }
 0x261   : > { %v2658_v24 = vpop.f32.mrf.mxu0  ;;  %v2678_v7 = vadd.f32 %v2677_v30, %v2676_v6 }
 0x262   : > { %v2679_v63 = vpop.f32.mrf.mxu1  ;;  %v2659_v61 = vadd.f32 %v2658_v24, %v2657_v8 }
 0x263   : > { %v1689_v5 = vadd.f32 %v2678_v7, %v2656_v14 }
 0x264   : > { %v2680_v19 = vpop.f32.mrf.mxu1 }
 0x265   : > { %v2681_v32 = vadd.f32 %v2680_v19, %v2679_v63 }
 0x267   : > { %v1692_v40 = vadd.f32 %v2681_v32, %v2659_v61 }
 0x26b   : > { %v1729_v22 = vpop.f32.mrf.mxu0 }
 0x26c   : > { %v1730_v33 = vadd.f32 %v1729_v22, %v1689_v5 }
 0x26d   : > { %v2916_v55 = vpop.f32.mrf.mxu0 }
 0x26f   : > { %v1732_v27 = vpop.f32.mrf.mxu0 }
 0x270   : > { %v1733_v44 = vadd.f32 %v1732_v27, %v1692_v40 }
 0x271   : > { %v2917_v29 = vpop.f32.mrf.mxu0 }
 0x27e   : > { %v2703_v58 = vpop.f32.mrf.mxu1 }
 0x280   : > { %v2704_v26 = vpop.f32.mrf.mxu1 }
 0x281   : > { %v2705_v39 = vadd.f32 %v2704_v26, %v2703_v58 }
 0x282   : > { %v2706_v15 = vpop.f32.mrf.mxu1 }
 0x284   : > { %v2707_v50 = vpop.f32.mrf.mxu1 }
 0x285   : > { %v2708_v35 = vadd.f32 %v2707_v50, %v2706_v15 }
 0x28b   : > { %v2725_v57 = vpop.f32.mrf.mxu0 }
 0x28d   : > { %v2726_v17 = vpop.f32.mrf.mxu0 }
 0x28e   : > { %v2727_v4 = vadd.f32 %v2726_v17, %v2725_v57  ;;  %v1854_v13 = vpop.f32.mrf.mxu1 }
 0x28f   : > { %v2728_v34 = vpop.f32.mrf.mxu0 }
 0x290   : > { %v1814_v3 = vadd.f32 %v2727_v4, %v2705_v39  ;;  %v2928_v10 = vpop.f32.mrf.mxu1 }
 0x291   : > { %v2729_v31 = vpop.f32.mrf.mxu0 }
 0x292   : > { %v1855_v36 = vadd.f32 %v1854_v13, %v1814_v3  ;;  %v2730_v37 = vadd.f32 %v2729_v31, %v2728_v34  ;;  %v1857_v38 = vpop.f32.mrf.mxu1 }
 0x294   : > { %v1861_v42 = vmax.f32 %v1730_v33, %v1855_v36  ;;  %v1817_v43 = vadd.f32 %v2730_v37, %v2708_v35  ;;  %v2929_v1 = vpop.f32.mrf.mxu1 }
 0x296   : > { %1863 = vst [vmem:[#allocation2 + $0x1e] sm:$0xff] %v1861_v42  ;;  %v1858_v45 = vadd.f32 %v1857_v38, %v1817_v43 }
 0x298   : > { %v1862_v47 = vmax.f32 %v1733_v44, %v1858_v45 }
 0x29a   : > { %1864 = vst [vmem:[#allocation2 + $0x26] sm:$0x3] %v1862_v47  ;;  %v2177_v47 = vld [vmem:[%s4113_s10 + $0xc] sm:$0x1] }
 0x29d   : > { %v2123_v53 = vld [vmem:[#allocation2 + $0x10] ss:$2 sm:$0xff]  ;;  %v2131_v20 = vld [vmem:[#allocation2 + $0x11] ss:$2 sm:$0xff] }
 0x29e   : > { %v2137_v56 = vmax.f32 %v2123_v53, %v2131_v20 }
 0x2a0   : > { %v2148_v9 = vadd.f32 %v4105_v51, %v2137_v56 }
 0x2a2   : > { %v2152_v60 = vmax.f32 %v2148_v9, 0.0 }
 0x2a4   : > { %v2342_v18 = vpack.c.bf16 %v2152_v60, %v2151_v59 }
 0x2a6   : > { %2343 = vst [vmem:[%s4113_s10] sm:$0xff] %v2342_v18  }
 0x2ab   : > { %v2752_v2 = vpop.f32.mrf.mxu0 }
 0x2ad   : > { %v2753_v28 = vpop.f32.mrf.mxu0 }
 0x2ae   : > { %v2774_v11 = vpop.f32.mrf.mxu1  ;;  %v2754_v30 = vadd.f32 %v2753_v28, %v2752_v2 }
 0x2af   : > { %v2755_v25 = vpop.f32.mrf.mxu0 }
 0x2b0   : > { %v2775_v0 = vpop.f32.mrf.mxu1 }
 0x2b1   : > { %v2756_v21 = vpop.f32.mrf.mxu0  ;;  %v2776_v27 = vadd.f32 %v2775_v0, %v2774_v11 }
 0x2b2   : > { %v2777_v48 = vpop.f32.mrf.mxu1  ;;  %v2757_v17 = vadd.f32 %v2756_v21, %v2755_v25 }
 0x2b3   : > { %v1944_v57 = vadd.f32 %v2776_v27, %v2754_v30 }
 0x2b4   : > { %v2778_v52 = vpop.f32.mrf.mxu1 }
 0x2b5   : > { %v2779_v15 = vadd.f32 %v2778_v52, %v2777_v48 }
 0x2b7   : > { %v1947_v5 = vadd.f32 %v2779_v15, %v2757_v17 }
 0x2bb   : > { %v1984_v23 = vpop.f32.mrf.mxu0 }
 0x2bc   : > { %v1985_v39 = vadd.f32 %v1984_v23, %v1944_v57 }
 0x2bd   : > { %v2940_v41 = vpop.f32.mrf.mxu0 }
 0x2bf   : > { %v1987_v16 = vpop.f32.mrf.mxu0 }
 0x2c0   : > { %v1988_v31 = vadd.f32 %v1987_v16, %v1947_v5 }
 0x2c1   : > { %v2941_v12 = vpop.f32.mrf.mxu0 }
 0x2ce   : > { %v2801_v8 = vpop.f32.mrf.mxu1 }
 0x2d0   : > { %v2802_v24 = vpop.f32.mrf.mxu1 }
 0x2d1   : > { %v2803_v63 = vadd.f32 %v2802_v24, %v2801_v8 }
 0x2d2   : > { %v2804_v22 = vpop.f32.mrf.mxu1 }
 0x2d4   : > { %v2805_v29 = vpop.f32.mrf.mxu1 }
 0x2d5   : > { %v2806_v4 = vadd.f32 %v2805_v29, %v2804_v22 }
 0x2db   : > { %v2823_v55 = vpop.f32.mrf.mxu0 }
 0x2dd   : > { %v2824_v6 = vpop.f32.mrf.mxu0 }
 0x2de   : > { %v2825_v19 = vadd.f32 %v2824_v6, %v2823_v55  ;;  %v2110_v58 = vpop.f32.mrf.mxu1 }
 0x2df   : > { %v2826_v26 = vpop.f32.mrf.mxu0 }
 0x2e0   : > { %v2070_v7 = vadd.f32 %v2825_v19, %v2803_v63  ;;  %v2952_v50 = vpop.f32.mrf.mxu1 }
 0x2e1   : > { %v2827_v14 = vpop.f32.mrf.mxu0 }
 0x2e2   : > { %v2111_v13 = vadd.f32 %v2110_v58, %v2070_v7  ;;  %v2828_v34 = vadd.f32 %v2827_v14, %v2826_v26  ;;  %v2113_v32 = vpop.f32.mrf.mxu1 }
 0x2e4   : > { %v2117_v3 = vmax.f32 %v1985_v39, %v2111_v13  ;;  %v2073_v10 = vadd.f32 %v2828_v34, %v2806_v4  ;;  %v2953_v61 = vpop.f32.mrf.mxu1 }
 0x2e6   : > { %2119 = vst [vmem:[#allocation2 + $0x28] sm:$0xff] %v2117_v3  ;;  %v2114_v33 = vadd.f32 %v2113_v32, %v2073_v10 }
 0x2e8   : > { %v2118_v35 = vmax.f32 %v1988_v31, %v2114_v33 }
 0x2ea   : > { %2120 = vst [vmem:[#allocation2 + $0x30] sm:$0x3] %v2118_v35 }
 0x2ed   : > { %v2125_v36 = vld [vmem:[#allocation2 + $0x20] ss:$2 sm:$0xff]  ;;  %v2133_v37 = vld [vmem:[#allocation2 + $0x21] ss:$2 sm:$0xff] }
 0x2ee   : > { %v2138_v38 = vmax.f32 %v2125_v36, %v2133_v37 }
 0x2f0   : > { %v2149_v40 = vadd.f32 %v4105_v51, %v2138_v38 }
 0x2f1   : > { %v2127_v42 = vld [vmem:[#allocation2 + $0x30] ss:$2 sm:$0x1]  ;;  %v2135_v43 = vld [vmem:[#allocation2 + $0x31] ss:$2 sm:$0x1] }
 0x2f2   : > { %v2153_v1 = vmax.f32 %v2149_v40, 0.0  ;;  %v2139_v44 = vmax.f32 %v2127_v42, %v2135_v43 }
 0x2f4   : > { %v2337_v45 = vpack.c.bf16 %v2153_v1, %v2153_v1  ;;  %v2150_v62 = vadd.f32 %v4105_v51, %v2139_v44 }
 0x2f6   : > { %2173 = vst [vmem:[%s4113_s10 + $0x8] sm:$0xf] %v2337_v45  ;;  %v2154_v46 = vmax.f32 %v2150_v62, 0.0 }
 0x2f8   : > { %v2338_v49 = vpack.c.bf16 %v2154_v46, %v2154_v46 }
 0x2fa   : > { %v2178_v53 = vsel %vm2176_vm4, %v2338_v49, %v2177_v47 }
 0x2fb   : > { %2179 = vst [vmem:[%s4113_s10 + $0xc] sm:$0x1] %v2178_v53 }
 0x2fc PF: > { %s15_s12 = sadd.s32 1, %s3139_s12  }
 0x2fd   : > { %p12_p2 = scmp.ge.s32.totalorder %s15_s12, 4  }
 0x2ff   :  { %14 = sbr.rel (!%p12_p2) target bundleno = 2 (0x2), region = 78 }
 0x304   :  { %2201 = vsyncpa [#allocation4], 1 }
 0x305   :  { %2203 = vsyncpa [#allocation4 + $0x1], 1 }
 0x306   :  { %2204 = vsyncpa [#allocation6], 1 }

// kernel: snn_forward.5
= control target key start
LH: loop header
LB: loop body
LE: loop exit
PB: predicated region body
PF: predicated region fallthrough
CT: control target
= control target key end

     0   :  { %10 = vsyncpa [#allocation3], 0  ;;  %s4728_s0 = inlined_call_operand.vmem [shape: bf16[2,3200], index: 0, kind: input, shape index: {}]   ;;  %s4729_s1 = inlined_call_operand.hbm [shape: bf16[3200,256], index: 1, kind: input, shape index: {}]   ;;  %s4730_s2 = inlined_call_operand.hbm [shape: f32[1,256], index: 2, kind: input, shape index: {}]   ;;  %s4731_s3 = inlined_call_operand.hbm [shape: bf16[256,128], index: 3, kind: input, shape index: {}]   ;;  %s4732_s4 = inlined_call_operand.hbm [shape: f32[1,128], index: 4, kind: input, shape index: {}]   ;;  %s4733_s5 = inlined_call_operand.hbm [shape: f32[2,128], index: 5, kind: output, shape index: {}]  }
   0x1   :  { %11 = vsyncpa [#allocation6], 0 }
   0x2   :  { %12 = vsyncpa [#allocation9], 0 }
   0x3   :  { %13 = vsyncpa [#allocation4], 0  ;;  %s4587_s18 = smov [#allocation5]   ;;  %s4588_s20 = smov [#allocation2]  }
   0x4   :  { %s34_s19 = sshll.u32 %s4587_s18, 4  ;;  %s21_s21 = sshll.u32 %s4588_s20, 4  ;;  %s35_s19 = int_to_ptr.vmem [resolvable:$true] %s34_s19  ;;  %s22_s21 = int_to_ptr.vmem [resolvable:$true] %s21_s21 }
   0x5   :  { %s4487_s22 = scalar_lea.vmem %s35_s19, 32  ;;  %p4492_p1 = scmp.lt.s32.totalorder %s35_s19, %s35_s19 }
   0x6   :  { %p4488_p0 = scmp.ne.s32.totalorder %s35_s19, %s4487_s22  ;;  %p4493_p2 = scmp.lt.s32.totalorder %s4487_s22, %s4487_s22 }
   0x8   :  { %p4494_p3 = por %p4493_p2, %p4492_p1 }
   0xa   :  { %p4495_p4 = pnand %p4494_p3, %p4488_p0 }
   0xc   :  { %4498 = shalt.err (!%p4495_p4)
}
   0xd   :  { %37 = dma.hbm_to_vmem [thread:$0]  %s4730_s2, 32, %s35_s19, [#allocation6]  }
   0xe   :  { %s4507_s25 = scalar_lea.vmem %s22_s21, 51200  ;;  %p4512_p6 = scmp.lt.s32.totalorder %s22_s21, %s22_s21 }
   0xf   :  { %p4508_p5 = scmp.ne.s32.totalorder %s22_s21, %s4507_s25  ;;  %p4513_p7 = scmp.lt.s32.totalorder %s4507_s25, %s4507_s25 }
  0x11   :  { %p4514_p8 = por %p4513_p7, %p4512_p6 }
  0x13   :  { %p4515_p9 = pnand %p4514_p8, %p4508_p5 }
  0x15   :  { %4518 = shalt.err (!%p4515_p9)
}
  0x16   :  { %s4589_s26 = smov 128   ;;  %s4590_s27 = smov 8  }
  0x17   :  { %27 = dma.hbm_to_vmem [thread:$0]  %s4729_s1, 51200, %s22_s21, [#allocation3], %s4589_s26, %s4589_s26, %s4590_s27  }
  0x18   :  { %s4591_s30 = smov [#allocation7]  }
  0x19   :  { %s43_s6 = sshll.u32 %s4591_s30, 4  ;;  %s44_s6 = int_to_ptr.vmem [resolvable:$true] %s43_s6 }
  0x1a   :  { %s4527_s7 = scalar_lea.vmem %s44_s6, 2048  ;;  %p4532_p11 = scmp.lt.s32.totalorder %s44_s6, %s44_s6 }
  0x1b   :  { %p4528_p10 = scmp.ne.s32.totalorder %s44_s6, %s4527_s7  ;;  %p4533_p12 = scmp.lt.s32.totalorder %s4527_s7, %s4527_s7 }
  0x1d   :  { %p4534_p13 = por %p4533_p12, %p4532_p11 }
  0x1f   :  { %p4535_p0 = pnand %p4534_p13, %p4528_p10 }
  0x21   :  { %4538 = shalt.err (!%p4535_p0)
}
  0x22   :  { %s4592_s2 = smov 64   ;;  %s4593_s8 = smov 4  }
  0x23   :  { %49 = dma.hbm_to_vmem [thread:$0]  %s4731_s3, 2048, %s44_s6, [#allocation6], %s4592_s2, %s4592_s2, %s4593_s8  }
  0x24   :  { %s4594_s11 = smov [#allocation8]  }
  0x25   :  { %s56_s12 = sshll.u32 %s4594_s11, 4  ;;  %s57_s12 = int_to_ptr.vmem [resolvable:$true] %s56_s12 }
  0x26   :  { %s4547_s1 = scalar_lea.vmem %s57_s12, 16  ;;  %s4551_s13 = scalar_lea.vmem %s57_s12, 32 }
  0x27   :  { %p4548_p1 = scmp.ne.s32.totalorder %s57_s12, %s4547_s1  ;;  %p4552_p2 = scmp.lt.s32.totalorder %s57_s12, %s57_s12 }
  0x28   :  { %p4553_p3 = scmp.lt.s32.totalorder %s4551_s13, %s4547_s1 }
  0x2a   :  { %p4554_p4 = por %p4553_p3, %p4552_p2 }
  0x2c   :  { %p4555_p5 = pnand %p4554_p4, %p4548_p1 }
  0x2e   :  { %4558 = shalt.err (!%p4555_p5)
}
  0x2f   :  { %59 = dma.hbm_to_vmem [thread:$0]  %s4732_s4, 16, %s57_s12, [#allocation9]  }
  0x30   :  { %4579 = dma.done.wait [#allocation3], 51200  }
  0x31   :  { %4580 = vsyncadd [#allocation3], 4294916096 }
  0x32   :  { %4581 = dma.done.wait [#allocation6], 2080  }
  0x33   :  { %4582 = vsyncadd [#allocation6], 4294965216 }
  0x34   :  { %4583 = dma.done.wait [#allocation9], 16  }
  0x35   :  { %4584 = vsyncadd [#allocation9], 4294967280  ;;  %v3860_v0 = vld [vmem:[#allocation2 + $0x74] ss:$8 sps:$4 sm:$0xff]   ;;  %v3862_v1 = vld [vmem:[#allocation2 + $0x70] ss:$8 sps:$4 sm:$0xff]   ;;  %v479_v35 = vlaneseq }
  0x36   :  { %2679 = vmatprep.subr.bf16.mxu0 %v3860_v0  ;;  %v3863_v2 = vld [vmem:[#allocation2 + $0x174] ss:$8 sps:$4 sm:$0xff]   ;;  %v3865_v3 = vld [vmem:[#allocation2 + $0x170] ss:$8 sps:$4 sm:$0xff]   ;;  %v3866_v4 = vld [vmem:[#allocation2 + $0x64] ss:$8 sps:$4 sm:$0xff]  }
  0x37   :  { %2680 = vmatpush1.bf16.msra.mxu0 %v3862_v1  ;;  %v3868_v5 = vld [vmem:[#allocation2 + $0x60] ss:$8 sps:$4 sm:$0xff]   ;;  %2720 = vmatprep.subr.bf16.mxu1 %v3863_v2  ;;  %v3869_v6 = vld [vmem:[#allocation2 + $0x164] ss:$8 sps:$4 sm:$0xff]   ;;  %v3872_v8 = vld [vmem:[#allocation2 + $0x54] ss:$8 sps:$4 sm:$0xff]  }
  0x38   :  { %2721 = vmatpush1.bf16.msra.mxu1 %v3865_v3  ;;  %2681 = vmatprep.subr.bf16.mxu0 %v3866_v4  ;;  %v3871_v7 = vld [vmem:[#allocation2 + $0x160] ss:$8 sps:$4 sm:$0xff]   ;;  %v3874_v9 = vld [vmem:[#allocation2 + $0x50] ss:$8 sps:$4 sm:$0xff]   ;;  %v3875_v10 = vld [vmem:[#allocation2 + $0x154] ss:$8 sps:$4 sm:$0xff]  }
  0x39   :  { %2722 = vmatprep.subr.bf16.mxu1 %v3869_v6  ;;  %v3878_v11 = vld [vmem:[#allocation2 + $0x44] ss:$8 sps:$4 sm:$0xff]   ;;  %v3877_v12 = vld [vmem:[#allocation2 + $0x150] ss:$8 sps:$4 sm:$0xff]   ;;  %v3880_v14 = vld [vmem:[#allocation2 + $0x40] ss:$8 sps:$4 sm:$0xff]  }
  0x3a   :  { %v3881_v13 = vld [vmem:[#allocation2 + $0x144] ss:$8 sps:$4 sm:$0xff]   ;;  %v3884_v15 = vld [vmem:[#allocation2 + $0x34] ss:$8 sps:$4 sm:$0xff]   ;;  %v3883_v16 = vld [vmem:[#allocation2 + $0x140] ss:$8 sps:$4 sm:$0xff]  }
  0x3b   :  { %2682 = vmatpush1.bf16.msra.mxu0 %v3868_v5  ;;  %v3887_v17 = vld [vmem:[#allocation2 + $0x134] ss:$8 sps:$4 sm:$0xff]   ;;  %v3886_v18 = vld [vmem:[#allocation2 + $0x30] ss:$8 sps:$4 sm:$0xff]   ;;  %v3890_v19 = vld [vmem:[#allocation2 + $0x24] ss:$8 sps:$4 sm:$0xff]  }
  0x3c   :  { %2683 = vmatprep.subr.bf16.mxu0 %v3872_v8  ;;  %2723 = vmatpush1.bf16.msra.mxu1 %v3871_v7  ;;  %v3889_v20 = vld [vmem:[#allocation2 + $0x130] ss:$8 sps:$4 sm:$0xff]   ;;  %v3893_v21 = vld [vmem:[#allocation2 + $0x124] ss:$8 sps:$4 sm:$0xff]   ;;  %v3892_v22 = vld [vmem:[#allocation2 + $0x20] ss:$8 sps:$4 sm:$0xff]  }
  0x3d   :  { %2724 = vmatprep.subr.bf16.mxu1 %v3875_v10  ;;  %v3896_v23 = vld [vmem:[#allocation2 + $0x14] ss:$8 sps:$4 sm:$0xff]   ;;  %v3895_v24 = vld [vmem:[#allocation2 + $0x120] ss:$8 sps:$4 sm:$0xff]   ;;  %v3898_v26 = vld [vmem:[#allocation2 + $0x10] ss:$8 sps:$4 sm:$0xff]  }
  0x3e   :  { %v3899_v25 = vld [vmem:[#allocation2 + $0x114] ss:$8 sps:$4 sm:$0xff]   ;;  %v3902_v27 = vld [vmem:[#allocation2 + $0x4] ss:$8 sps:$4 sm:$0xff]   ;;  %v3901_v28 = vld [vmem:[#allocation2 + $0x110] ss:$8 sps:$4 sm:$0xff]  }
  0x3f   :  { %2684 = vmatpush1.bf16.msra.mxu0 %v3874_v9  ;;  %v3905_v29 = vld [vmem:[#allocation2 + $0x104] ss:$8 sps:$4 sm:$0xff]   ;;  %v3904_v30 = vld [vmem:[#allocation2] ss:$8 sps:$4 sm:$0xff]   ;;  %v3908_v31 = vld [vmem:[#allocation2 + $0xf4] ss:$8 sps:$4 sm:$0xff]  }
  0x40   :  { %2685 = vmatprep.subr.bf16.mxu0 %v3878_v11  ;;  %2725 = vmatpush1.bf16.msra.mxu1 %v3877_v12  ;;  %v3907_v32 = vld [vmem:[#allocation2 + $0x100] ss:$8 sps:$4 sm:$0xff]   ;;  %v3911_v33 = vld [vmem:[#allocation2 + $0x1f4] ss:$8 sps:$4 sm:$0xff]   ;;  %v3910_v34 = vld [vmem:[#allocation2 + $0xf0] ss:$8 sps:$4 sm:$0xff]  }
  0x41   :  { %2726 = vmatprep.subr.bf16.mxu1 %v3881_v13  ;;  %v4595_v36 = vmov 1966171168   ;;  %v3914_v38 = vld [vmem:[#allocation2 + $0xe4] ss:$8 sps:$4 sm:$0xff]   ;;  %v3913_v39 = vld [vmem:[#allocation2 + $0x1f0] ss:$8 sps:$4 sm:$0xff]  }
  0x42   :  { %v495_v37 = vunpack.c.l.s4 %v4595_v36  ;;  %v3917_v40 = vld [vmem:[#allocation2 + $0x1e4] ss:$8 sps:$4 sm:$0xff]   ;;  %v3916_v41 = vld [vmem:[#allocation2 + $0xe0] ss:$8 sps:$4 sm:$0xff]   ;;  %v4640_v42 = vshrl.u32 %v479_v35, 7 }
  0x43   :  { %2686 = vmatpush1.bf16.msra.mxu0 %v3880_v14  ;;  %v3920_v44 = vld [vmem:[#allocation2 + $0xd4] ss:$8 sps:$4 sm:$0xff]   ;;  %v3919_v45 = vld [vmem:[#allocation2 + $0x1e0] ss:$8 sps:$4 sm:$0xff]   ;;  %v3922_v47 = vld [vmem:[#allocation2 + $0xd0] ss:$8 sps:$4 sm:$0xff]  }
  0x44   :  { %2687 = vmatprep.subr.bf16.mxu0 %v3884_v15  ;;  %2727 = vmatpush1.bf16.msra.mxu1 %v3883_v16  ;;  %v496_v43 = vunpack.c.0.s8 %v495_v37  ;;  %v3923_v46 = vld [vmem:[#allocation2 + $0x1d4] ss:$8 sps:$4 sm:$0xff]   ;;  %v3926_v49 = vld [vmem:[#allocation2 + $0xc4] ss:$8 sps:$4 sm:$0xff]   ;;  %v3925_v50 = vld [vmem:[#allocation2 + $0x1d0] ss:$8 sps:$4 sm:$0xff]  }
  0x45   :  { %2728 = vmatprep.subr.bf16.mxu1 %v3887_v17  ;;  %v3929_v51 = vld [vmem:[#allocation2 + $0x1c4] ss:$8 sps:$4 sm:$0xff]   ;;  %v3928_v53 = vld [vmem:[#allocation2 + $0xc0] ss:$8 sps:$4 sm:$0xff]   ;;  %v3932_v55 = vld [vmem:[#allocation2 + $0xb4] ss:$8 sps:$4 sm:$0xff]  }
  0x46   :  { %v4643_v48 = vsub.s32 %v496_v43, %v4640_v42  ;;  %v73_v52 = vld [vmem:[%s4728_s0] sm:$0xff]  ;;  %v3935_v58 = vld [vmem:[#allocation2 + $0x1b4] ss:$8 sps:$4 sm:$0xff]   ;;  %v3934_v59 = vld [vmem:[#allocation2 + $0xb0] ss:$8 sps:$4 sm:$0xff]  }
  0x47   :  { %2688 = vmatpush1.bf16.msra.mxu0 %v3886_v18  ;;  %v3931_v56 = vld [vmem:[#allocation2 + $0x1c0] ss:$8 sps:$4 sm:$0xff]   ;;  %v3938_v61 = vld [vmem:[#allocation2 + $0xa4] ss:$8 sps:$4 sm:$0xff]   ;;  %v3937_v62 = vld [vmem:[#allocation2 + $0x1b0] ss:$8 sps:$4 sm:$0xff]   ;;  %v493_v63 = vcombine.high %v73_v52, %v73_v52 }
  0x48   :  { %2689 = vmatprep.subr.bf16.mxu0 %v3890_v19  ;;  %2729 = vmatpush1.bf16.msra.mxu1 %v3889_v20  ;;  %v500_v54 = vrot.slane %v73_v52, %v4643_v48  ;;  %v3941_v1 = vld [vmem:[#allocation2 + $0x1a4] ss:$8 sps:$4 sm:$0xff]   ;;  %v3940_v2 = vld [vmem:[#allocation2 + $0xa0] ss:$8 sps:$4 sm:$0xff]   ;;  %v3944_v3 = vld [vmem:[#allocation2 + $0x94] ss:$8 sps:$4 sm:$0xff]  }
  0x49   :  { %2730 = vmatprep.subr.bf16.mxu1 %v3893_v21  ;;  %v3943_v4 = vld [vmem:[#allocation2 + $0x1a0] ss:$8 sps:$4 sm:$0xff]   ;;  %v4651_v5 = vrot.slane %v493_v63, %v4643_v48  ;;  %v3947_v6 = vld [vmem:[#allocation2 + $0x194] ss:$8 sps:$4 sm:$0xff]   ;;  %v3946_v7 = vld [vmem:[#allocation2 + $0x90] ss:$8 sps:$4 sm:$0xff]  }
  0x4a   :  { %v508_v57 = vcombine.high %v500_v54, %v500_v54  ;;  %v3950_v8 = vld [vmem:[#allocation2 + $0x84] ss:$8 sps:$4 sm:$0xff]   ;;  %v3949_v9 = vld [vmem:[#allocation2 + $0x190] ss:$8 sps:$4 sm:$0xff]   ;;  %v3952_v12 = vld [vmem:[#allocation2 + $0x80] ss:$8 sps:$4 sm:$0xff]   ;;  %v516_v13 = vrot.slane %v500_v54, %v4643_v48 }
  0x4b   :  { %2690 = vmatpush1.bf16.msra.mxu0 %v3892_v22  ;;  %v509_v10 = vcombine.high %v4651_v5, %v4651_v5  ;;  %v3953_v11 = vld [vmem:[#allocation2 + $0x184] ss:$8 sps:$4 sm:$0xff]   ;;  %v3959_v14 = vld [vmem:[#allocation2 + $0x274] ss:$8 sps:$4 sm:$0xff]   ;;  %v3956_v15 = vld [vmem:[#allocation2 + $0x180] ss:$8 sps:$4 sm:$0xff]  }
  0x4c   :  { %2691 = vmatprep.subr.bf16.mxu0 %v3896_v23  ;;  %2731 = vmatpush1.bf16.msra.mxu1 %v3895_v24  ;;  %v530_v60 = vrot.slane %v508_v57, %v4643_v48  ;;  %v3962_v17 = vld [vmem:[#allocation2 + $0x374] ss:$8 sps:$4 sm:$0xff]   ;;  %v3957_v18 = vld [vmem:[#allocation2 + $0x270] ss:$8 sps:$4 sm:$0xff]   ;;  %v538_v19 = vcombine.high %v516_v13, %v516_v13  ;;  %v3965_v20 = vld [vmem:[#allocation2 + $0x264] ss:$8 sps:$4 sm:$0xff]  }
  0x4d   :  { %2732 = vmatprep.subr.bf16.mxu1 %v3899_v25  ;;  %v537_v16 = vrot.slane %v509_v10, %v4643_v48  ;;  %v3960_v21 = vld [vmem:[#allocation2 + $0x370] ss:$8 sps:$4 sm:$0xff]   ;;  %v3968_v23 = vld [vmem:[#allocation2 + $0x364] ss:$8 sps:$4 sm:$0xff]   ;;  %v3963_v24 = vld [vmem:[#allocation2 + $0x260] ss:$8 sps:$4 sm:$0xff]  }
  0x4e   :  { %2711 = vmatprep.mubr.bf16.mxu0 %v530_v60  ;;  %v540_v0 = vcombine.high %v530_v60, %v530_v60  ;;  %v3971_v25 = vld [vmem:[#allocation2 + $0x254] ss:$8 sps:$4 sm:$0xff]   ;;  %v3981_v36 = vld [vmem:[#allocation2 + $0x230] ss:$8 sps:$4 sm:$0xff]   ;;  %v3989_v37 = vld [vmem:[#allocation2 + $0x224] ss:$8 sps:$4 sm:$0xff]  }
  0x4f   :  { %2692 = vmatpush1.bf16.msra.mxu0 %v3898_v26  ;;  %v541_v22 = vcombine.high %v537_v16, %v537_v16  ;;  %v3966_v26 = vld [vmem:[#allocation2 + $0x360] ss:$8 sps:$4 sm:$0xff]   ;;  %v3986_v35 = vld [vmem:[#allocation2 + $0x334] ss:$8 sps:$4 sm:$0xff]   ;;  %v4005_v54 = vld [vmem:[#allocation2 + $0x2f0] ss:$8 sps:$4 sm:$0xff]  }
  0x50   :  { %2693 = vmatprep.subr.bf16.mxu0 %v3902_v27  ;;  %2733 = vmatpush1.bf16.msra.mxu1 %v3901_v28  ;;  %v3974_v27 = vld [vmem:[#allocation2 + $0x354] ss:$8 sps:$4 sm:$0xff]   ;;  %v3969_v28 = vld [vmem:[#allocation2 + $0x250] ss:$8 sps:$4 sm:$0xff]   ;;  %v3990_v43 = vld [vmem:[#allocation2 + $0x320] ss:$8 sps:$4 sm:$0xff]  }
  0x51   :  { %2734 = vmatprep.subr.bf16.mxu1 %v3905_v29  ;;  %2752 = vmatprep.mubr.bf16.mxu1 %v540_v0  ;;  %v3977_v29 = vld [vmem:[#allocation2 + $0x244] ss:$8 sps:$4 sm:$0xff]   ;;  %v4002_v52 = vld [vmem:[#allocation2 + $0x300] ss:$8 sps:$4 sm:$0xff]   ;;  %v4020_v0 = vld [vmem:[#allocation2 + $0x3d0] ss:$8 sps:$4 sm:$0xff]  }
  0x52   :  { %v4016_v57 = vld [vmem:[#allocation2 + $0x3e4] ss:$8 sps:$4 sm:$0xff]   ;;  %v4014_v60 = vld [vmem:[#allocation2 + $0x3e0] ss:$8 sps:$4 sm:$0xff]  }
  0x53   :  { %2694 = vmatpush1.bf16.msra.mxu0 %v3904_v30  ;;  %v3972_v30 = vld [vmem:[#allocation2 + $0x350] ss:$8 sps:$4 sm:$0xff]   ;;  %v4025_v63 = vld [vmem:[#allocation2 + $0x2c4] ss:$8 sps:$4 sm:$0xff]  }
  0x54   :  { %2695 = vmatprep.subr.bf16.mxu0 %v3908_v31  ;;  %2735 = vmatpush1.bf16.msra.mxu1 %v3907_v32  ;;  %v3980_v31 = vld [vmem:[#allocation2 + $0x344] ss:$8 sps:$4 sm:$0xff]   ;;  %v3975_v32 = vld [vmem:[#allocation2 + $0x240] ss:$8 sps:$4 sm:$0xff]  }
  0x55   :  { %2736 = vmatprep.subr.bf16.mxu1 %v3911_v33  ;;  %v3983_v33 = vld [vmem:[#allocation2 + $0x234] ss:$8 sps:$4 sm:$0xff]   ;;  %v4040_v10 = vld [vmem:[#allocation2 + $0x3a4] ss:$8 sps:$4 sm:$0xff]  }
  0x57   :  { %2696 = vmatpush2.bf16.msra.mxu0 %v3910_v34  ;;  %v3978_v34 = vld [vmem:[#allocation2 + $0x340] ss:$8 sps:$4 sm:$0xff]  }
  0x58   :  { %2697 = vmatprep.subr.bf16.mxu0 %v3914_v38  ;;  %2737 = vmatpush2.bf16.msra.mxu1 %v3913_v39  ;;  %v3984_v38 = vld [vmem:[#allocation2 + $0x330] ss:$8 sps:$4 sm:$0xff]   ;;  %v3992_v39 = vld [vmem:[#allocation2 + $0x324] ss:$8 sps:$4 sm:$0xff]  }
  0x59   :  { %2738 = vmatprep.subr.bf16.mxu1 %v3917_v40  ;;  %v3987_v40 = vld [vmem:[#allocation2 + $0x220] ss:$8 sps:$4 sm:$0xff]  }
  0x5b   :  { %2698 = vmatpush2.bf16.msra.mxu0 %v3916_v41  ;;  %v3995_v41 = vld [vmem:[#allocation2 + $0x214] ss:$8 sps:$4 sm:$0xff]  }
  0x5c   :  { %2699 = vmatprep.subr.bf16.mxu0 %v3920_v44  ;;  %2739 = vmatpush2.bf16.msra.mxu1 %v3919_v45  ;;  %v3998_v44 = vld [vmem:[#allocation2 + $0x314] ss:$8 sps:$4 sm:$0xff]   ;;  %v3993_v45 = vld [vmem:[#allocation2 + $0x210] ss:$8 sps:$4 sm:$0xff]  }
  0x5d   :  { %2740 = vmatprep.subr.bf16.mxu1 %v3923_v46  ;;  %v4001_v46 = vld [vmem:[#allocation2 + $0x204] ss:$8 sps:$4 sm:$0xff]  }
  0x5f   :  { %2700 = vmatpush2.bf16.msra.mxu0 %v3922_v47  ;;  %v3996_v47 = vld [vmem:[#allocation2 + $0x310] ss:$8 sps:$4 sm:$0xff]  }
  0x60   :  { %2701 = vmatprep.subr.bf16.mxu0 %v3926_v49  ;;  %2741 = vmatpush2.bf16.msra.mxu1 %v3925_v50  ;;  %v4004_v49 = vld [vmem:[#allocation2 + $0x304] ss:$8 sps:$4 sm:$0xff]   ;;  %v3999_v50 = vld [vmem:[#allocation2 + $0x200] ss:$8 sps:$4 sm:$0xff]  }
  0x61   :  { %2742 = vmatprep.subr.bf16.mxu1 %v3929_v51  ;;  %v4007_v51 = vld [vmem:[#allocation2 + $0x2f4] ss:$8 sps:$4 sm:$0xff]  }
  0x63   :  { %2702 = vmatpush2.bf16.msra.mxu0 %v3928_v53  ;;  %v4010_v53 = vld [vmem:[#allocation2 + $0x3f4] ss:$8 sps:$4 sm:$0xff]  }
  0x64   :  { %2703 = vmatprep.subr.bf16.mxu0 %v3932_v55  ;;  %2743 = vmatpush2.bf16.msra.mxu1 %v3931_v56  ;;  %v4013_v55 = vld [vmem:[#allocation2 + $0x2e4] ss:$8 sps:$4 sm:$0xff]   ;;  %v4008_v56 = vld [vmem:[#allocation2 + $0x3f0] ss:$8 sps:$4 sm:$0xff]  }
  0x65   :  { %2744 = vmatprep.subr.bf16.mxu1 %v3935_v58  ;;  %v4011_v58 = vld [vmem:[#allocation2 + $0x2e0] ss:$8 sps:$4 sm:$0xff]  }
  0x67   :  { %2704 = vmatpush2.bf16.msra.mxu0 %v3934_v59  ;;  %v4019_v59 = vld [vmem:[#allocation2 + $0x2d4] ss:$8 sps:$4 sm:$0xff]  }
  0x68   :  { %2705 = vmatprep.subr.bf16.mxu0 %v3938_v61  ;;  %2745 = vmatpush2.bf16.msra.mxu1 %v3937_v62  ;;  %v4022_v61 = vld [vmem:[#allocation2 + $0x3d4] ss:$8 sps:$4 sm:$0xff]   ;;  %v4017_v62 = vld [vmem:[#allocation2 + $0x2d0] ss:$8 sps:$4 sm:$0xff]  }
  0x69   :  { %2746 = vmatprep.subr.bf16.mxu1 %v3941_v1  ;;  %v4028_v1 = vld [vmem:[#allocation2 + $0x3c4] ss:$8 sps:$4 sm:$0xff]  }
  0x6b   :  { %2706 = vmatpush2.bf16.msra.mxu0 %v3940_v2  ;;  %v4023_v2 = vld [vmem:[#allocation2 + $0x2c0] ss:$8 sps:$4 sm:$0xff]  }
  0x6c   :  { %2707 = vmatprep.subr.bf16.mxu0 %v3944_v3  ;;  %2747 = vmatpush2.bf16.msra.mxu1 %v3943_v4  ;;  %v4031_v3 = vld [vmem:[#allocation2 + $0x2b4] ss:$8 sps:$4 sm:$0xff]   ;;  %v4026_v4 = vld [vmem:[#allocation2 + $0x3c0] ss:$8 sps:$4 sm:$0xff]  }
  0x6d   :  { %2748 = vmatprep.subr.bf16.mxu1 %v3947_v6  ;;  %v4034_v6 = vld [vmem:[#allocation2 + $0x3b4] ss:$8 sps:$4 sm:$0xff]  }
  0x6f   :  { %2708 = vmatpush2.bf16.msra.mxu0 %v3946_v7  ;;  %v4029_v7 = vld [vmem:[#allocation2 + $0x2b0] ss:$8 sps:$4 sm:$0xff]  }
  0x70   :  { %2709 = vmatprep.subr.bf16.mxu0 %v3950_v8  ;;  %2749 = vmatpush2.bf16.msra.mxu1 %v3949_v9  ;;  %v4037_v8 = vld [vmem:[#allocation2 + $0x2a4] ss:$8 sps:$4 sm:$0xff]   ;;  %v4032_v9 = vld [vmem:[#allocation2 + $0x3b0] ss:$8 sps:$4 sm:$0xff]  }
  0x71   :  { %2750 = vmatprep.subr.bf16.mxu1 %v3953_v11  ;;  %v4035_v11 = vld [vmem:[#allocation2 + $0x2a0] ss:$8 sps:$4 sm:$0xff]  }
  0x73   :  { %2710 = vmatpush2.bf16.msra.mxu0 %v3952_v12  ;;  %v4043_v12 = vld [vmem:[#allocation2 + $0x294] ss:$8 sps:$4 sm:$0xff]  }
  0x74   :  { %2761 = vmatprep.subr.bf16.mxu0 %v3959_v14  ;;  %2751 = vmatpush2.bf16.msra.mxu1 %v3956_v15  ;;  %v4046_v14 = vld [vmem:[#allocation2 + $0x394] ss:$8 sps:$4 sm:$0xff]   ;;  %v4041_v15 = vld [vmem:[#allocation2 + $0x290] ss:$8 sps:$4 sm:$0xff]  }
  0x75   :  { %2802 = vmatprep.subr.bf16.mxu1 %v3962_v17  ;;  %v4044_v17 = vld [vmem:[#allocation2 + $0x390] ss:$8 sps:$4 sm:$0xff]  }
  0x76   :  { %2712 = vmatmul.mubr.bf16.vlgmr.msra.gmra.mxu0 %v516_v13  ;;  %v4038_v13 = vld [vmem:[#allocation2 + $0x3a0] ss:$8 sps:$4 sm:$0xff]  }
  0x77   :  { %2762 = vmatpush1.bf16.msra.mxu0 %v3957_v18  ;;  %2793 = vmatprep.mubr.bf16.mxu0 %v537_v16  ;;  %v4049_v16 = vld [vmem:[#allocation2 + $0x284] ss:$8 sps:$4 sm:$0xff]  }
  0x78   :  { %2753 = vmatmul.mubr.bf16.vlgmr.msra.gmra.mxu1 %v538_v19  ;;  %2763 = vmatprep.subr.bf16.mxu0 %v3965_v20  ;;  %v4052_v18 = vld [vmem:[#allocation2 + $0x384] ss:$8 sps:$4 sm:$0xff]   ;;  %v4047_v19 = vld [vmem:[#allocation2 + $0x280] ss:$8 sps:$4 sm:$0xff]   ;;  %v523_v20 = vrot.slane %v4651_v5, %v4643_v48 }
  0x79   :  { %2803 = vmatpush1.bf16.msra.mxu1 %v3960_v21  ;;  %2834 = vmatprep.mubr.bf16.mxu1 %v541_v22  ;;  %v4055_v21 = vld [vmem:[#allocation2 + $0x474] ss:$8 sps:$4 sm:$0xff]   ;;  %v4050_v22 = vld [vmem:[#allocation2 + $0x380] ss:$8 sps:$4 sm:$0xff]  }
  0x7a   :  { %2804 = vmatprep.subr.bf16.mxu1 %v3968_v23  ;;  %v4058_v23 = vld [vmem:[#allocation2 + $0x574] ss:$8 sps:$4 sm:$0xff]  }
  0x7b   :  { %2764 = vmatpush1.bf16.msra.mxu0 %v3963_v24  ;;  %v4053_v24 = vld [vmem:[#allocation2 + $0x470] ss:$8 sps:$4 sm:$0xff]  }
  0x7c   :  { %2765 = vmatprep.subr.bf16.mxu0 %v3971_v25  ;;  %v539_v25 = vcombine.high %v523_v20, %v523_v20 }
  0x7d   :  { %2805 = vmatpush1.bf16.msra.mxu1 %v3966_v26  ;;  %v4061_v26 = vld [vmem:[#allocation2 + $0x464] ss:$8 sps:$4 sm:$0xff]  }
  0x7e   :  { %2806 = vmatprep.subr.bf16.mxu1 %v3974_v27  ;;  %v4662_v27 = vld [vmem:[%s4728_s0 + $0x8] sm:$0xff] }
  0x7f   :  { %2766 = vmatpush1.bf16.msra.mxu0 %v3969_v28  ;;  %v4056_v28 = vld [vmem:[#allocation2 + $0x570] ss:$8 sps:$4 sm:$0xff]   ;;  %v4666_v5 = vrot.slane %v4662_v27, %v4643_v48 }
  0x80   :  { %2767 = vmatprep.subr.bf16.mxu0 %v3977_v29  ;;  %v4064_v29 = vld [vmem:[#allocation2 + $0x564] ss:$8 sps:$4 sm:$0xff]  }
  0x81   :  { %2807 = vmatpush1.bf16.msra.mxu1 %v3972_v30  ;;  %v4059_v30 = vld [vmem:[#allocation2 + $0x460] ss:$8 sps:$4 sm:$0xff]  }
  0x82   :  { %2808 = vmatprep.subr.bf16.mxu1 %v3980_v31  ;;  %v557_v31 = vcombine.high %v4666_v5, %v4666_v5 }
  0x83   :  { %2768 = vmatpush1.bf16.msra.mxu0 %v3975_v32  ;;  %v4067_v32 = vld [vmem:[#allocation2 + $0x454] ss:$8 sps:$4 sm:$0xff]  }
  0x84   :  { %2769 = vmatprep.subr.bf16.mxu0 %v3983_v33  ;;  %v4062_v33 = vld [vmem:[#allocation2 + $0x560] ss:$8 sps:$4 sm:$0xff]  }
  0x85   :  { %2809 = vmatpush1.bf16.msra.mxu1 %v3978_v34  ;;  %v579_v34 = vrot.slane %v557_v31, %v4643_v48  ;;  %v4143_v31 = vld [vmem:[#allocation2 + $0x480] ss:$8 sps:$4 sm:$0xff]  }
  0x86   :  { %2810 = vmatprep.subr.bf16.mxu1 %v3986_v35  ;;  %v4070_v35 = vld [vmem:[#allocation2 + $0x554] ss:$8 sps:$4 sm:$0xff]  }
  0x87   :  { %2770 = vmatpush1.bf16.msra.mxu0 %v3981_v36  ;;  %v4065_v36 = vld [vmem:[#allocation2 + $0x450] ss:$8 sps:$4 sm:$0xff]  }
  0x88   :  { %2771 = vmatprep.subr.bf16.mxu0 %v3989_v37  ;;  %v589_v37 = vcombine.high %v579_v34, %v579_v34 }
  0x89   :  { %2811 = vmatpush1.bf16.msra.mxu1 %v3984_v38  ;;  %v4073_v38 = vld [vmem:[#allocation2 + $0x444] ss:$8 sps:$4 sm:$0xff]  }
  0x8a   :  { %2812 = vmatprep.subr.bf16.mxu1 %v3992_v39  ;;  %v4068_v39 = vld [vmem:[#allocation2 + $0x550] ss:$8 sps:$4 sm:$0xff]  }
  0x8b   :  { %2772 = vmatpush1.bf16.msra.mxu0 %v3987_v40  ;;  %v4076_v40 = vld [vmem:[#allocation2 + $0x544] ss:$8 sps:$4 sm:$0xff]  }
  0x8c   :  { %2773 = vmatprep.subr.bf16.mxu0 %v3995_v41  ;;  %v4071_v41 = vld [vmem:[#allocation2 + $0x440] ss:$8 sps:$4 sm:$0xff]  }
  0x8d   :  { %2813 = vmatpush1.bf16.msra.mxu1 %v3990_v43  ;;  %v4079_v43 = vld [vmem:[#allocation2 + $0x434] ss:$8 sps:$4 sm:$0xff]  }
  0x8e   :  { %2814 = vmatprep.subr.bf16.mxu1 %v3998_v44  ;;  %v4074_v44 = vld [vmem:[#allocation2 + $0x540] ss:$8 sps:$4 sm:$0xff]  }
  0x8f   :  { %2774 = vmatpush1.bf16.msra.mxu0 %v3993_v45  ;;  %v4082_v45 = vld [vmem:[#allocation2 + $0x534] ss:$8 sps:$4 sm:$0xff]  }
  0x90   :  { %2775 = vmatprep.subr.bf16.mxu0 %v4001_v46  ;;  %v4077_v46 = vld [vmem:[#allocation2 + $0x430] ss:$8 sps:$4 sm:$0xff]  }
  0x91   :  { %2815 = vmatpush1.bf16.msra.mxu1 %v3996_v47  ;;  %v4085_v47 = vld [vmem:[#allocation2 + $0x424] ss:$8 sps:$4 sm:$0xff]  }
  0x92   :  { %2816 = vmatprep.subr.bf16.mxu1 %v4004_v49  ;;  %v4080_v49 = vld [vmem:[#allocation2 + $0x530] ss:$8 sps:$4 sm:$0xff]  }
  0x93   :  { %2776 = vmatpush1.bf16.msra.mxu0 %v3999_v50  ;;  %v4088_v50 = vld [vmem:[#allocation2 + $0x524] ss:$8 sps:$4 sm:$0xff]  }
  0x94   :  { %2777 = vmatprep.subr.bf16.mxu0 %v4007_v51  ;;  %v4083_v51 = vld [vmem:[#allocation2 + $0x420] ss:$8 sps:$4 sm:$0xff]  }
  0x95   :  { %2817 = vmatpush1.bf16.msra.mxu1 %v4002_v52  ;;  %v4091_v52 = vld [vmem:[#allocation2 + $0x414] ss:$8 sps:$4 sm:$0xff]  }
  0x96   :  { %2818 = vmatprep.subr.bf16.mxu1 %v4010_v53  ;;  %v4086_v53 = vld [vmem:[#allocation2 + $0x520] ss:$8 sps:$4 sm:$0xff]  }
  0x97   :  { %2778 = vmatpush2.bf16.msra.mxu0 %v4005_v54  ;;  %v4094_v54 = vld [vmem:[#allocation2 + $0x514] ss:$8 sps:$4 sm:$0xff]  }
  0x98   :  { %2779 = vmatprep.subr.bf16.mxu0 %v4013_v55  ;;  %v4089_v55 = vld [vmem:[#allocation2 + $0x410] ss:$8 sps:$4 sm:$0xff]  }
  0x99   :  { %2819 = vmatpush2.bf16.msra.mxu1 %v4008_v56  ;;  %v4097_v56 = vld [vmem:[#allocation2 + $0x404] ss:$8 sps:$4 sm:$0xff]  }
  0x9a   :  { %2820 = vmatprep.subr.bf16.mxu1 %v4016_v57  ;;  %v4092_v57 = vld [vmem:[#allocation2 + $0x510] ss:$8 sps:$4 sm:$0xff]  }
  0x9b   :  { %2780 = vmatpush2.bf16.msra.mxu0 %v4011_v58  ;;  %v4100_v58 = vld [vmem:[#allocation2 + $0x504] ss:$8 sps:$4 sm:$0xff]  }
  0x9c   :  { %2781 = vmatprep.subr.bf16.mxu0 %v4019_v59  ;;  %v4095_v59 = vld [vmem:[#allocation2 + $0x400] ss:$8 sps:$4 sm:$0xff]  }
  0x9d   :  { %2821 = vmatpush2.bf16.msra.mxu1 %v4014_v60  ;;  %v4103_v60 = vld [vmem:[#allocation2 + $0x4f4] ss:$8 sps:$4 sm:$0xff]  }
  0x9e   :  { %2822 = vmatprep.subr.bf16.mxu1 %v4022_v61  ;;  %v4098_v61 = vld [vmem:[#allocation2 + $0x500] ss:$8 sps:$4 sm:$0xff]  }
  0x9f   :  { %2782 = vmatpush2.bf16.msra.mxu0 %v4017_v62  ;;  %v4106_v62 = vld [vmem:[#allocation2 + $0x5f4] ss:$8 sps:$4 sm:$0xff]  }
  0xa0   :  { %2783 = vmatprep.subr.bf16.mxu0 %v4025_v63  ;;  %v4101_v63 = vld [vmem:[#allocation2 + $0x4f0] ss:$8 sps:$4 sm:$0xff]  }
  0xa1   :  { %2823 = vmatpush2.bf16.msra.mxu1 %v4020_v0  ;;  %v4109_v0 = vld [vmem:[#allocation2 + $0x4e4] ss:$8 sps:$4 sm:$0xff]  }
  0xa2   :  { %2824 = vmatprep.subr.bf16.mxu1 %v4028_v1  ;;  %v4104_v1 = vld [vmem:[#allocation2 + $0x5f0] ss:$8 sps:$4 sm:$0xff]  }
  0xa3   :  { %2784 = vmatpush2.bf16.msra.mxu0 %v4023_v2  ;;  %v4112_v2 = vld [vmem:[#allocation2 + $0x5e4] ss:$8 sps:$4 sm:$0xff]  }
  0xa4   :  { %2785 = vmatprep.subr.bf16.mxu0 %v4031_v3  ;;  %v4107_v3 = vld [vmem:[#allocation2 + $0x4e0] ss:$8 sps:$4 sm:$0xff]  }
  0xa5   :  { %2825 = vmatpush2.bf16.msra.mxu1 %v4026_v4  ;;  %v4115_v4 = vld [vmem:[#allocation2 + $0x4d4] ss:$8 sps:$4 sm:$0xff]  }
  0xa6   :  { %2826 = vmatprep.subr.bf16.mxu1 %v4034_v6  ;;  %v4110_v6 = vld [vmem:[#allocation2 + $0x5e0] ss:$8 sps:$4 sm:$0xff]  }
  0xa7   :  { %2786 = vmatpush2.bf16.msra.mxu0 %v4029_v7  ;;  %v4118_v7 = vld [vmem:[#allocation2 + $0x5d4] ss:$8 sps:$4 sm:$0xff]  }
  0xa8   :  { %2787 = vmatprep.subr.bf16.mxu0 %v4037_v8  ;;  %v4113_v8 = vld [vmem:[#allocation2 + $0x4d0] ss:$8 sps:$4 sm:$0xff]  }
  0xa9   :  { %2827 = vmatpush2.bf16.msra.mxu1 %v4032_v9  ;;  %v4121_v9 = vld [vmem:[#allocation2 + $0x4c4] ss:$8 sps:$4 sm:$0xff]  }
  0xaa   :  { %2828 = vmatprep.subr.bf16.mxu1 %v4040_v10  ;;  %v4116_v10 = vld [vmem:[#allocation2 + $0x5d0] ss:$8 sps:$4 sm:$0xff]  }
  0xab   :  { %2788 = vmatpush2.bf16.msra.mxu0 %v4035_v11  ;;  %v4124_v11 = vld [vmem:[#allocation2 + $0x5c4] ss:$8 sps:$4 sm:$0xff]  }
  0xac   :  { %2789 = vmatprep.subr.bf16.mxu0 %v4043_v12  ;;  %v4119_v12 = vld [vmem:[#allocation2 + $0x4c0] ss:$8 sps:$4 sm:$0xff]  }
  0xad   :  { %2829 = vmatpush2.bf16.msra.mxu1 %v4038_v13  ;;  %v4127_v13 = vld [vmem:[#allocation2 + $0x4b4] ss:$8 sps:$4 sm:$0xff]  }
  0xae   :  { %2830 = vmatprep.subr.bf16.mxu1 %v4046_v14  ;;  %v4122_v14 = vld [vmem:[#allocation2 + $0x5c0] ss:$8 sps:$4 sm:$0xff]  }
  0xaf   :  { %2790 = vmatpush2.bf16.msra.mxu0 %v4041_v15  ;;  %v4130_v15 = vld [vmem:[#allocation2 + $0x5b4] ss:$8 sps:$4 sm:$0xff]  }
  0xb0   :  { %2791 = vmatprep.subr.bf16.mxu0 %v4049_v16  ;;  %v4125_v16 = vld [vmem:[#allocation2 + $0x4b0] ss:$8 sps:$4 sm:$0xff]  }
  0xb1   :  { %2831 = vmatpush2.bf16.msra.mxu1 %v4044_v17  ;;  %v4133_v17 = vld [vmem:[#allocation2 + $0x4a4] ss:$8 sps:$4 sm:$0xff]  }
  0xb2   :  { %2832 = vmatprep.subr.bf16.mxu1 %v4052_v18  ;;  %v4128_v18 = vld [vmem:[#allocation2 + $0x5b0] ss:$8 sps:$4 sm:$0xff]  }
  0xb3   :  { %2792 = vmatpush2.bf16.msra.mxu0 %v4047_v19  ;;  %v542_v19 = vcombine.high %v4662_v27, %v4662_v27 }
  0xb4   :  { %2843 = vmatprep.subr.bf16.mxu0 %v4055_v21  ;;  %v4131_v21 = vld [vmem:[#allocation2 + $0x4a0] ss:$8 sps:$4 sm:$0xff]  }
  0xb5   :  { %2833 = vmatpush2.bf16.msra.mxu1 %v4050_v22  ;;  %v4139_v22 = vld [vmem:[#allocation2 + $0x494] ss:$8 sps:$4 sm:$0xff]  }
  0xb6   :  { %2794 = vmatmul.mubr.bf16.vlgmr.msra.gmra.mxu0 %v523_v20  ;;  %2884 = vmatprep.subr.bf16.mxu1 %v4058_v23  ;;  %v4136_v20 = vld [vmem:[#allocation2 + $0x5a4] ss:$8 sps:$4 sm:$0xff]   ;;  %v4134_v23 = vld [vmem:[#allocation2 + $0x5a0] ss:$8 sps:$4 sm:$0xff]  }
  0xb7   :  { %2844 = vmatpush1.bf16.msra.mxu0 %v4053_v24  ;;  %2875 = vmatprep.mubr.bf16.mxu0 %v579_v34  ;;  %v4674_v24 = vrot.slane %v542_v19, %v4643_v48  ;;  %v4146_v34 = vld [vmem:[#allocation2 + $0x580] ss:$8 sps:$4 sm:$0xff]   ;;  %v4212_v19 = vld [vmem:[#allocation2 + $0x7d0] ss:$8 sps:$4 sm:$0xff]  }
  0xb8   :  { %2835 = vmatmul.mubr.bf16.vlgmr.msra.gmra.mxu1 %v539_v25  ;;  %2845 = vmatprep.subr.bf16.mxu0 %v4061_v26  ;;  %v4142_v25 = vld [vmem:[#allocation2 + $0x594] ss:$8 sps:$4 sm:$0xff]   ;;  %v4137_v26 = vld [vmem:[#allocation2 + $0x490] ss:$8 sps:$4 sm:$0xff]  }
  0xb9   :  { %2885 = vmatpush1.bf16.msra.mxu1 %v4056_v28  ;;  %2916 = vmatprep.mubr.bf16.mxu1 %v589_v37  ;;  %v4145_v28 = vld [vmem:[#allocation2 + $0x484] ss:$8 sps:$4 sm:$0xff]   ;;  %v558_v27 = vcombine.high %v4674_v24, %v4674_v24  ;;  %v4149_v37 = vld [vmem:[#allocation2 + $0x670] ss:$8 sps:$4 sm:$0xff]  }
  0xba   :  { %2886 = vmatprep.subr.bf16.mxu1 %v4064_v29  ;;  %v4140_v29 = vld [vmem:[#allocation2 + $0x590] ss:$8 sps:$4 sm:$0xff]  }
  0xbb   :  { %2846 = vmatpush1.bf16.msra.mxu0 %v4059_v30  ;;  %v4148_v30 = vld [vmem:[#allocation2 + $0x584] ss:$8 sps:$4 sm:$0xff]  }
  0xbc   :  { %2847 = vmatprep.subr.bf16.mxu0 %v4067_v32  ;;  %v565_v32 = vrot.slane %v4666_v5, %v4643_v48  ;;  %v4155_v5 = vld [vmem:[#allocation2 + $0x660] ss:$8 sps:$4 sm:$0xff]  }
  0xbd   :  { %2887 = vmatpush1.bf16.msra.mxu1 %v4062_v33  ;;  %v4151_v33 = vld [vmem:[#allocation2 + $0x674] ss:$8 sps:$4 sm:$0xff]  }
  0xbe   :  { %2888 = vmatprep.subr.bf16.mxu1 %v4070_v35  ;;  %v586_v35 = vrot.slane %v558_v27, %v4643_v48  ;;  %v4232_v27 = vld [vmem:[#allocation2 + $0x7a4] ss:$8 sps:$4 sm:$0xff]  }
  0xbf   :  { %2848 = vmatpush1.bf16.msra.mxu0 %v4065_v36  ;;  %v4154_v36 = vld [vmem:[#allocation2 + $0x774] ss:$8 sps:$4 sm:$0xff]  }
  0xc0   :  { %2849 = vmatprep.subr.bf16.mxu0 %v4073_v38  ;;  %v587_v38 = vcombine.high %v565_v32, %v565_v32 }
  0xc1   :  { %2889 = vmatpush1.bf16.msra.mxu1 %v4068_v39  ;;  %v4157_v39 = vld [vmem:[#allocation2 + $0x664] ss:$8 sps:$4 sm:$0xff]  }
  0xc2   :  { %2890 = vmatprep.subr.bf16.mxu1 %v4076_v40  ;;  %v4152_v40 = vld [vmem:[#allocation2 + $0x770] ss:$8 sps:$4 sm:$0xff]  }
  0xc3   :  { %2850 = vmatpush1.bf16.msra.mxu0 %v4071_v41  ;;  %v590_v41 = vcombine.high %v586_v35, %v586_v35 }
  0xc4   :  { %2851 = vmatprep.subr.bf16.mxu0 %v4079_v43  ;;  %v4160_v43 = vld [vmem:[#allocation2 + $0x764] ss:$8 sps:$4 sm:$0xff]  }
  0xc5   :  { %2891 = vmatpush1.bf16.msra.mxu1 %v4074_v44  ;;  %v4163_v44 = vld [vmem:[#allocation2 + $0x654] ss:$8 sps:$4 sm:$0xff]  }
  0xc6   :  { %2892 = vmatprep.subr.bf16.mxu1 %v4082_v45  ;;  %v4158_v45 = vld [vmem:[#allocation2 + $0x760] ss:$8 sps:$4 sm:$0xff]  }
  0xc7   :  { %2852 = vmatpush1.bf16.msra.mxu0 %v4077_v46  ;;  %v4166_v46 = vld [vmem:[#allocation2 + $0x754] ss:$8 sps:$4 sm:$0xff]  }
  0xc8   :  { %2853 = vmatprep.subr.bf16.mxu0 %v4085_v47  ;;  %v4161_v47 = vld [vmem:[#allocation2 + $0x650] ss:$8 sps:$4 sm:$0xff]  }
  0xc9   :  { %2893 = vmatpush1.bf16.msra.mxu1 %v4080_v49  ;;  %v4169_v49 = vld [vmem:[#allocation2 + $0x644] ss:$8 sps:$4 sm:$0xff]  }
  0xca   :  { %2894 = vmatprep.subr.bf16.mxu1 %v4088_v50  ;;  %v4164_v50 = vld [vmem:[#allocation2 + $0x750] ss:$8 sps:$4 sm:$0xff]  }
  0xcb   :  { %2854 = vmatpush1.bf16.msra.mxu0 %v4083_v51  ;;  %v4172_v51 = vld [vmem:[#allocation2 + $0x744] ss:$8 sps:$4 sm:$0xff]  }
  0xcc   :  { %2855 = vmatprep.subr.bf16.mxu0 %v4091_v52  ;;  %v4167_v52 = vld [vmem:[#allocation2 + $0x640] ss:$8 sps:$4 sm:$0xff]  }
  0xcd   :  { %2895 = vmatpush1.bf16.msra.mxu1 %v4086_v53  ;;  %v4175_v53 = vld [vmem:[#allocation2 + $0x634] ss:$8 sps:$4 sm:$0xff]  }
  0xce   :  { %2896 = vmatprep.subr.bf16.mxu1 %v4094_v54  ;;  %v4170_v54 = vld [vmem:[#allocation2 + $0x740] ss:$8 sps:$4 sm:$0xff]  }
  0xcf   :  { %2856 = vmatpush1.bf16.msra.mxu0 %v4089_v55  ;;  %v4178_v55 = vld [vmem:[#allocation2 + $0x734] ss:$8 sps:$4 sm:$0xff]  }
  0xd0   :  { %2857 = vmatprep.subr.bf16.mxu0 %v4097_v56  ;;  %v4173_v56 = vld [vmem:[#allocation2 + $0x630] ss:$8 sps:$4 sm:$0xff]  }
  0xd1   :  { %2897 = vmatpush1.bf16.msra.mxu1 %v4092_v57  ;;  %v4181_v57 = vld [vmem:[#allocation2 + $0x624] ss:$8 sps:$4 sm:$0xff]  }
  0xd2   :  { %2898 = vmatprep.subr.bf16.mxu1 %v4100_v58  ;;  %v4176_v58 = vld [vmem:[#allocation2 + $0x730] ss:$8 sps:$4 sm:$0xff]  }
  0xd3   :  { %2858 = vmatpush1.bf16.msra.mxu0 %v4095_v59  ;;  %v4184_v59 = vld [vmem:[#allocation2 + $0x724] ss:$8 sps:$4 sm:$0xff]  }
  0xd4   :  { %2859 = vmatprep.subr.bf16.mxu0 %v4103_v60  ;;  %v4179_v60 = vld [vmem:[#allocation2 + $0x620] ss:$8 sps:$4 sm:$0xff]  }
  0xd5   :  { %2899 = vmatpush1.bf16.msra.mxu1 %v4098_v61  ;;  %v4187_v61 = vld [vmem:[#allocation2 + $0x614] ss:$8 sps:$4 sm:$0xff]  }
  0xd6   :  { %2900 = vmatprep.subr.bf16.mxu1 %v4106_v62  ;;  %v4182_v62 = vld [vmem:[#allocation2 + $0x720] ss:$8 sps:$4 sm:$0xff]  }
  0xd7   :  { %2860 = vmatpush2.bf16.msra.mxu0 %v4101_v63  ;;  %v4190_v63 = vld [vmem:[#allocation2 + $0x714] ss:$8 sps:$4 sm:$0xff]  }
  0xd8   :  { %2861 = vmatprep.subr.bf16.mxu0 %v4109_v0  ;;  %v4185_v0 = vld [vmem:[#allocation2 + $0x610] ss:$8 sps:$4 sm:$0xff]  }
  0xd9   :  { %2901 = vmatpush2.bf16.msra.mxu1 %v4104_v1  ;;  %v4193_v1 = vld [vmem:[#allocation2 + $0x604] ss:$8 sps:$4 sm:$0xff]  }
  0xda   :  { %2902 = vmatprep.subr.bf16.mxu1 %v4112_v2  ;;  %v4188_v2 = vld [vmem:[#allocation2 + $0x710] ss:$8 sps:$4 sm:$0xff]  }
  0xdb   :  { %2862 = vmatpush2.bf16.msra.mxu0 %v4107_v3  ;;  %v4196_v3 = vld [vmem:[#allocation2 + $0x704] ss:$8 sps:$4 sm:$0xff]  }
  0xdc   :  { %2863 = vmatprep.subr.bf16.mxu0 %v4115_v4  ;;  %v4191_v4 = vld [vmem:[#allocation2 + $0x600] ss:$8 sps:$4 sm:$0xff]  }
  0xdd   :  { %2903 = vmatpush2.bf16.msra.mxu1 %v4110_v6  ;;  %v4199_v6 = vld [vmem:[#allocation2 + $0x6f4] ss:$8 sps:$4 sm:$0xff]  }
  0xde   :  { %2904 = vmatprep.subr.bf16.mxu1 %v4118_v7  ;;  %v4194_v7 = vld [vmem:[#allocation2 + $0x700] ss:$8 sps:$4 sm:$0xff]  }
  0xdf   :  { %2864 = vmatpush2.bf16.msra.mxu0 %v4113_v8  ;;  %v4202_v8 = vld [vmem:[#allocation2 + $0x7f4] ss:$8 sps:$4 sm:$0xff]  }
  0xe0   :  { %2865 = vmatprep.subr.bf16.mxu0 %v4121_v9  ;;  %v4197_v9 = vld [vmem:[#allocation2 + $0x6f0] ss:$8 sps:$4 sm:$0xff]  }
  0xe1   :  { %2905 = vmatpush2.bf16.msra.mxu1 %v4116_v10  ;;  %v4205_v10 = vld [vmem:[#allocation2 + $0x6e4] ss:$8 sps:$4 sm:$0xff]  }
  0xe2   :  { %2906 = vmatprep.subr.bf16.mxu1 %v4124_v11  ;;  %v4200_v11 = vld [vmem:[#allocation2 + $0x7f0] ss:$8 sps:$4 sm:$0xff]  }
  0xe3   :  { %2866 = vmatpush2.bf16.msra.mxu0 %v4119_v12  ;;  %v4208_v12 = vld [vmem:[#allocation2 + $0x7e4] ss:$8 sps:$4 sm:$0xff]  }
  0xe4   :  { %2867 = vmatprep.subr.bf16.mxu0 %v4127_v13  ;;  %v4203_v13 = vld [vmem:[#allocation2 + $0x6e0] ss:$8 sps:$4 sm:$0xff]  }
  0xe5   :  { %2907 = vmatpush2.bf16.msra.mxu1 %v4122_v14  ;;  %v4211_v14 = vld [vmem:[#allocation2 + $0x6d4] ss:$8 sps:$4 sm:$0xff]  }
  0xe6   :  { %2908 = vmatprep.subr.bf16.mxu1 %v4130_v15  ;;  %v4206_v15 = vld [vmem:[#allocation2 + $0x7e0] ss:$8 sps:$4 sm:$0xff]  }
  0xe7   :  { %2868 = vmatpush2.bf16.msra.mxu0 %v4125_v16  ;;  %v4214_v16 = vld [vmem:[#allocation2 + $0x7d4] ss:$8 sps:$4 sm:$0xff]  }
  0xe8   :  { %2869 = vmatprep.subr.bf16.mxu0 %v4133_v17  ;;  %v4209_v17 = vld [vmem:[#allocation2 + $0x6d0] ss:$8 sps:$4 sm:$0xff]  }
  0xe9   :  { %2909 = vmatpush2.bf16.msra.mxu1 %v4128_v18  ;;  %v4217_v18 = vld [vmem:[#allocation2 + $0x6c4] ss:$8 sps:$4 sm:$0xff]  }
  0xea   :  { %2910 = vmatprep.subr.bf16.mxu1 %v4136_v20  ;;  %v4220_v20 = vld [vmem:[#allocation2 + $0x7c4] ss:$8 sps:$4 sm:$0xff]  }
  0xeb   :  { %2870 = vmatpush2.bf16.msra.mxu0 %v4131_v21  ;;  %v4215_v21 = vld [vmem:[#allocation2 + $0x6c0] ss:$8 sps:$4 sm:$0xff]  }
  0xec   :  { %2871 = vmatprep.subr.bf16.mxu0 %v4139_v22  ;;  %v4223_v22 = vld [vmem:[#allocation2 + $0x6b4] ss:$8 sps:$4 sm:$0xff]  }
  0xed   :  { %2911 = vmatpush2.bf16.msra.mxu1 %v4134_v23  ;;  %v4218_v23 = vld [vmem:[#allocation2 + $0x7c0] ss:$8 sps:$4 sm:$0xff]  }
  0xee   :  { %2912 = vmatprep.subr.bf16.mxu1 %v4142_v25  ;;  %v4226_v25 = vld [vmem:[#allocation2 + $0x7b4] ss:$8 sps:$4 sm:$0xff]  }
  0xef   :  { %2872 = vmatpush2.bf16.msra.mxu0 %v4137_v26  ;;  %v4221_v26 = vld [vmem:[#allocation2 + $0x6b0] ss:$8 sps:$4 sm:$0xff]  }
  0xf0   :  { %2873 = vmatprep.subr.bf16.mxu0 %v4145_v28  ;;  %v4229_v28 = vld [vmem:[#allocation2 + $0x6a4] ss:$8 sps:$4 sm:$0xff]  }
  0xf1   :  { %2913 = vmatpush2.bf16.msra.mxu1 %v4140_v29  ;;  %v4224_v29 = vld [vmem:[#allocation2 + $0x7b0] ss:$8 sps:$4 sm:$0xff]  }
  0xf2   :  { %2914 = vmatprep.subr.bf16.mxu1 %v4148_v30  ;;  %v4684_v30 = vld [vmem:[%s4728_s0 + $0x10] sm:$0xff] }
  0xf3   :  { %2874 = vmatpush2.bf16.msra.mxu0 %v4143_v31  ;;  %v4227_v31 = vld [vmem:[#allocation2 + $0x6a0] ss:$8 sps:$4 sm:$0xff]  }
  0xf4   :  { %2925 = vmatprep.subr.bf16.mxu0 %v4151_v33  ;;  %v4230_v33 = vld [vmem:[#allocation2 + $0x7a0] ss:$8 sps:$4 sm:$0xff]  }
  0xf5   :  { %2915 = vmatpush2.bf16.msra.mxu1 %v4146_v34  ;;  %v4688_v34 = vrot.slane %v4684_v30, %v4643_v48 }
  0xf6   :  { %2876 = vmatmul.mubr.bf16.vlgmr.msra.gmra.mxu0 %v565_v32  ;;  %2966 = vmatprep.subr.bf16.mxu1 %v4154_v36  ;;  %v4235_v32 = vld [vmem:[#allocation2 + $0x694] ss:$8 sps:$4 sm:$0xff]   ;;  %v4233_v36 = vld [vmem:[#allocation2 + $0x690] ss:$8 sps:$4 sm:$0xff]  }
  0xf7   :  { %2926 = vmatpush1.bf16.msra.mxu0 %v4149_v37  ;;  %2957 = vmatprep.mubr.bf16.mxu0 %v586_v35  ;;  %v4238_v35 = vld [vmem:[#allocation2 + $0x794] ss:$8 sps:$4 sm:$0xff]   ;;  %v4241_v37 = vld [vmem:[#allocation2 + $0x684] ss:$8 sps:$4 sm:$0xff]  }
  0xf8   :  { %2917 = vmatmul.mubr.bf16.vlgmr.msra.gmra.mxu1 %v587_v38  ;;  %2927 = vmatprep.subr.bf16.mxu0 %v4157_v39  ;;  %v4236_v38 = vld [vmem:[#allocation2 + $0x790] ss:$8 sps:$4 sm:$0xff]   ;;  %v606_v39 = vcombine.high %v4688_v34, %v4688_v34 }
  0xf9   :  { %2967 = vmatpush1.bf16.msra.mxu1 %v4152_v40  ;;  %2998 = vmatprep.mubr.bf16.mxu1 %v590_v41  ;;  %v4244_v40 = vld [vmem:[#allocation2 + $0x784] ss:$8 sps:$4 sm:$0xff]   ;;  %v4239_v41 = vld [vmem:[#allocation2 + $0x680] ss:$8 sps:$4 sm:$0xff]  }
  0xfa   :  { %2968 = vmatprep.subr.bf16.mxu1 %v4160_v43  ;;  %v477_v43 = vld [vmem:[#allocation5] sm:$0x3] }
  0xfb   :  { %2928 = vmatpush1.bf16.msra.mxu0 %v4155_v5  ;;  %v481_v5 = vsub.s32 0, %v4640_v42 }
  0xfc   :  { %2929 = vmatprep.subr.bf16.mxu0 %v4163_v44  ;;  %v572_v44 = vrot.slane %v4674_v24, %v4643_v48 }
  0xfd   :  { %2969 = vmatpush1.bf16.msra.mxu1 %v4158_v45  ;;  %v4248_v45 = vld [vmem:[#allocation2 + $0x874] ss:$8 sps:$4 sm:$0xff]  }
  0xfe   :  { %2970 = vmatprep.subr.bf16.mxu1 %v4166_v46  ;;  %v4242_v46 = vld [vmem:[#allocation2 + $0x780] ss:$8 sps:$4 sm:$0xff]  }
  0xff   :  { %2930 = vmatpush1.bf16.msra.mxu0 %v4161_v47  ;;  %v485_v47 = vsub.s32 1, %v4640_v42 }
 0x100   :  { %2931 = vmatprep.subr.bf16.mxu0 %v4169_v49  ;;  %v628_v49 = vrot.slane %v606_v39, %v4643_v48  ;;  %v4297_v39 = vld [vmem:[#allocation2 + $0x9f0] ss:$8 sps:$4 sm:$0xff]  }
 0x101   :  { %2971 = vmatpush1.bf16.msra.mxu1 %v4164_v50  ;;  %v4251_v50 = vld [vmem:[#allocation2 + $0x974] ss:$8 sps:$4 sm:$0xff]  }
 0x102   :  { %2972 = vmatprep.subr.bf16.mxu1 %v4172_v51  ;;  %v482_v51 = vrot.slane %v477_v43, %v481_v5  ;;  %v4303_v5 = vld [vmem:[#allocation2 + $0x9e0] ss:$8 sps:$4 sm:$0xff]  }
 0x103   :  { %2932 = vmatpush1.bf16.msra.mxu0 %v4167_v52  ;;  %v4246_v52 = vld [vmem:[#allocation2 + $0x870] ss:$8 sps:$4 sm:$0xff]  }
 0x104   :  { %2933 = vmatprep.subr.bf16.mxu0 %v4175_v53  ;;  %v588_v53 = vcombine.high %v572_v44, %v572_v44 }
 0x105   :  { %2973 = vmatpush1.bf16.msra.mxu1 %v4170_v54  ;;  %v4254_v54 = vld [vmem:[#allocation2 + $0x864] ss:$8 sps:$4 sm:$0xff]  }
 0x106   :  { %2974 = vmatprep.subr.bf16.mxu1 %v4178_v55  ;;  %v486_v55 = vrot.slane %v477_v43, %v485_v47  ;;  %v4308_v43 = vld [vmem:[#allocation2 + $0x8d4] ss:$8 sps:$4 sm:$0xff]   ;;  %v4309_v47 = vld [vmem:[#allocation2 + $0x9d0] ss:$8 sps:$4 sm:$0xff]  }
 0x107   :  { %2934 = vmatpush1.bf16.msra.mxu0 %v4173_v56  ;;  %v4249_v56 = vld [vmem:[#allocation2 + $0x970] ss:$8 sps:$4 sm:$0xff]  }
 0x108   :  { %2935 = vmatprep.subr.bf16.mxu0 %v4181_v57  ;;  %v638_v57 = vcombine.high %v628_v49, %v628_v49 }
 0x109   :  { %2975 = vmatpush1.bf16.msra.mxu1 %v4176_v58  ;;  %v4252_v58 = vld [vmem:[#allocation2 + $0x860] ss:$8 sps:$4 sm:$0xff]  }
 0x10a   :  { %2976 = vmatprep.subr.bf16.mxu1 %v4184_v59  ;;  %v4257_v59 = vld [vmem:[#allocation2 + $0x964] ss:$8 sps:$4 sm:$0xff]  }
 0x10b   :  { %2936 = vmatpush1.bf16.msra.mxu0 %v4179_v60  ;;  %v4255_v60 = vld [vmem:[#allocation2 + $0x960] ss:$8 sps:$4 sm:$0xff]  }
 0x10c   :  { %2937 = vmatprep.subr.bf16.mxu0 %v4187_v61 }
 0x10d   :  { %2977 = vmatpush1.bf16.msra.mxu1 %v4182_v62 }
 0x10e   :  { %2978 = vmatprep.subr.bf16.mxu1 %v4190_v63  ;;  %v4260_v63 = vld [vmem:[#allocation2 + $0x854] ss:$8 sps:$4 sm:$0xff]  }
 0x10f   :  { %2938 = vmatpush1.bf16.msra.mxu0 %v4185_v0 }
 0x110   :  { %2939 = vmatprep.subr.bf16.mxu0 %v4193_v1 }
 0x111   :  { %2979 = vmatpush1.bf16.msra.mxu1 %v4188_v2  ;;  %v4258_v2 = vld [vmem:[#allocation2 + $0x850] ss:$8 sps:$4 sm:$0xff]  }
 0x112   :  { %2980 = vmatprep.subr.bf16.mxu1 %v4196_v3  ;;  %v4263_v3 = vld [vmem:[#allocation2 + $0x954] ss:$8 sps:$4 sm:$0xff]  }
 0x113   :  { %2940 = vmatpush1.bf16.msra.mxu0 %v4191_v4 }
 0x114   :  { %2941 = vmatprep.subr.bf16.mxu0 %v4199_v6 }
 0x115   :  { %2981 = vmatpush1.bf16.msra.mxu1 %v4194_v7 }
 0x116   :  { %2982 = vmatprep.subr.bf16.mxu1 %v4202_v8  ;;  %v4261_v8 = vld [vmem:[#allocation2 + $0x950] ss:$8 sps:$4 sm:$0xff]  }
 0x117   :  { %2942 = vmatpush2.bf16.msra.mxu0 %v4197_v9 }
 0x118   :  { %2943 = vmatprep.subr.bf16.mxu0 %v4205_v10  ;;  %v4266_v10 = vld [vmem:[#allocation2 + $0x844] ss:$8 sps:$4 sm:$0xff]  }
 0x119   :  { %2983 = vmatpush2.bf16.msra.mxu1 %v4200_v11  ;;  %v4269_v11 = vld [vmem:[#allocation2 + $0x944] ss:$8 sps:$4 sm:$0xff]  }
 0x11a   :  { %2984 = vmatprep.subr.bf16.mxu1 %v4208_v12 }
 0x11b   :  { %2944 = vmatpush2.bf16.msra.mxu0 %v4203_v13  ;;  %v4264_v13 = vld [vmem:[#allocation2 + $0x840] ss:$8 sps:$4 sm:$0xff]  }
 0x11c   :  { %2945 = vmatprep.subr.bf16.mxu0 %v4211_v14 }
 0x11d   :  { %2985 = vmatpush2.bf16.msra.mxu1 %v4206_v15  ;;  %v4267_v15 = vld [vmem:[#allocation2 + $0x940] ss:$8 sps:$4 sm:$0xff]  }
 0x11e   :  { %2986 = vmatprep.subr.bf16.mxu1 %v4214_v16  ;;  %v4272_v16 = vld [vmem:[#allocation2 + $0x834] ss:$8 sps:$4 sm:$0xff]  }
 0x11f   :  { %2946 = vmatpush2.bf16.msra.mxu0 %v4209_v17  ;;  %v4275_v17 = vld [vmem:[#allocation2 + $0x934] ss:$8 sps:$4 sm:$0xff]  }
 0x120   :  { %2947 = vmatprep.subr.bf16.mxu0 %v4217_v18  ;;  %v4270_v18 = vld [vmem:[#allocation2 + $0x830] ss:$8 sps:$4 sm:$0xff]  }
 0x121   :  { %2987 = vmatpush2.bf16.msra.mxu1 %v4212_v19  ;;  %v4273_v19 = vld [vmem:[#allocation2 + $0x930] ss:$8 sps:$4 sm:$0xff]  }
 0x122   :  { %2988 = vmatprep.subr.bf16.mxu1 %v4220_v20  ;;  %v4278_v20 = vld [vmem:[#allocation2 + $0x824] ss:$8 sps:$4 sm:$0xff]  }
 0x123   :  { %2948 = vmatpush2.bf16.msra.mxu0 %v4215_v21  ;;  %v4281_v21 = vld [vmem:[#allocation2 + $0x924] ss:$8 sps:$4 sm:$0xff]  }
 0x124   :  { %2949 = vmatprep.subr.bf16.mxu0 %v4223_v22  ;;  %v4276_v22 = vld [vmem:[#allocation2 + $0x820] ss:$8 sps:$4 sm:$0xff]  }
 0x125   :  { %2989 = vmatpush2.bf16.msra.mxu1 %v4218_v23  ;;  %v4284_v23 = vld [vmem:[#allocation2 + $0x814] ss:$8 sps:$4 sm:$0xff]  }
 0x126   :  { %2990 = vmatprep.subr.bf16.mxu1 %v4226_v25  ;;  %v4279_v25 = vld [vmem:[#allocation2 + $0x920] ss:$8 sps:$4 sm:$0xff]  }
 0x127   :  { %2950 = vmatpush2.bf16.msra.mxu0 %v4221_v26  ;;  %v4287_v26 = vld [vmem:[#allocation2 + $0x914] ss:$8 sps:$4 sm:$0xff]  }
 0x128   :  { %2951 = vmatprep.subr.bf16.mxu0 %v4229_v28  ;;  %v4282_v28 = vld [vmem:[#allocation2 + $0x810] ss:$8 sps:$4 sm:$0xff]  }
 0x129   :  { %2991 = vmatpush2.bf16.msra.mxu1 %v4224_v29  ;;  %v4290_v29 = vld [vmem:[#allocation2 + $0x804] ss:$8 sps:$4 sm:$0xff]  }
 0x12a   :  { %2992 = vmatprep.subr.bf16.mxu1 %v4232_v27  ;;  %v4285_v27 = vld [vmem:[#allocation2 + $0x910] ss:$8 sps:$4 sm:$0xff]  }
 0x12b   :  { %2952 = vmatpush2.bf16.msra.mxu0 %v4227_v31  ;;  %v4293_v31 = vld [vmem:[#allocation2 + $0x904] ss:$8 sps:$4 sm:$0xff]  }
 0x12c   :  { %2953 = vmatprep.subr.bf16.mxu0 %v4235_v32  ;;  %v4288_v32 = vld [vmem:[#allocation2 + $0x800] ss:$8 sps:$4 sm:$0xff]  }
 0x12d   :  { %2993 = vmatpush2.bf16.msra.mxu1 %v4230_v33  ;;  %v4296_v33 = vld [vmem:[#allocation2 + $0x8f4] ss:$8 sps:$4 sm:$0xff]  }
 0x12e   :  { %2994 = vmatprep.subr.bf16.mxu1 %v4238_v35  ;;  %v4291_v35 = vld [vmem:[#allocation2 + $0x900] ss:$8 sps:$4 sm:$0xff]  }
 0x12f   :  { %2954 = vmatpush2.bf16.msra.mxu0 %v4233_v36  ;;  %v4299_v36 = vld [vmem:[#allocation2 + $0x9f4] ss:$8 sps:$4 sm:$0xff]  }
 0x130   :  { %2955 = vmatprep.subr.bf16.mxu0 %v4241_v37  ;;  %v4294_v37 = vld [vmem:[#allocation2 + $0x8f0] ss:$8 sps:$4 sm:$0xff]  }
 0x131   :  { %2995 = vmatpush2.bf16.msra.mxu1 %v4236_v38  ;;  %v4302_v38 = vld [vmem:[#allocation2 + $0x8e4] ss:$8 sps:$4 sm:$0xff]  }
 0x132   :  { %2996 = vmatprep.subr.bf16.mxu1 %v4244_v40  ;;  %v4305_v40 = vld [vmem:[#allocation2 + $0x9e4] ss:$8 sps:$4 sm:$0xff]  }
 0x133   :  { %2956 = vmatpush2.bf16.msra.mxu0 %v4239_v41  ;;  %v4300_v41 = vld [vmem:[#allocation2 + $0x8e0] ss:$8 sps:$4 sm:$0xff]  }
 0x134   :  { %3007 = vmatprep.subr.bf16.mxu0 %v4248_v45  ;;  %v4306_v45 = vld [vmem:[#allocation2 + $0x8d0] ss:$8 sps:$4 sm:$0xff]  }
 0x135   :  { %2997 = vmatpush2.bf16.msra.mxu1 %v4242_v46  ;;  %v4314_v46 = vld [vmem:[#allocation2 + $0x8c4] ss:$8 sps:$4 sm:$0xff]  }
 0x136   :  { %v2713_v24 = vpop.f32.mrf.mxu0  ;;  %2958 = vmatmul.mubr.bf16.vlgmr.msra.gmra.mxu0 %v572_v44  ;;  %3048 = vmatprep.subr.bf16.mxu1 %v4251_v50  ;;  %v4311_v44 = vld [vmem:[#allocation2 + $0x9d4] ss:$8 sps:$4 sm:$0xff]   ;;  %v4312_v50 = vld [vmem:[#allocation2 + $0x8c0] ss:$8 sps:$4 sm:$0xff]  }
 0x137   :  { %v2714_v42 = vadd.f32 %v2713_v24, %v482_v51  ;;  %3008 = vmatpush1.bf16.msra.mxu0 %v4246_v52  ;;  %3039 = vmatprep.mubr.bf16.mxu0 %v628_v49  ;;  %v4317_v49 = vld [vmem:[#allocation2 + $0x9c4] ss:$8 sps:$4 sm:$0xff]   ;;  %v4320_v51 = vld [vmem:[#allocation2 + $0x8b4] ss:$8 sps:$4 sm:$0xff]   ;;  %v4315_v52 = vld [vmem:[#allocation2 + $0x9c0] ss:$8 sps:$4 sm:$0xff]  }
 0x138   :  { %v2715_v61 = vpop.f32.mrf.mxu0  ;;  %v2754_v62 = vpop.f32.mrf.mxu1  ;;  %2999 = vmatmul.mubr.bf16.vlgmr.msra.gmra.mxu1 %v588_v53  ;;  %3009 = vmatprep.subr.bf16.mxu0 %v4254_v54  ;;  %v4323_v53 = vld [vmem:[#allocation2 + $0x9b4] ss:$8 sps:$4 sm:$0xff]   ;;  %v4318_v54 = vld [vmem:[#allocation2 + $0x8b0] ss:$8 sps:$4 sm:$0xff]   ;;  %v4329_v24 = vld [vmem:[#allocation2 + $0x9a4] ss:$8 sps:$4 sm:$0xff]  }
 0x139   :  { %v2716_v0 = vadd.f32 %v2715_v61, %v486_v55  ;;  %v4697_v1 = vadd.f32 %v2754_v62, %v2714_v42  ;;  %3049 = vmatpush1.bf16.msra.mxu1 %v4249_v56  ;;  %3080 = vmatprep.mubr.bf16.mxu1 %v638_v57  ;;  %v4326_v55 = vld [vmem:[#allocation2 + $0x8a4] ss:$8 sps:$4 sm:$0xff]   ;;  %v4321_v56 = vld [vmem:[#allocation2 + $0x9b0] ss:$8 sps:$4 sm:$0xff]   ;;  %v591_v57 = vcombine.high %v4684_v30, %v4684_v30  ;;  %v4327_v42 = vld [vmem:[#allocation2 + $0x9a0] ss:$8 sps:$4 sm:$0xff]  }
 0x13a   :  { %v2717_v4 = vpop.f32.mrf.mxu0  ;;  %v2756_v6 = vpop.f32.mrf.mxu1  ;;  %3050 = vmatprep.subr.bf16.mxu1 %v4257_v59  ;;  %v4332_v59 = vld [vmem:[#allocation2 + $0x894] ss:$8 sps:$4 sm:$0xff]   ;;  %v4330_v62 = vld [vmem:[#allocation2 + $0x890] ss:$8 sps:$4 sm:$0xff]  }
 0x13b   :  { %v4699_v7 = vadd.f32 %v2756_v6, %v2716_v0  ;;  %3010 = vmatpush1.bf16.msra.mxu0 %v4252_v58  ;;  %v4324_v58 = vld [vmem:[#allocation2 + $0x8a0] ss:$8 sps:$4 sm:$0xff]   ;;  %v4335_v61 = vld [vmem:[#allocation2 + $0x994] ss:$8 sps:$4 sm:$0xff]   ;;  %v4333_v0 = vld [vmem:[#allocation2 + $0x990] ss:$8 sps:$4 sm:$0xff]   ;;  %v614_v4 = vrot.slane %v4688_v34, %v4643_v48 }
 0x13c   :  { %v2718_v9 = vpop.f32.mrf.mxu0  ;;  %3011 = vmatprep.subr.bf16.mxu0 %v4260_v63  ;;  %v2758_v12 = vpop.f32.mrf.mxu1  ;;  %v4338_v63 = vld [vmem:[#allocation2 + $0x884] ss:$8 sps:$4 sm:$0xff]   ;;  %v4344_v6 = vld [vmem:[#allocation2 + $0xa74] ss:$8 sps:$4 sm:$0xff]  }
 0x13d   :  { %3051 = vmatpush1.bf16.msra.mxu1 %v4255_v60  ;;  %v4704_v60 = vrot.slane %v591_v57, %v4643_v48  ;;  %v636_v12 = vcombine.high %v614_v4, %v614_v4  ;;  %v4395_v57 = vld [vmem:[#allocation2 + $0xbf4] ss:$8 sps:$4 sm:$0xff]  }
 0x13e   :  { %3052 = vmatprep.subr.bf16.mxu1 %v4263_v3  ;;  %v2759_v14 = vpop.f32.mrf.mxu1  ;;  %v4336_v3 = vld [vmem:[#allocation2 + $0x880] ss:$8 sps:$4 sm:$0xff]  }
 0x13f   :  { %3012 = vmatpush1.bf16.msra.mxu0 %v4258_v2  ;;  %v607_v30 = vcombine.high %v4704_v60, %v4704_v60  ;;  %v4341_v2 = vld [vmem:[#allocation2 + $0x984] ss:$8 sps:$4 sm:$0xff]   ;;  %v4345_v14 = vld [vmem:[#allocation2 + $0xb70] ss:$8 sps:$4 sm:$0xff]  }
 0x140   :  { %3013 = vmatprep.subr.bf16.mxu0 %v4266_v10  ;;  %v4347_v10 = vld [vmem:[#allocation2 + $0xb74] ss:$8 sps:$4 sm:$0xff]  }
 0x141   :  { %3053 = vmatpush1.bf16.msra.mxu1 %v4261_v8  ;;  %v4339_v8 = vld [vmem:[#allocation2 + $0x980] ss:$8 sps:$4 sm:$0xff]   ;;  %v635_v9 = vrot.slane %v607_v30, %v4643_v48  ;;  %v4402_v30 = vld [vmem:[#allocation2 + $0xad0] ss:$8 sps:$4 sm:$0xff]  }
 0x142   :  { %3054 = vmatprep.subr.bf16.mxu1 %v4269_v11  ;;  %v4342_v11 = vld [vmem:[#allocation2 + $0xa70] ss:$8 sps:$4 sm:$0xff]  }
 0x143   :  { %3014 = vmatpush1.bf16.msra.mxu0 %v4264_v13  ;;  %v4350_v13 = vld [vmem:[#allocation2 + $0xa64] ss:$8 sps:$4 sm:$0xff]  }
 0x144   :  { %3015 = vmatprep.subr.bf16.mxu0 %v4272_v16 }
 0x145   :  { %3055 = vmatpush1.bf16.msra.mxu1 %v4267_v15  ;;  %v639_v15 = vcombine.high %v635_v9, %v635_v9 }
 0x146   :  { %3056 = vmatprep.subr.bf16.mxu1 %v4275_v17  ;;  %v4353_v17 = vld [vmem:[#allocation2 + $0xb64] ss:$8 sps:$4 sm:$0xff]  }
 0x147   :  { %3016 = vmatpush1.bf16.msra.mxu0 %v4270_v18  ;;  %v4348_v18 = vld [vmem:[#allocation2 + $0xa60] ss:$8 sps:$4 sm:$0xff]  }
 0x148   :  { %3017 = vmatprep.subr.bf16.mxu0 %v4278_v20 }
 0x149   :  { %3057 = vmatpush1.bf16.msra.mxu1 %v4273_v19 }
 0x14a   :  { %3058 = vmatprep.subr.bf16.mxu1 %v4281_v21  ;;  %v4356_v21 = vld [vmem:[#allocation2 + $0xa54] ss:$8 sps:$4 sm:$0xff]  }
 0x14b   :  { %3018 = vmatpush1.bf16.msra.mxu0 %v4276_v22 }
 0x14c   :  { %3019 = vmatprep.subr.bf16.mxu0 %v4284_v23 }
 0x14d   :  { %3059 = vmatpush1.bf16.msra.mxu1 %v4279_v25  ;;  %v4351_v25 = vld [vmem:[#allocation2 + $0xb60] ss:$8 sps:$4 sm:$0xff]  }
 0x14e   :  { %3060 = vmatprep.subr.bf16.mxu1 %v4287_v26 }
 0x14f   :  { %3020 = vmatpush1.bf16.msra.mxu0 %v4282_v28 }
 0x150   :  { %3021 = vmatprep.subr.bf16.mxu0 %v4290_v29  ;;  %v4359_v29 = vld [vmem:[#allocation2 + $0xb54] ss:$8 sps:$4 sm:$0xff]  }
 0x151   :  { %3061 = vmatpush1.bf16.msra.mxu1 %v4285_v27  ;;  %v4354_v27 = vld [vmem:[#allocation2 + $0xa50] ss:$8 sps:$4 sm:$0xff]  }
 0x152   :  { %3062 = vmatprep.subr.bf16.mxu1 %v4293_v31 }
 0x153   :  { %3022 = vmatpush1.bf16.msra.mxu0 %v4288_v32  ;;  %v4362_v32 = vld [vmem:[#allocation2 + $0xa44] ss:$8 sps:$4 sm:$0xff]  }
 0x154   :  { %3023 = vmatprep.subr.bf16.mxu0 %v4296_v33 }
 0x155   :  { %3063 = vmatpush1.bf16.msra.mxu1 %v4291_v35  ;;  %v4357_v35 = vld [vmem:[#allocation2 + $0xb50] ss:$8 sps:$4 sm:$0xff]  }
 0x156   :  { %3064 = vmatprep.subr.bf16.mxu1 %v4299_v36 }
 0x157   :  { %3024 = vmatpush2.bf16.msra.mxu0 %v4294_v37  ;;  %v4360_v37 = vld [vmem:[#allocation2 + $0xa40] ss:$8 sps:$4 sm:$0xff]  }
 0x158   :  { %3025 = vmatprep.subr.bf16.mxu0 %v4302_v38  ;;  %v4368_v38 = vld [vmem:[#allocation2 + $0xa34] ss:$8 sps:$4 sm:$0xff]  }
 0x159   :  { %3065 = vmatpush2.bf16.msra.mxu1 %v4297_v39  ;;  %v4363_v39 = vld [vmem:[#allocation2 + $0xb40] ss:$8 sps:$4 sm:$0xff]  }
 0x15a   :  { %3066 = vmatprep.subr.bf16.mxu1 %v4305_v40  ;;  %v4371_v40 = vld [vmem:[#allocation2 + $0xb34] ss:$8 sps:$4 sm:$0xff]  }
 0x15b   :  { %3026 = vmatpush2.bf16.msra.mxu0 %v4300_v41  ;;  %v4366_v41 = vld [vmem:[#allocation2 + $0xa30] ss:$8 sps:$4 sm:$0xff]  }
 0x15c   :  { %3027 = vmatprep.subr.bf16.mxu0 %v4308_v43  ;;  %v4374_v43 = vld [vmem:[#allocation2 + $0xa24] ss:$8 sps:$4 sm:$0xff]  }
 0x15d   :  { %3067 = vmatpush2.bf16.msra.mxu1 %v4303_v5  ;;  %v4369_v5 = vld [vmem:[#allocation2 + $0xb30] ss:$8 sps:$4 sm:$0xff]  }
 0x15e   :  { %3068 = vmatprep.subr.bf16.mxu1 %v4311_v44  ;;  %v4377_v44 = vld [vmem:[#allocation2 + $0xb24] ss:$8 sps:$4 sm:$0xff]  }
 0x15f   :  { %3028 = vmatpush2.bf16.msra.mxu0 %v4306_v45  ;;  %v4372_v45 = vld [vmem:[#allocation2 + $0xa20] ss:$8 sps:$4 sm:$0xff]  }
 0x160   :  { %3029 = vmatprep.subr.bf16.mxu0 %v4314_v46  ;;  %v4380_v46 = vld [vmem:[#allocation2 + $0xa14] ss:$8 sps:$4 sm:$0xff]  }
 0x161   :  { %3069 = vmatpush2.bf16.msra.mxu1 %v4309_v47  ;;  %v4375_v47 = vld [vmem:[#allocation2 + $0xb20] ss:$8 sps:$4 sm:$0xff]  }
 0x162   :  { %3070 = vmatprep.subr.bf16.mxu1 %v4317_v49  ;;  %v4383_v49 = vld [vmem:[#allocation2 + $0xb14] ss:$8 sps:$4 sm:$0xff]  }
 0x163   :  { %3030 = vmatpush2.bf16.msra.mxu0 %v4312_v50  ;;  %v4378_v50 = vld [vmem:[#allocation2 + $0xa10] ss:$8 sps:$4 sm:$0xff]  }
 0x164   :  { %3031 = vmatprep.subr.bf16.mxu0 %v4320_v51  ;;  %v4386_v51 = vld [vmem:[#allocation2 + $0xa04] ss:$8 sps:$4 sm:$0xff]  }
 0x165   :  { %3071 = vmatpush2.bf16.msra.mxu1 %v4315_v52  ;;  %v4381_v52 = vld [vmem:[#allocation2 + $0xb10] ss:$8 sps:$4 sm:$0xff]  }
 0x166   :  { %3072 = vmatprep.subr.bf16.mxu1 %v4323_v53  ;;  %v4389_v53 = vld [vmem:[#allocation2 + $0xb04] ss:$8 sps:$4 sm:$0xff]  }
 0x167   :  { %3032 = vmatpush2.bf16.msra.mxu0 %v4318_v54  ;;  %v4384_v54 = vld [vmem:[#allocation2 + $0xa00] ss:$8 sps:$4 sm:$0xff]  }
 0x168   :  { %3033 = vmatprep.subr.bf16.mxu0 %v4326_v55  ;;  %v4392_v55 = vld [vmem:[#allocation2 + $0xaf4] ss:$8 sps:$4 sm:$0xff]  }
 0x169   :  { %3073 = vmatpush2.bf16.msra.mxu1 %v4321_v56  ;;  %v4387_v56 = vld [vmem:[#allocation2 + $0xb00] ss:$8 sps:$4 sm:$0xff]  }
 0x16a   :  { %3074 = vmatprep.subr.bf16.mxu1 %v4329_v24  ;;  %v4390_v24 = vld [vmem:[#allocation2 + $0xaf0] ss:$8 sps:$4 sm:$0xff]  }
 0x16b   :  { %3034 = vmatpush2.bf16.msra.mxu0 %v4324_v58  ;;  %v4398_v58 = vld [vmem:[#allocation2 + $0xae4] ss:$8 sps:$4 sm:$0xff]  }
 0x16c   :  { %3035 = vmatprep.subr.bf16.mxu0 %v4332_v59  ;;  %v4393_v59 = vld [vmem:[#allocation2 + $0xbf0] ss:$8 sps:$4 sm:$0xff]  }
 0x16d   :  { %3075 = vmatpush2.bf16.msra.mxu1 %v4327_v42  ;;  %v4401_v42 = vld [vmem:[#allocation2 + $0xbe4] ss:$8 sps:$4 sm:$0xff]  }
 0x16e   :  { %3076 = vmatprep.subr.bf16.mxu1 %v4335_v61  ;;  %v4396_v61 = vld [vmem:[#allocation2 + $0xae0] ss:$8 sps:$4 sm:$0xff]  }
 0x16f   :  { %3036 = vmatpush2.bf16.msra.mxu0 %v4330_v62  ;;  %v4404_v62 = vld [vmem:[#allocation2 + $0xad4] ss:$8 sps:$4 sm:$0xff]  }
 0x170   :  { %3037 = vmatprep.subr.bf16.mxu0 %v4338_v63  ;;  %v4399_v63 = vld [vmem:[#allocation2 + $0xbe0] ss:$8 sps:$4 sm:$0xff]  }
 0x171   :  { %3077 = vmatpush2.bf16.msra.mxu1 %v4333_v0  ;;  %v4407_v0 = vld [vmem:[#allocation2 + $0xbd4] ss:$8 sps:$4 sm:$0xff]  }
 0x172   :  { %3078 = vmatprep.subr.bf16.mxu1 %v4341_v2  ;;  %v4410_v2 = vld [vmem:[#allocation2 + $0xac4] ss:$8 sps:$4 sm:$0xff]  }
 0x173   :  { %3038 = vmatpush2.bf16.msra.mxu0 %v4336_v3  ;;  %v4405_v3 = vld [vmem:[#allocation2 + $0xbd0] ss:$8 sps:$4 sm:$0xff]  }
 0x174   :  { %3089 = vmatprep.subr.bf16.mxu0 %v4344_v6  ;;  %v4408_v6 = vld [vmem:[#allocation2 + $0xac0] ss:$8 sps:$4 sm:$0xff]  }
 0x175   :  { %3079 = vmatpush2.bf16.msra.mxu1 %v4339_v8  ;;  %v4416_v8 = vld [vmem:[#allocation2 + $0xab4] ss:$8 sps:$4 sm:$0xff]  }
 0x176   :  { %v2795_v16 = vpop.f32.mrf.mxu0  ;;  %3040 = vmatmul.mubr.bf16.vlgmr.msra.gmra.mxu0 %v614_v4  ;;  %3130 = vmatprep.subr.bf16.mxu1 %v4347_v10  ;;  %v4413_v4 = vld [vmem:[#allocation2 + $0xbc4] ss:$8 sps:$4 sm:$0xff]   ;;  %v4419_v10 = vld [vmem:[#allocation2 + $0xbb4] ss:$8 sps:$4 sm:$0xff]  }
 0x177   :  { %v2796_v34 = vadd.f32 %v2795_v16, %v4697_v1  ;;  %3090 = vmatpush1.bf16.msra.mxu0 %v4342_v11  ;;  %3121 = vmatprep.mubr.bf16.mxu0 %v635_v9  ;;  %v4411_v9 = vld [vmem:[#allocation2 + $0xbc0] ss:$8 sps:$4 sm:$0xff]   ;;  %v4414_v11 = vld [vmem:[#allocation2 + $0xab0] ss:$8 sps:$4 sm:$0xff]   ;;  %v4428_v16 = vld [vmem:[#allocation2 + $0xa94] ss:$8 sps:$4 sm:$0xff]  }
 0x178   :  { %v2797_v19 = vpop.f32.mrf.mxu0  ;;  %v2836_v20 = vpop.f32.mrf.mxu1  ;;  %3081 = vmatmul.mubr.bf16.vlgmr.msra.gmra.mxu1 %v636_v12  ;;  %3091 = vmatprep.subr.bf16.mxu0 %v4350_v13  ;;  %v4422_v12 = vld [vmem:[#allocation2 + $0xaa4] ss:$8 sps:$4 sm:$0xff]   ;;  %v4417_v13 = vld [vmem:[#allocation2 + $0xbb0] ss:$8 sps:$4 sm:$0xff]  }
 0x179   :  { %v2798_v22 = vadd.f32 %v2797_v19, %v4699_v7  ;;  %v4713_v23 = vadd.f32 %v2836_v20, %v2796_v34  ;;  %3131 = vmatpush1.bf16.msra.mxu1 %v4345_v14  ;;  %3162 = vmatprep.mubr.bf16.mxu1 %v639_v15  ;;  %v4365_v7 = vld [vmem:[#allocation2 + $0xb44] ss:$8 sps:$4 sm:$0xff]   ;;  %v4420_v15 = vld [vmem:[#allocation2 + $0xaa0] ss:$8 sps:$4 sm:$0xff]   ;;  %v4431_v34 = vld [vmem:[#allocation2 + $0xb94] ss:$8 sps:$4 sm:$0xff]  }
 0x17a   :  { %v2799_v26 = vpop.f32.mrf.mxu0  ;;  %v2838_v28 = vpop.f32.mrf.mxu1  ;;  %3132 = vmatprep.subr.bf16.mxu1 %v4353_v17  ;;  %v4425_v14 = vld [vmem:[#allocation2 + $0xba4] ss:$8 sps:$4 sm:$0xff]   ;;  %v4423_v17 = vld [vmem:[#allocation2 + $0xba0] ss:$8 sps:$4 sm:$0xff]   ;;  %v4429_v20 = vld [vmem:[#allocation2 + $0xb90] ss:$8 sps:$4 sm:$0xff]  }
 0x17b   :  { %v4715_v1 = vadd.f32 %v2838_v28, %v2798_v22  ;;  %3092 = vmatpush1.bf16.msra.mxu0 %v4348_v18  ;;  %v4426_v18 = vld [vmem:[#allocation2 + $0xa90] ss:$8 sps:$4 sm:$0xff]   ;;  %v4434_v19 = vld [vmem:[#allocation2 + $0xa84] ss:$8 sps:$4 sm:$0xff]   ;;  %v4432_v22 = vld [vmem:[#allocation2 + $0xa80] ss:$8 sps:$4 sm:$0xff]  }
 0x17c   :  { %v2800_v31 = vpop.f32.mrf.mxu0  ;;  %3093 = vmatprep.subr.bf16.mxu0 %v4356_v21  ;;  %v2840_v33 = vpop.f32.mrf.mxu1  ;;  %v4437_v21 = vld [vmem:[#allocation2 + $0xb84] ss:$8 sps:$4 sm:$0xff]   ;;  %v4441_v26 = vld [vmem:[#allocation2 + $0xc74] ss:$8 sps:$4 sm:$0xff]   ;;  %v4435_v28 = vld [vmem:[#allocation2 + $0xb80] ss:$8 sps:$4 sm:$0xff]  }
 0x17d   :  { %3133 = vmatpush1.bf16.msra.mxu1 %v4351_v25  ;;  %v621_v25 = vrot.slane %v4704_v60, %v4643_v48  ;;  %v4444_v31 = vld [vmem:[#allocation2 + $0xc64] ss:$8 sps:$4 sm:$0xff]  }
 0x17e   :  { %3134 = vmatprep.subr.bf16.mxu1 %v4359_v29  ;;  %v2841_v36 = vpop.f32.mrf.mxu1  ;;  %v4439_v29 = vld [vmem:[#allocation2 + $0xc70] ss:$8 sps:$4 sm:$0xff]  }
 0x17f   :  { %3094 = vmatpush1.bf16.msra.mxu0 %v4354_v27  ;;  %v637_v27 = vcombine.high %v621_v25, %v621_v25 }
 0x180   :  { %3095 = vmatprep.subr.bf16.mxu0 %v4362_v32 }
 0x181   :  { %3135 = vmatpush1.bf16.msra.mxu1 %v4357_v35  ;;  %v4442_v35 = vld [vmem:[#allocation2 + $0xc60] ss:$8 sps:$4 sm:$0xff]  }
 0x182   :  { %3136 = vmatprep.subr.bf16.mxu1 %v4365_v7  ;;  %v4596_v7 = vmov 0  }
 0x183   :  { %3096 = vmatpush1.bf16.msra.mxu0 %v4360_v37  ;;  %v4447_v37 = vld [vmem:[#allocation2 + $0xc54] ss:$8 sps:$4 sm:$0xff]  }
 0x184   :  { %3097 = vmatprep.subr.bf16.mxu0 %v4368_v38 }
 0x185   :  { %3137 = vmatpush1.bf16.msra.mxu1 %v4363_v39 }
 0x186   :  { %3138 = vmatprep.subr.bf16.mxu1 %v4371_v40 }
 0x187   :  { %3098 = vmatpush1.bf16.msra.mxu0 %v4366_v41 }
 0x188   :  { %3099 = vmatprep.subr.bf16.mxu0 %v4374_v43 }
 0x189   :  { %3139 = vmatpush1.bf16.msra.mxu1 %v4369_v5  ;;  %v4445_v5 = vld [vmem:[#allocation2 + $0xc50] ss:$8 sps:$4 sm:$0xff]  }
 0x18a   :  { %3140 = vmatprep.subr.bf16.mxu1 %v4377_v44 }
 0x18b   :  { %3100 = vmatpush1.bf16.msra.mxu0 %v4372_v45 }
 0x18c   :  { %3101 = vmatprep.subr.bf16.mxu0 %v4380_v46 }
 0x18d   :  { %3141 = vmatpush1.bf16.msra.mxu1 %v4375_v47  ;;  %v4448_v47 = vld [vmem:[#allocation2 + $0xc40] ss:$8 sps:$4 sm:$0xff]  }
 0x18e   :  { %3142 = vmatprep.subr.bf16.mxu1 %v4383_v49  ;;  %v4453_v49 = vld [vmem:[#allocation2 + $0xc34] ss:$8 sps:$4 sm:$0xff]  }
 0x18f   :  { %3102 = vmatpush1.bf16.msra.mxu0 %v4378_v50  ;;  %v4451_v50 = vld [vmem:[#allocation2 + $0xc30] ss:$8 sps:$4 sm:$0xff]  }
 0x190   :  { %3103 = vmatprep.subr.bf16.mxu0 %v4386_v51  ;;  %v4456_v51 = vld [vmem:[#allocation2 + $0xc24] ss:$8 sps:$4 sm:$0xff]  }
 0x191   :  { %3143 = vmatpush1.bf16.msra.mxu1 %v4381_v52  ;;  %v4459_v52 = vld [vmem:[#allocation2 + $0xc14] ss:$8 sps:$4 sm:$0xff]  }
 0x192   :  { %3144 = vmatprep.subr.bf16.mxu1 %v4389_v53  ;;  %v4457_v53 = vld [vmem:[#allocation2 + $0xc10] ss:$8 sps:$4 sm:$0xff]  }
 0x193   :  { %3104 = vmatpush1.bf16.msra.mxu0 %v4384_v54  ;;  %v4462_v54 = vld [vmem:[#allocation2 + $0xc04] ss:$8 sps:$4 sm:$0xff]  }
 0x194   :  { %3105 = vmatprep.subr.bf16.mxu0 %v4392_v55  ;;  %v4460_v55 = vld [vmem:[#allocation2 + $0xc00] ss:$8 sps:$4 sm:$0xff]  }
 0x195   :  { %3145 = vmatpush1.bf16.msra.mxu1 %v4387_v56  ;;  %v3409_v56 = vld.sshfl [vmem:[%s4728_s0 + $0x18] sm:$0x1 pattern:$0x75316420]  ;;  %s4597_s0 = smov [#allocation10]  }
 0x196   :  { %3146 = vmatprep.subr.bf16.mxu1 %v4395_v57  ;;  %v653_v57 = vrot.slane %v3409_v56, %v4643_v48  ;;  %v4466_v48 = vld [vmem:[#allocation7 + $0x30] sm:$0xff]   ;;  %s3398_s22 = sshll.u32 %s4597_s0, 4  ;;  %s3399_s22 = int_to_ptr.vmem [resolvable:$true] %s3398_s22 }
 0x197   :  { %3106 = vmatpush2.bf16.msra.mxu0 %v4390_v24  ;;  %s4559_s23 = scalar_lea.vmem %s3399_s22, 32  ;;  %p4564_p7 = scmp.lt.s32.totalorder %s3399_s22, %s3399_s22 }
 0x198   :  { %3107 = vmatprep.subr.bf16.mxu0 %v4398_v58  ;;  %p4560_p6 = scmp.ne.s32.totalorder %s3399_s22, %s4559_s23  ;;  %p4565_p8 = scmp.lt.s32.totalorder %s4559_s23, %s4559_s23 }
 0x199   :  { %3147 = vmatpush2.bf16.msra.mxu1 %v4393_v59 }
 0x19a   :  { %3148 = vmatprep.subr.bf16.mxu1 %v4401_v42  ;;  %p4566_p9 = por %p4565_p8, %p4564_p7 }
 0x19b   :  { %3108 = vmatpush2.bf16.msra.mxu0 %v4396_v61 }
 0x19c   :  { %3109 = vmatprep.subr.bf16.mxu0 %v4404_v62  ;;  %p4567_p10 = pnand %p4566_p9, %p4560_p6 }
 0x19d   :  { %3149 = vmatpush2.bf16.msra.mxu1 %v4399_v63 }
 0x19e   :  { %3150 = vmatprep.subr.bf16.mxu1 %v4407_v0 }
 0x19f   :  { %3110 = vmatpush2.bf16.msra.mxu0 %v4402_v30 }
 0x1a0   :  { %3111 = vmatprep.subr.bf16.mxu0 %v4410_v2 }
 0x1a1   :  { %3151 = vmatpush2.bf16.msra.mxu1 %v4405_v3 }
 0x1a2   :  { %3152 = vmatprep.subr.bf16.mxu1 %v4413_v4  ;;  %v4463_v4 = vld [vmem:[#allocation7 + $0x78] sm:$0xff]  }
 0x1a3   :  { %3112 = vmatpush2.bf16.msra.mxu0 %v4408_v6  ;;  %v4464_v6 = vld [vmem:[#allocation7 + $0x38] sm:$0xff]  }
 0x1a4   :  { %3113 = vmatprep.subr.bf16.mxu0 %v4416_v8  ;;  %v4465_v8 = vld [vmem:[#allocation7 + $0x70] sm:$0xff]  }
 0x1a5   :  { %3153 = vmatpush2.bf16.msra.mxu1 %v4411_v9 }
 0x1a6   :  { %3154 = vmatprep.subr.bf16.mxu1 %v4419_v10  ;;  %v4467_v10 = vld [vmem:[#allocation7 + $0x68] sm:$0xff]  }
 0x1a7   :  { %3114 = vmatpush2.bf16.msra.mxu0 %v4414_v11  ;;  %v4468_v11 = vld [vmem:[#allocation7 + $0x28] sm:$0xff]  }
 0x1a8   :  { %3115 = vmatprep.subr.bf16.mxu0 %v4422_v12  ;;  %v4469_v12 = vld [vmem:[#allocation7 + $0x60] sm:$0xff]  }
 0x1a9   :  { %3155 = vmatpush2.bf16.msra.mxu1 %v4417_v13  ;;  %v4470_v13 = vld [vmem:[#allocation7 + $0x20] sm:$0xff]  }
 0x1aa   :  { %3156 = vmatprep.subr.bf16.mxu1 %v4425_v14  ;;  %v4471_v14 = vld [vmem:[#allocation7 + $0x58] sm:$0xff]  }
 0x1ab   :  { %3116 = vmatpush2.bf16.msra.mxu0 %v4420_v15  ;;  %v4472_v15 = vld [vmem:[#allocation7 + $0x18] sm:$0xff]  }
 0x1ac   :  { %3117 = vmatprep.subr.bf16.mxu0 %v4428_v16  ;;  %v4473_v16 = vld [vmem:[#allocation7 + $0x50] sm:$0xff]  }
 0x1ad   :  { %3157 = vmatpush2.bf16.msra.mxu1 %v4423_v17  ;;  %v4474_v17 = vld [vmem:[#allocation7 + $0x10] sm:$0xff]  }
 0x1ae   :  { %3158 = vmatprep.subr.bf16.mxu1 %v4431_v34  ;;  %v4475_v34 = vld [vmem:[#allocation7 + $0x48] sm:$0xff]  }
 0x1af   :  { %3118 = vmatpush2.bf16.msra.mxu0 %v4426_v18  ;;  %v4476_v18 = vld [vmem:[#allocation7 + $0x8] sm:$0xff]  }
 0x1b0   :  { %3119 = vmatprep.subr.bf16.mxu0 %v4434_v19  ;;  %v4477_v19 = vld [vmem:[#allocation7 + $0x40] sm:$0xff]  }
 0x1b1   :  { %3159 = vmatpush2.bf16.msra.mxu1 %v4429_v20  ;;  %v4478_v20 = vld [vmem:[#allocation7] sm:$0xff]  }
 0x1b2   :  { %3160 = vmatprep.subr.bf16.mxu1 %v4437_v21 }
 0x1b3   :  { %3120 = vmatpush2.bf16.msra.mxu0 %v4432_v22 }
 0x1b4   :  { %3171 = vmatprep.subr.bf16.mxu0 %v4441_v26 }
 0x1b5   :  { %3161 = vmatpush2.bf16.msra.mxu1 %v4435_v28 }
 0x1b6   :  { %v2877_v32 = vpop.f32.mrf.mxu0  ;;  %3122 = vmatmul.mubr.bf16.vlgmr.msra.gmra.mxu0 %v621_v25  ;;  %3827 = vmatprep.subr.bf16.mxu1 %v4463_v4 }
 0x1b7   :  { %v2878_v33 = vadd.f32 %v2877_v32, %v4713_v23  ;;  %3172 = vmatpush1.bf16.msra.mxu0 %v4439_v29  ;;  %3203 = vmatprep.mubr.bf16.mxu0 %v4596_v7  ;;  %v4450_v23 = vld [vmem:[#allocation2 + $0xc44] ss:$8 sps:$4 sm:$0xff]  }
 0x1b8   :  { %v2879_v36 = vpop.f32.mrf.mxu0  ;;  %v2918_v60 = vpop.f32.mrf.mxu1  ;;  %3163 = vmatmul.mubr.bf16.vlgmr.msra.gmra.mxu1 %v637_v27  ;;  %3173 = vmatprep.subr.bf16.mxu0 %v4444_v31 }
 0x1b9   :  { %v2880_v38 = vadd.f32 %v2879_v36, %v4715_v1  ;;  %v2919_v39 = vadd.f32 %v2918_v60, %v2878_v33  ;;  %v4454_v1 = vld [vmem:[#allocation2 + $0xc20] ss:$8 sps:$4 sm:$0xff]   ;;  %3828 = vmatpush3.bf16.msra.mxu1 %v4464_v6 }
 0x1ba   :  { %v2881_v40 = vpop.f32.mrf.mxu0  ;;  %v2920_v41 = vpop.f32.mrf.mxu1  ;;  %3829 = vmatprep.subr.bf16.mxu1 %v4465_v8 }
 0x1bb   :  { %v2921_v43 = vadd.f32 %v2920_v41, %v2880_v38  ;;  %3174 = vmatpush1.bf16.msra.mxu0 %v4442_v35 }
 0x1bc   :  { %v2882_v44 = vpop.f32.mrf.mxu0  ;;  %3175 = vmatprep.subr.bf16.mxu0 %v4447_v37  ;;  %v2922_v45 = vpop.f32.mrf.mxu1 }
 0x1bd   :  { %3830 = vmatpush3.bf16.msra.mxu1 %v4466_v48 }
 0x1be   :  { %v2923_v46 = vpop.f32.mrf.mxu1  ;;  %3831 = vmatprep.subr.bf16.mxu1 %v4467_v10 }
 0x1bf   :  { %3176 = vmatpush1.bf16.msra.mxu0 %v4445_v5 }
 0x1c0   :  { %3177 = vmatprep.subr.bf16.mxu0 %v4450_v23 }
 0x1c1   :  { %3832 = vmatpush3.bf16.msra.mxu1 %v4468_v11 }
 0x1c2   :  { %3833 = vmatprep.subr.bf16.mxu1 %v4469_v12 }
 0x1c3   :  { %3178 = vmatpush1.bf16.msra.mxu0 %v4448_v47 }
 0x1c4   :  { %3179 = vmatprep.subr.bf16.mxu0 %v4453_v49 }
 0x1c5   :  { %3834 = vmatpush3.bf16.msra.mxu1 %v4470_v13 }
 0x1c6   :  { %3835 = vmatprep.subr.bf16.mxu1 %v4471_v14 }
 0x1c7   :  { %3180 = vmatpush1.bf16.msra.mxu0 %v4451_v50 }
 0x1c8   :  { %3181 = vmatprep.subr.bf16.mxu0 %v4456_v51 }
 0x1c9   :  { %3836 = vmatpush3.bf16.msra.mxu1 %v4472_v15 }
 0x1ca   :  { %3837 = vmatprep.subr.bf16.mxu1 %v4473_v16 }
 0x1cb   :  { %3182 = vmatpush1.bf16.msra.mxu0 %v4454_v1 }
 0x1cc   :  { %3183 = vmatprep.subr.bf16.mxu0 %v4459_v52 }
 0x1cd   :  { %3838 = vmatpush3.bf16.msra.mxu1 %v4474_v17 }
 0x1ce   :  { %3839 = vmatprep.subr.bf16.mxu1 %v4475_v34 }
 0x1cf   :  { %3184 = vmatpush1.bf16.msra.mxu0 %v4457_v53 }
 0x1d0   :  { %3185 = vmatprep.subr.bf16.mxu0 %v4462_v54 }
 0x1d1   :  { %3840 = vmatpush3.bf16.msra.mxu1 %v4476_v18 }
 0x1d2   :  { %3841 = vmatprep.subr.bf16.mxu1 %v4477_v19 }
 0x1d3   :  { %3186 = vmatpush1.bf16.msra.mxu0 %v4460_v55 }
 0x1d5   :  { %3842 = vmatpush3.bf16.msra.mxu1 %v4478_v20 }
 0x1d6   :  { %3204 = vmatmul.mubr.bf16.vlgmr.msra.gmra.mxu0 %v653_v57  ;;  %v3810_v57 = vld [vmem:[#allocation8] ss:$0 sm:$0xff] }
 0x1f6   :  { %v2959_v24 = vpop.f32.mrf.mxu0 }
 0x1f7   :  { %v2960_v58 = vadd.f32 %v2959_v24, %v2919_v39 }
 0x1f8   :  { %v2961_v59 = vpop.f32.mrf.mxu0  ;;  %v3000_v42 = vpop.f32.mrf.mxu1 }
 0x1f9   :  { %v2962_v61 = vadd.f32 %v2961_v59, %v2921_v43  ;;  %v3001_v62 = vadd.f32 %v3000_v42, %v2960_v58 }
 0x1fa   :  { %v2963_v63 = vpop.f32.mrf.mxu0  ;;  %v3002_v0 = vpop.f32.mrf.mxu1 }
 0x1fb   :  { %v3003_v30 = vadd.f32 %v3002_v0, %v2962_v61 }
 0x1fc   :  { %v2964_v2 = vpop.f32.mrf.mxu0  ;;  %v3004_v3 = vpop.f32.mrf.mxu1 }
 0x1fe   :  { %v3005_v9 = vpop.f32.mrf.mxu1 }
 0x236   :  { %v3041_v21 = vpop.f32.mrf.mxu0 }
 0x237   :  { %v3042_v22 = vadd.f32 %v3041_v21, %v3001_v62 }
 0x238   :  { %v3043_v25 = vpop.f32.mrf.mxu0  ;;  %v3082_v26 = vpop.f32.mrf.mxu1 }
 0x239   :  { %v3044_v28 = vadd.f32 %v3043_v25, %v3003_v30  ;;  %v3083_v29 = vadd.f32 %v3082_v26, %v3042_v22 }
 0x23a   :  { %v3045_v27 = vpop.f32.mrf.mxu0  ;;  %v3084_v31 = vpop.f32.mrf.mxu1 }
 0x23b   :  { %v3085_v32 = vadd.f32 %v3084_v31, %v3044_v28 }
 0x23c   :  { %v3046_v33 = vpop.f32.mrf.mxu0  ;;  %v3086_v35 = vpop.f32.mrf.mxu1 }
 0x23e   :  { %v3087_v7 = vpop.f32.mrf.mxu1 }
 0x276   :  { %v3123_v36 = vpop.f32.mrf.mxu0 }
 0x277   :  { %v3124_v5 = vadd.f32 %v3123_v36, %v3083_v29 }
 0x278   :  { %v3125_v60 = vpop.f32.mrf.mxu0  ;;  %v3164_v37 = vpop.f32.mrf.mxu1 }
 0x279   :  { %v3126_v44 = vadd.f32 %v3125_v60, %v3085_v32  ;;  %v3165_v23 = vadd.f32 %v3164_v37, %v3124_v5 }
 0x27a   :  { %v3127_v38 = vpop.f32.mrf.mxu0  ;;  %v3166_v39 = vpop.f32.mrf.mxu1 }
 0x27b   :  { %v3167_v46 = vadd.f32 %v3166_v39, %v3126_v44 }
 0x27c   :  { %v3128_v40 = vpop.f32.mrf.mxu0  ;;  %v3168_v41 = vpop.f32.mrf.mxu1 }
 0x27e   :  { %v3169_v43 = vpop.f32.mrf.mxu1 }
 0x296   :  { %v3205_v45 = vpop.f32.mrf.mxu0 }
 0x297   :  { %v3206_v47 = vadd.f32 %v3205_v45, %v3165_v23 }
 0x298   :  { %v3207_v49 = vpop.f32.mrf.mxu0 }
 0x299   :  { %v3208_v50 = vadd.f32 %v3207_v49, %v3167_v46  ;;  %v3212_v51 = vmax.f32 %v3206_v47, 0.0 }
 0x29a   :  { %v3209_v1 = vpop.f32.mrf.mxu0 }
 0x29b   :  { %v3213_v52 = vmax.f32 %v3208_v50, 0.0  ;;  %v3214_v55 = vpack.c.bf16 %v3212_v51, %v3212_v51 }
 0x29c   :  { %v3210_v53 = vpop.f32.mrf.mxu0 }
 0x29d   :  { %v3215_v54 = vpack.c.bf16 %v3213_v52, %v3213_v52 }
 0x29f   :  { %3383 = vmatprep.mubr.bf16.mxu1 %v3215_v54 }
 0x2a0   :  { %3384 = vmatmul.mubr.bf16.vlgmr.msra.gmra.mxu1 %v3214_v55 }
 0x360   :  { %v3843_v56 = vpop.f32.mrf.mxu1 }
 0x362   :  { %v3844_v24 = vpop.f32.mrf.mxu1 }
 0x363   :  { %v3845_v58 = vadd.f32 %v3844_v24, %v3843_v56 }
 0x364   :  { %v3846_v59 = vpop.f32.mrf.mxu1 }
 0x365   :  { %v3386_v42 = vadd.f32 %v3845_v58, %v3810_v57 }
 0x366   :  { %v3847_v61 = vpop.f32.mrf.mxu1 }
 0x367   :  { %3391 = vst [vmem:[#allocation10] sm:$0x3] %v3386_v42 }
 0x368   :  { %4570 = shalt.err (!%p4567_p10)
}
 0x369   :  { %3401 = dma.vmem_to_hbm [thread:$0]  %s3399_s22, 32, %s4733_s5, [#allocation4]  }
 0x36a   :  { %4585 = dma.done.wait [#allocation4], 32  }
 0x36b   :  { %4586 = vsyncadd [#allocation4], 4294967264 }
 0x36c   :  { %3405 = vsyncpa [#allocation3], 1 }
 0x36d   :  { %3406 = vsyncpa [#allocation6], 1 }
 0x36e   :  { %3407 = vsyncpa [#allocation9], 1 }
 0x36f   :  { %3408 = vsyncpa [#allocation4], 1 }

</bundles_post_ra>
